<compile_context>
chip_gen: v7x
topology: tpu7x:2x2x1
jax: 0.10.0
libtpu: 0.0.40
codegen_flags: <defaults>
</compile_context>

<pallas_src>
import math
from functools import partial

import numpy as np
import jax
import jax.numpy as jnp
from jax.experimental import pallas as pl
from jax.experimental.pallas import tpu as pltpu


# ----------------------------- synthetic config ------------------------------
class Cfg:
    IMAGE_SIZE = 64
    NUM_CLASSES = 4
    CENTER_VARIANCE = 0.1
    SIZE_VARIANCE = 0.2
    FEATURE_MAPS = (8, 4)            # spatial side of each feature map
    STRIDES = (8, 16)
    MIN_SIZES = (16, 32)
    MAX_SIZES = (32, 48)
    ASPECT_RATIOS = ((2,), (2,))     # boxes/location = 2 + 2*len(ratios) = 4
    BOXES_PER_LOCATION = (4, 4)
    OUT_CHANNELS = (32, 32)
    CLIP = True


# ----------------------------- PriorBox (host-side constant) -----------------
def prior_box(cfg):
    priors = []
    for k, fm in enumerate(cfg.FEATURE_MAPS):
        scale = cfg.IMAGE_SIZE / cfg.STRIDES[k]
        for j in range(fm):
            for i in range(fm):
                cx = (i + 0.5) / scale
                cy = (j + 0.5) / scale
                s = cfg.MIN_SIZES[k] / cfg.IMAGE_SIZE
                priors.append([cx, cy, s, s])
                s2 = math.sqrt(cfg.MIN_SIZES[k] * cfg.MAX_SIZES[k]) / cfg.IMAGE_SIZE
                priors.append([cx, cy, s2, s2])
                for ratio in cfg.ASPECT_RATIOS[k]:
                    r = math.sqrt(ratio)
                    priors.append([cx, cy, s * r, s / r])
                    priors.append([cx, cy, s / r, s * r])
    priors = np.asarray(priors, dtype=np.float32)
    if cfg.CLIP:
        priors = np.clip(priors, 0.0, 1.0)
    return jnp.asarray(priors)


# ----------------------------- in-kernel helpers ------------------------------
def _decode(y, pri, *, nc, bpl, center_var, size_var):
    """softmax over classes + convert_locations_to_boxes + center->corner.

    y:   (M, bpl*nc + bpl*4)  columns = [cls (box-major) | reg (box-major)]
    pri: (M, bpl*4)           columns = box-major (cx, cy, w, h)
    returns (M, bpl*(nc+4))   columns = box-major (scores..., x0, y0, x1, y1)
    """
    dets = []
    for k in range(bpl):
        lg = y[:, k * nc:(k + 1) * nc]
        m = jnp.max(lg, axis=-1, keepdims=True)
        e = jnp.exp(lg - m)
        sc = e / jnp.sum(e, axis=-1, keepdims=True)
        lo = y[:, bpl * nc + 4 * k: bpl * nc + 4 * (k + 1)]   # [dcx, dcy, dw, dh]
        pk = pri[:, 4 * k:4 * (k + 1)]
        cxcy = lo[:, :2] * center_var * pk[:, 2:] + pk[:, :2]
        wh = jnp.exp(lo[:, 2:] * size_var) * pk[:, 2:]
        dets.append(jnp.concatenate([sc, cxcy - 0.5 * wh, cxcy + 0.5 * wh], axis=-1))
    return jnp.concatenate(dets, axis=-1)


# ----------------------------- fused Pallas kernel ----------------------------
def _fused_ssd_head_kernel(x0p_ref, x1_ref, dww_ref, dwb_ref, pw0_ref, pwb0_ref,
                           w1_ref, b1_ref, pri0_ref, pri1_ref, out_ref,
                           *, B, H0, W0, N1, nc, bpl, center_var, size_var):
    # ---- level 0: SSDLite SeparableConv2d, cls & reg fused via channel dup ----
    xp = x0p_ref[...]                         # (B, H0+2, W0+2, 2C)  zero-padded
    dww = dww_ref[...]                        # (3, 3, 2C)  BN scale pre-folded
    two_c = xp.shape[-1]
    acc = jnp.zeros((B, H0, W0, two_c), jnp.float32)
    for dy in range(3):                       # depthwise 3x3, stride 1, pad 1
        for dx in range(3):
            acc = acc + xp[:, dy:dy + H0, dx:dx + W0, :] * dww[dy, dx]
    acc = acc + dwb_ref[...]                  # folded (dw bias, BN bias)
    acc = jnp.clip(acc, 0.0, 6.0)             # ReLU6
    acc2d = acc.reshape(B * H0 * W0, two_c)   # batch folded into M
    # block-diagonal pointwise 1x1 (cls | reg) on the MXU: bf16 ops, f32 acc
    y0 = jnp.dot(acc2d.astype(jnp.bfloat16), pw0_ref[...].astype(jnp.bfloat16),
                 preferred_element_type=jnp.float32) + pwb0_ref[...]

    # ---- level 1: plain 1x1 Conv2d head, cls | reg merged along Cout ----------
    y1 = jnp.dot(x1_ref[...].astype(jnp.bfloat16), w1_ref[...].astype(jnp.bfloat16),
                 preferred_element_type=jnp.float32) + b1_ref[...]

    # ---- post-processing: softmax + box decode + concat -----------------------
    det0 = _decode(y0, pri0_ref[...], nc=nc, bpl=bpl,
                   center_var=center_var, size_var=size_var)   # (B*H0*W0, 32)
    det1 = _decode(y1, pri1_ref[...], nc=nc, bpl=bpl,
                   center_var=center_var, size_var=size_var)   # (B*N1, 32)

    # lane-contiguous, sublane-aligned stores into one (B, locs, 32) slab
    out_ref[:, :H0 * W0, :] = det0.reshape(B, H0 * W0, det0.shape[-1])
    out_ref[:, H0 * W0:, :] = det1.reshape(B, N1, det1.shape[-1])


# ----------------------------- SSDBoxHead.forward -----------------------------
def ssd_box_head_forward(features_nchw, params, priors, cfg):
    assert len(features_nchw) == 2
    B = features_nchw[0].shape[0]
    H0, H1 = cfg.FEATURE_MAPS
    C = cfg.OUT_CHANNELS[0]
    nc, bpl = cfg.NUM_CLASSES, cfg.BOXES_PER_LOCATION[0]
    n_loc0, n_loc1 = H0 * H0, H1 * H1

    # input prep (tiny XLA glue, fuses into one op per level):
    # NCHW->NHWC, duplicate channels so cls & reg depthwise run in one pass,
    # zero-pad the 3x3 halo once (shared by both heads).
    x0 = jnp.transpose(features_nchw[0], (0, 2, 3, 1))
    x0 = jnp.concatenate([x0, x0], axis=-1)                       # (B,H0,W0,2C)
    x0p = jnp.pad(x0, ((0, 0), (1, 1), (1, 1), (0, 0)))
    x1 = jnp.transpose(features_nchw[1], (0, 2, 3, 1)).reshape(B * n_loc1, C)

    # one-time parameter folding / merging (eval-mode BN folded into depthwise,
    # cls & reg pointwise weights merged into one block-diagonal matrix).
    pc, pr = params[0]["cls"], params[0]["reg"]
    dww = jnp.concatenate([pc["dww"] * pc["bn_scale"],
                           pr["dww"] * pr["bn_scale"]], axis=-1)          # (3,3,2C)
    dwb = jnp.concatenate([pc["dwb"] * pc["bn_scale"] + pc["bn_bias"],
                           pr["dwb"] * pr["bn_scale"] + pr["bn_bias"]], axis=-1)
    co_c, co_r = pc["pww"].shape[1], pr["pww"].shape[1]
    pw0 = jnp.zeros((2 * C, co_c + co_r), jnp.float32)
    pw0 = pw0.at[:C, :co_c].set(pc["pww"]).at[C:, co_c:].set(pr["pww"])   # block-diag
    pwb0 = jnp.concatenate([pc["pwb"], pr["pwb"]], axis=-1)               # (1, 32)
    w1 = jnp.concatenate([params[1]["cls"]["w"], params[1]["reg"]["w"]], axis=1)
    b1 = jnp.concatenate([params[1]["cls"]["b"], params[1]["reg"]["b"]], axis=1)

    # priors re-packed per level to match the head column layout (box-major),
    # tiled over batch so the kernel works on flat (B*locs, .) slabs.
    pri0 = jnp.tile(priors[:n_loc0 * bpl].reshape(1, n_loc0, bpl * 4),
                    (B, 1, 1)).reshape(B * n_loc0, bpl * 4)
    pri1 = jnp.tile(priors[n_loc0 * bpl:].reshape(1, n_loc1, bpl * 4),
                    (B, 1, 1)).reshape(B * n_loc1, bpl * 4)

    vmem = pl.BlockSpec(memory_space=pltpu.MemorySpace.VMEM)
    out = pl.pallas_call(
        partial(_fused_ssd_head_kernel, B=B, H0=H0, W0=H0, N1=n_loc1,
                nc=nc, bpl=bpl,
                center_var=cfg.CENTER_VARIANCE, size_var=cfg.SIZE_VARIANCE),
        out_shape=jax.ShapeDtypeStruct((B, n_loc0 + n_loc1, bpl * (nc + 4)),
                                       jnp.float32),
        in_specs=[vmem] * 10,
        out_specs=vmem,
    )(x0p, x1, dww, dwb, pw0, pwb0, w1, b1, pri0, pri1)

    # free reshape: (B, locs, bpl*(nc+4)) -> (B, num_priors, nc+4)
    return out.reshape(B, (n_loc0 + n_loc1) * bpl, nc + 4)


# ----------------------------- parameters ------------------------------------
def init_params(cfg, key):
    params = []
    n_levels = len(cfg.FEATURE_MAPS)
    for level in range(n_levels):
        C = cfg.OUT_CHANNELS[level]
        bpl = cfg.BOXES_PER_LOCATION[level]
        lp = {}
        for head, cout in (("cls", bpl * cfg.NUM_CLASSES), ("reg", bpl * 4)):
            key, k0, k1, k2, k3, k4, k5, k6, k7 = jax.random.split(key, 9)
            if level == n_levels - 1:
                lp[head] = dict(
                    w=0.1 * jax.random.normal(k0, (C, cout), jnp.float32),
                    b=0.1 * jax.random.normal(k1, (1, cout), jnp.float32),
                )
            else:
                gamma = 1.0 + 0.1 * jax.random.normal(k2, (1, C), jnp.float32)
                beta = 0.1 * jax.random.normal(k3, (1, C), jnp.float32)
                mean = 0.1 * jax.random.normal(k4, (1, C), jnp.float32)
                var = 0.5 + jax.random.uniform(k5, (1, C), jnp.float32)
                scale = gamma / jnp.sqrt(var + 1e-5)
                lp[head] = dict(
                    dww=0.1 * jax.random.normal(k0, (3, 3, C), jnp.float32),
                    dwb=0.1 * jax.random.normal(k1, (1, C), jnp.float32),
                    bn_scale=scale,
                    bn_bias=beta - mean * scale,
                    pww=0.1 * jax.random.normal(k6, (C, cout), jnp.float32),
                    pwb=0.1 * jax.random.normal(k7, (1, cout), jnp.float32),
                )
        params.append(lp)
    return params


# ----------------------------- pure-JAX reference -----------------------------
def ref_forward(features_nchw, params, priors, cfg):
    n_levels = len(features_nchw)
    B = features_nchw[0].shape[0]
    cls_list, reg_list = [], []
    for level, feat in enumerate(features_nchw):
        x = jnp.transpose(feat, (0, 2, 3, 1))
        _, H, W, C = x.shape
        for head, store in (("cls", cls_list), ("reg", reg_list)):
            p = params[level][head]
            if level == n_levels - 1:
                y = jnp.einsum("bhwc,co->bhwo", x.astype(jnp.bfloat16),
                               p["w"].astype(jnp.bfloat16),
                               preferred_element_type=jnp.float32) + p["b"]
            else:
                xp = jnp.pad(x, ((0, 0), (1, 1), (1, 1), (0, 0)))
                acc = jnp.zeros((B, H, W, C), jnp.float32)
                for dy in range(3):
                    for dx in range(3):
                        acc = acc + xp[:, dy:dy + H, dx:dx + W, :] * p["dww"][dy, dx]
                acc = acc + p["dwb"]
                acc = jnp.clip(acc * p["bn_scale"] + p["bn_bias"], 0.0, 6.0)
                y = jnp.einsum("bhwc,co->bhwo", acc.astype(jnp.bfloat16),
                               p["pww"].astype(jnp.bfloat16),
                               preferred_element_type=jnp.float32) + p["pwb"]
            store.append(y.reshape(B, -1))
    cls_logits = jnp.concatenate(cls_list, axis=1).reshape(B, -1, cfg.NUM_CLASSES)
    bbox_pred = jnp.concatenate(reg_list, axis=1).reshape(B, -1, 4)
    scores = jax.nn.softmax(cls_logits, axis=2)
    cxcy = bbox_pred[..., :2] * cfg.CENTER_VARIANCE * priors[..., 2:] + priors[..., :2]
    wh = jnp.exp(bbox_pred[..., 2:] * cfg.SIZE_VARIANCE) * priors[..., 2:]
    boxes = jnp.concatenate([cxcy - 0.5 * wh, cxcy + 0.5 * wh], axis=-1)
    return jnp.concatenate([scores, boxes], axis=-1)


# ----------------------------- main -------------------------------------------
if __name__ == "__main__":
    cfg = Cfg()
    key = jax.random.PRNGKey(0)
    k_f0, k_f1, k_par = jax.random.split(key, 3)

    B = 2
    features = [
        jax.random.normal(k_f0, (B, cfg.OUT_CHANNELS[0],
                                 cfg.FEATURE_MAPS[0], cfg.FEATURE_MAPS[0]), jnp.float32),
        jax.random.normal(k_f1, (B, cfg.OUT_CHANNELS[1],
                                 cfg.FEATURE_MAPS[1], cfg.FEATURE_MAPS[1]), jnp.float32),
    ]
    params = init_params(cfg, k_par)
    priors = prior_box(cfg)   # (320, 4) center-form priors

    fwd = jax.jit(lambda feats, prm, pri: ssd_box_head_forward(feats, prm, pri, cfg))
    detections = jax.block_until_ready(fwd(features, params, priors))

    ref = ref_forward(features, params, priors, cfg)
    np.testing.assert_allclose(np.asarray(detections), np.asarray(ref),
                               rtol=1e-3, atol=1e-3)
    assert detections.shape == (B, priors.shape[0], cfg.NUM_CLASSES + 4)
    print("KERNEL_OK")
</pallas_src>

<mosaic_0001>
module attributes {stable_mosaic.version = 11 : i64} {
  func.func @_fused_ssd_head_kernel(%arg0: memref<2x10x10x64xf32, #tpu.memory_space<vmem>>, %arg1: memref<32x32xf32, #tpu.memory_space<vmem>>, %arg2: memref<3x3x64xf32, #tpu.memory_space<vmem>>, %arg3: memref<1x64xf32, #tpu.memory_space<vmem>>, %arg4: memref<64x32xf32, #tpu.memory_space<vmem>>, %arg5: memref<1x32xf32, #tpu.memory_space<vmem>>, %arg6: memref<32x32xf32, #tpu.memory_space<vmem>>, %arg7: memref<1x32xf32, #tpu.memory_space<vmem>>, %arg8: memref<128x16xf32, #tpu.memory_space<vmem>>, %arg9: memref<32x16xf32, #tpu.memory_space<vmem>>, %arg10: memref<2x80x32xf32, #tpu.memory_space<vmem>>) attributes {dimension_semantics = [], scalar_prefetch = 0 : i64, scratch_operands = 0 : i64, tpu.core_type = #tpu.core_type<tc>} {
    %c0 = arith.constant 0 : index
    %c0_0 = arith.constant 0 : index
    %c0_1 = arith.constant 0 : index
    %c0_2 = arith.constant 0 : index
    %0 = vector.load %arg0[%c0, %c0_0, %c0_1, %c0_2] : memref<2x10x10x64xf32, #tpu.memory_space<vmem>>, vector<2x10x10x64xf32>
    %c0_3 = arith.constant 0 : index
    %c0_4 = arith.constant 0 : index
    %c0_5 = arith.constant 0 : index
    %1 = vector.load %arg2[%c0_3, %c0_4, %c0_5] : memref<3x3x64xf32, #tpu.memory_space<vmem>>, vector<3x3x64xf32>
    %cst = arith.constant 0.000000e+00 : f32
    %2 = vector.broadcast %cst : f32 to vector<2x8x8x64xf32>
    %3 = vector.extract_strided_slice %0 {offsets = [0, 0, 0, 0], sizes = [2, 8, 8, 64], strides = [1, 1, 1, 1]} : vector<2x10x10x64xf32> to vector<2x8x8x64xf32>
    %4 = vector.extract_strided_slice %1 {offsets = [0, 0, 0], sizes = [1, 1, 64], strides = [1, 1, 1]} : vector<3x3x64xf32> to vector<1x1x64xf32>
    %5 = vector.shape_cast %4 : vector<1x1x64xf32> to vector<64xf32>
    %6 = vector.shape_cast %5 : vector<64xf32> to vector<1x1x1x64xf32>
    %7 = vector.broadcast %6 : vector<1x1x1x64xf32> to vector<2x8x8x64xf32>
    %8 = arith.mulf %3, %7 : vector<2x8x8x64xf32>
    %9 = arith.addf %2, %8 : vector<2x8x8x64xf32>
    %10 = vector.extract_strided_slice %0 {offsets = [0, 0, 1, 0], sizes = [2, 8, 8, 64], strides = [1, 1, 1, 1]} : vector<2x10x10x64xf32> to vector<2x8x8x64xf32>
    %11 = vector.extract_strided_slice %1 {offsets = [0, 1, 0], sizes = [1, 1, 64], strides = [1, 1, 1]} : vector<3x3x64xf32> to vector<1x1x64xf32>
    %12 = vector.shape_cast %11 : vector<1x1x64xf32> to vector<64xf32>
    %13 = vector.shape_cast %12 : vector<64xf32> to vector<1x1x1x64xf32>
    %14 = vector.broadcast %13 : vector<1x1x1x64xf32> to vector<2x8x8x64xf32>
    %15 = arith.mulf %10, %14 : vector<2x8x8x64xf32>
    %16 = arith.addf %9, %15 : vector<2x8x8x64xf32>
    %17 = vector.extract_strided_slice %0 {offsets = [0, 0, 2, 0], sizes = [2, 8, 8, 64], strides = [1, 1, 1, 1]} : vector<2x10x10x64xf32> to vector<2x8x8x64xf32>
    %18 = vector.extract_strided_slice %1 {offsets = [0, 2, 0], sizes = [1, 1, 64], strides = [1, 1, 1]} : vector<3x3x64xf32> to vector<1x1x64xf32>
    %19 = vector.shape_cast %18 : vector<1x1x64xf32> to vector<64xf32>
    %20 = vector.shape_cast %19 : vector<64xf32> to vector<1x1x1x64xf32>
    %21 = vector.broadcast %20 : vector<1x1x1x64xf32> to vector<2x8x8x64xf32>
    %22 = arith.mulf %17, %21 : vector<2x8x8x64xf32>
    %23 = arith.addf %16, %22 : vector<2x8x8x64xf32>
    %24 = vector.extract_strided_slice %0 {offsets = [0, 1, 0, 0], sizes = [2, 8, 8, 64], strides = [1, 1, 1, 1]} : vector<2x10x10x64xf32> to vector<2x8x8x64xf32>
    %25 = vector.extract_strided_slice %1 {offsets = [1, 0, 0], sizes = [1, 1, 64], strides = [1, 1, 1]} : vector<3x3x64xf32> to vector<1x1x64xf32>
    %26 = vector.shape_cast %25 : vector<1x1x64xf32> to vector<64xf32>
    %27 = vector.shape_cast %26 : vector<64xf32> to vector<1x1x1x64xf32>
    %28 = vector.broadcast %27 : vector<1x1x1x64xf32> to vector<2x8x8x64xf32>
    %29 = arith.mulf %24, %28 : vector<2x8x8x64xf32>
    %30 = arith.addf %23, %29 : vector<2x8x8x64xf32>
    %31 = vector.extract_strided_slice %0 {offsets = [0, 1, 1, 0], sizes = [2, 8, 8, 64], strides = [1, 1, 1, 1]} : vector<2x10x10x64xf32> to vector<2x8x8x64xf32>
    %32 = vector.extract_strided_slice %1 {offsets = [1, 1, 0], sizes = [1, 1, 64], strides = [1, 1, 1]} : vector<3x3x64xf32> to vector<1x1x64xf32>
    %33 = vector.shape_cast %32 : vector<1x1x64xf32> to vector<64xf32>
    %34 = vector.shape_cast %33 : vector<64xf32> to vector<1x1x1x64xf32>
    %35 = vector.broadcast %34 : vector<1x1x1x64xf32> to vector<2x8x8x64xf32>
    %36 = arith.mulf %31, %35 : vector<2x8x8x64xf32>
    %37 = arith.addf %30, %36 : vector<2x8x8x64xf32>
    %38 = vector.extract_strided_slice %0 {offsets = [0, 1, 2, 0], sizes = [2, 8, 8, 64], strides = [1, 1, 1, 1]} : vector<2x10x10x64xf32> to vector<2x8x8x64xf32>
    %39 = vector.extract_strided_slice %1 {offsets = [1, 2, 0], sizes = [1, 1, 64], strides = [1, 1, 1]} : vector<3x3x64xf32> to vector<1x1x64xf32>
    %40 = vector.shape_cast %39 : vector<1x1x64xf32> to vector<64xf32>
    %41 = vector.shape_cast %40 : vector<64xf32> to vector<1x1x1x64xf32>
    %42 = vector.broadcast %41 : vector<1x1x1x64xf32> to vector<2x8x8x64xf32>
    %43 = arith.mulf %38, %42 : vector<2x8x8x64xf32>
    %44 = arith.addf %37, %43 : vector<2x8x8x64xf32>
    %45 = vector.extract_strided_slice %0 {offsets = [0, 2, 0, 0], sizes = [2, 8, 8, 64], strides = [1, 1, 1, 1]} : vector<2x10x10x64xf32> to vector<2x8x8x64xf32>
    %46 = vector.extract_strided_slice %1 {offsets = [2, 0, 0], sizes = [1, 1, 64], strides = [1, 1, 1]} : vector<3x3x64xf32> to vector<1x1x64xf32>
    %47 = vector.shape_cast %46 : vector<1x1x64xf32> to vector<64xf32>
    %48 = vector.shape_cast %47 : vector<64xf32> to vector<1x1x1x64xf32>
    %49 = vector.broadcast %48 : vector<1x1x1x64xf32> to vector<2x8x8x64xf32>
    %50 = arith.mulf %45, %49 : vector<2x8x8x64xf32>
    %51 = arith.addf %44, %50 : vector<2x8x8x64xf32>
    %52 = vector.extract_strided_slice %0 {offsets = [0, 2, 1, 0], sizes = [2, 8, 8, 64], strides = [1, 1, 1, 1]} : vector<2x10x10x64xf32> to vector<2x8x8x64xf32>
    %53 = vector.extract_strided_slice %1 {offsets = [2, 1, 0], sizes = [1, 1, 64], strides = [1, 1, 1]} : vector<3x3x64xf32> to vector<1x1x64xf32>
    %54 = vector.shape_cast %53 : vector<1x1x64xf32> to vector<64xf32>
    %55 = vector.shape_cast %54 : vector<64xf32> to vector<1x1x1x64xf32>
    %56 = vector.broadcast %55 : vector<1x1x1x64xf32> to vector<2x8x8x64xf32>
    %57 = arith.mulf %52, %56 : vector<2x8x8x64xf32>
    %58 = arith.addf %51, %57 : vector<2x8x8x64xf32>
    %59 = vector.extract_strided_slice %0 {offsets = [0, 2, 2, 0], sizes = [2, 8, 8, 64], strides = [1, 1, 1, 1]} : vector<2x10x10x64xf32> to vector<2x8x8x64xf32>
    %60 = vector.extract_strided_slice %1 {offsets = [2, 2, 0], sizes = [1, 1, 64], strides = [1, 1, 1]} : vector<3x3x64xf32> to vector<1x1x64xf32>
    %61 = vector.shape_cast %60 : vector<1x1x64xf32> to vector<64xf32>
    %62 = vector.shape_cast %61 : vector<64xf32> to vector<1x1x1x64xf32>
    %63 = vector.broadcast %62 : vector<1x1x1x64xf32> to vector<2x8x8x64xf32>
    %64 = arith.mulf %59, %63 : vector<2x8x8x64xf32>
    %65 = arith.addf %58, %64 : vector<2x8x8x64xf32>
    %c0_6 = arith.constant 0 : index
    %c0_7 = arith.constant 0 : index
    %66 = vector.load %arg3[%c0_6, %c0_7] : memref<1x64xf32, #tpu.memory_space<vmem>>, vector<1x64xf32>
    %67 = vector.shape_cast %66 : vector<1x64xf32> to vector<1x1x1x64xf32>
    %68 = vector.broadcast %67 : vector<1x1x1x64xf32> to vector<2x8x8x64xf32>
    %69 = arith.addf %65, %68 : vector<2x8x8x64xf32>
    %cst_8 = arith.constant 0.000000e+00 : f32
    %cst_9 = arith.constant 6.000000e+00 : f32
    %70 = vector.broadcast %cst_8 : f32 to vector<2x8x8x64xf32>
    %71 = arith.maximumf %70, %69 : vector<2x8x8x64xf32>
    %72 = vector.broadcast %cst_9 : f32 to vector<2x8x8x64xf32>
    %73 = arith.minimumf %72, %71 : vector<2x8x8x64xf32>
    %74 = vector.shape_cast %73 : vector<2x8x8x64xf32> to vector<128x64xf32>
    %75 = arith.truncf %74 : vector<128x64xf32> to vector<128x64xbf16>
    %c0_10 = arith.constant 0 : index
    %c0_11 = arith.constant 0 : index
    %76 = vector.load %arg4[%c0_10, %c0_11] : memref<64x32xf32, #tpu.memory_space<vmem>>, vector<64x32xf32>
    %77 = arith.truncf %76 : vector<64x32xf32> to vector<64x32xbf16>
    %cst_12 = arith.constant dense<0.000000e+00> : vector<128x32xf32>
    %78 = tpu.matmul %75, %77, %cst_12 {dimension_numbers = #tpu.dot_dimension_numbers<[1], [0], [0], [1], [0, 0, 1, 1], [], []>} : vector<128x64xbf16>, vector<64x32xbf16>, vector<128x32xf32> -> vector<128x32xf32>
    %c0_13 = arith.constant 0 : index
    %c0_14 = arith.constant 0 : index
    %79 = vector.load %arg5[%c0_13, %c0_14] : memref<1x32xf32, #tpu.memory_space<vmem>>, vector<1x32xf32>
    %80 = vector.broadcast %79 : vector<1x32xf32> to vector<128x32xf32>
    %81 = arith.addf %78, %80 : vector<128x32xf32>
    %c0_15 = arith.constant 0 : index
    %c0_16 = arith.constant 0 : index
    %82 = vector.load %arg1[%c0_15, %c0_16] : memref<32x32xf32, #tpu.memory_space<vmem>>, vector<32x32xf32>
    %83 = arith.truncf %82 : vector<32x32xf32> to vector<32x32xbf16>
    %c0_17 = arith.constant 0 : index
    %c0_18 = arith.constant 0 : index
    %84 = vector.load %arg6[%c0_17, %c0_18] : memref<32x32xf32, #tpu.memory_space<vmem>>, vector<32x32xf32>
    %85 = arith.truncf %84 : vector<32x32xf32> to vector<32x32xbf16>
    %cst_19 = arith.constant dense<0.000000e+00> : vector<32x32xf32>
    %86 = tpu.matmul %83, %85, %cst_19 {dimension_numbers = #tpu.dot_dimension_numbers<[1], [0], [0], [1], [0, 0, 1, 1], [], []>} : vector<32x32xbf16>, vector<32x32xbf16>, vector<32x32xf32> -> vector<32x32xf32>
    %c0_20 = arith.constant 0 : index
    %c0_21 = arith.constant 0 : index
    %87 = vector.load %arg7[%c0_20, %c0_21] : memref<1x32xf32, #tpu.memory_space<vmem>>, vector<1x32xf32>
    %88 = vector.broadcast %87 : vector<1x32xf32> to vector<32x32xf32>
    %89 = arith.addf %86, %88 : vector<32x32xf32>
    %c0_22 = arith.constant 0 : index
    %c0_23 = arith.constant 0 : index
    %90 = vector.load %arg8[%c0_22, %c0_23] : memref<128x16xf32, #tpu.memory_space<vmem>>, vector<128x16xf32>
    %91 = vector.extract_strided_slice %81 {offsets = [0, 0], sizes = [128, 4], strides = [1, 1]} : vector<128x32xf32> to vector<128x4xf32>
    %cst_24 = arith.constant dense<0xFF800000> : vector<128xf32>
    %92 = vector.multi_reduction <maximumf>, %91, %cst_24 [1] : vector<128x4xf32> to vector<128xf32>
    %93 = vector.shape_cast %92 : vector<128xf32> to vector<128x1xf32>
    %94 = vector.broadcast %93 : vector<128x1xf32> to vector<128x4xf32>
    %95 = arith.subf %91, %94 : vector<128x4xf32>
    %96 = math.exp %95 : vector<128x4xf32>
    %cst_25 = arith.constant dense<0.000000e+00> : vector<128xf32>
    %97 = vector.multi_reduction <add>, %96, %cst_25 [1] : vector<128x4xf32> to vector<128xf32>
    %98 = vector.shape_cast %97 : vector<128xf32> to vector<128x1xf32>
    %99 = vector.broadcast %98 : vector<128x1xf32> to vector<128x4xf32>
    %100 = arith.divf %96, %99 : vector<128x4xf32>
    %101 = vector.extract_strided_slice %81 {offsets = [0, 16], sizes = [128, 4], strides = [1, 1]} : vector<128x32xf32> to vector<128x4xf32>
    %102 = vector.extract_strided_slice %90 {offsets = [0, 0], sizes = [128, 4], strides = [1, 1]} : vector<128x16xf32> to vector<128x4xf32>
    %103 = vector.extract_strided_slice %101 {offsets = [0, 0], sizes = [128, 2], strides = [1, 1]} : vector<128x4xf32> to vector<128x2xf32>
    %cst_26 = arith.constant 1.000000e-01 : f32
    %104 = vector.broadcast %cst_26 : f32 to vector<128x2xf32>
    %105 = arith.mulf %103, %104 : vector<128x2xf32>
    %106 = vector.extract_strided_slice %102 {offsets = [0, 2], sizes = [128, 2], strides = [1, 1]} : vector<128x4xf32> to vector<128x2xf32>
    %107 = arith.mulf %105, %106 : vector<128x2xf32>
    %108 = vector.extract_strided_slice %102 {offsets = [0, 0], sizes = [128, 2], strides = [1, 1]} : vector<128x4xf32> to vector<128x2xf32>
    %109 = arith.addf %107, %108 : vector<128x2xf32>
    %110 = vector.extract_strided_slice %101 {offsets = [0, 2], sizes = [128, 2], strides = [1, 1]} : vector<128x4xf32> to vector<128x2xf32>
    %cst_27 = arith.constant 2.000000e-01 : f32
    %111 = vector.broadcast %cst_27 : f32 to vector<128x2xf32>
    %112 = arith.mulf %110, %111 : vector<128x2xf32>
    %113 = math.exp %112 : vector<128x2xf32>
    %114 = vector.extract_strided_slice %102 {offsets = [0, 2], sizes = [128, 2], strides = [1, 1]} : vector<128x4xf32> to vector<128x2xf32>
    %115 = arith.mulf %113, %114 : vector<128x2xf32>
    %cst_28 = arith.constant 5.000000e-01 : f32
    %116 = vector.broadcast %cst_28 : f32 to vector<128x2xf32>
    %117 = arith.mulf %116, %115 : vector<128x2xf32>
    %118 = arith.subf %109, %117 : vector<128x2xf32>
    %cst_29 = arith.constant 5.000000e-01 : f32
    %119 = vector.broadcast %cst_29 : f32 to vector<128x2xf32>
    %120 = arith.mulf %119, %115 : vector<128x2xf32>
    %121 = arith.addf %109, %120 : vector<128x2xf32>
    %122 = tpu.concatenate %100, %118, %121 in 1 : vector<128x4xf32>, vector<128x2xf32>, vector<128x2xf32> -> vector<128x8xf32>
    %123 = vector.extract_strided_slice %81 {offsets = [0, 4], sizes = [128, 4], strides = [1, 1]} : vector<128x32xf32> to vector<128x4xf32>
    %cst_30 = arith.constant dense<0xFF800000> : vector<128xf32>
    %124 = vector.multi_reduction <maximumf>, %123, %cst_30 [1] : vector<128x4xf32> to vector<128xf32>
    %125 = vector.shape_cast %124 : vector<128xf32> to vector<128x1xf32>
    %126 = vector.broadcast %125 : vector<128x1xf32> to vector<128x4xf32>
    %127 = arith.subf %123, %126 : vector<128x4xf32>
    %128 = math.exp %127 : vector<128x4xf32>
    %cst_31 = arith.constant dense<0.000000e+00> : vector<128xf32>
    %129 = vector.multi_reduction <add>, %128, %cst_31 [1] : vector<128x4xf32> to vector<128xf32>
    %130 = vector.shape_cast %129 : vector<128xf32> to vector<128x1xf32>
    %131 = vector.broadcast %130 : vector<128x1xf32> to vector<128x4xf32>
    %132 = arith.divf %128, %131 : vector<128x4xf32>
    %133 = vector.extract_strided_slice %81 {offsets = [0, 20], sizes = [128, 4], strides = [1, 1]} : vector<128x32xf32> to vector<128x4xf32>
    %134 = vector.extract_strided_slice %90 {offsets = [0, 4], sizes = [128, 4], strides = [1, 1]} : vector<128x16xf32> to vector<128x4xf32>
    %135 = vector.extract_strided_slice %133 {offsets = [0, 0], sizes = [128, 2], strides = [1, 1]} : vector<128x4xf32> to vector<128x2xf32>
    %cst_32 = arith.constant 1.000000e-01 : f32
    %136 = vector.broadcast %cst_32 : f32 to vector<128x2xf32>
    %137 = arith.mulf %135, %136 : vector<128x2xf32>
    %138 = vector.extract_strided_slice %134 {offsets = [0, 2], sizes = [128, 2], strides = [1, 1]} : vector<128x4xf32> to vector<128x2xf32>
    %139 = arith.mulf %137, %138 : vector<128x2xf32>
    %140 = vector.extract_strided_slice %134 {offsets = [0, 0], sizes = [128, 2], strides = [1, 1]} : vector<128x4xf32> to vector<128x2xf32>
    %141 = arith.addf %139, %140 : vector<128x2xf32>
    %142 = vector.extract_strided_slice %133 {offsets = [0, 2], sizes = [128, 2], strides = [1, 1]} : vector<128x4xf32> to vector<128x2xf32>
    %cst_33 = arith.constant 2.000000e-01 : f32
    %143 = vector.broadcast %cst_33 : f32 to vector<128x2xf32>
    %144 = arith.mulf %142, %143 : vector<128x2xf32>
    %145 = math.exp %144 : vector<128x2xf32>
    %146 = vector.extract_strided_slice %134 {offsets = [0, 2], sizes = [128, 2], strides = [1, 1]} : vector<128x4xf32> to vector<128x2xf32>
    %147 = arith.mulf %145, %146 : vector<128x2xf32>
    %cst_34 = arith.constant 5.000000e-01 : f32
    %148 = vector.broadcast %cst_34 : f32 to vector<128x2xf32>
    %149 = arith.mulf %148, %147 : vector<128x2xf32>
    %150 = arith.subf %141, %149 : vector<128x2xf32>
    %cst_35 = arith.constant 5.000000e-01 : f32
    %151 = vector.broadcast %cst_35 : f32 to vector<128x2xf32>
    %152 = arith.mulf %151, %147 : vector<128x2xf32>
    %153 = arith.addf %141, %152 : vector<128x2xf32>
    %154 = tpu.concatenate %132, %150, %153 in 1 : vector<128x4xf32>, vector<128x2xf32>, vector<128x2xf32> -> vector<128x8xf32>
    %155 = vector.extract_strided_slice %81 {offsets = [0, 8], sizes = [128, 4], strides = [1, 1]} : vector<128x32xf32> to vector<128x4xf32>
    %cst_36 = arith.constant dense<0xFF800000> : vector<128xf32>
    %156 = vector.multi_reduction <maximumf>, %155, %cst_36 [1] : vector<128x4xf32> to vector<128xf32>
    %157 = vector.shape_cast %156 : vector<128xf32> to vector<128x1xf32>
    %158 = vector.broadcast %157 : vector<128x1xf32> to vector<128x4xf32>
    %159 = arith.subf %155, %158 : vector<128x4xf32>
    %160 = math.exp %159 : vector<128x4xf32>
    %cst_37 = arith.constant dense<0.000000e+00> : vector<128xf32>
    %161 = vector.multi_reduction <add>, %160, %cst_37 [1] : vector<128x4xf32> to vector<128xf32>
    %162 = vector.shape_cast %161 : vector<128xf32> to vector<128x1xf32>
    %163 = vector.broadcast %162 : vector<128x1xf32> to vector<128x4xf32>
    %164 = arith.divf %160, %163 : vector<128x4xf32>
    %165 = vector.extract_strided_slice %81 {offsets = [0, 24], sizes = [128, 4], strides = [1, 1]} : vector<128x32xf32> to vector<128x4xf32>
    %166 = vector.extract_strided_slice %90 {offsets = [0, 8], sizes = [128, 4], strides = [1, 1]} : vector<128x16xf32> to vector<128x4xf32>
    %167 = vector.extract_strided_slice %165 {offsets = [0, 0], sizes = [128, 2], strides = [1, 1]} : vector<128x4xf32> to vector<128x2xf32>
    %cst_38 = arith.constant 1.000000e-01 : f32
    %168 = vector.broadcast %cst_38 : f32 to vector<128x2xf32>
    %169 = arith.mulf %167, %168 : vector<128x2xf32>
    %170 = vector.extract_strided_slice %166 {offsets = [0, 2], sizes = [128, 2], strides = [1, 1]} : vector<128x4xf32> to vector<128x2xf32>
    %171 = arith.mulf %169, %170 : vector<128x2xf32>
    %172 = vector.extract_strided_slice %166 {offsets = [0, 0], sizes = [128, 2], strides = [1, 1]} : vector<128x4xf32> to vector<128x2xf32>
    %173 = arith.addf %171, %172 : vector<128x2xf32>
    %174 = vector.extract_strided_slice %165 {offsets = [0, 2], sizes = [128, 2], strides = [1, 1]} : vector<128x4xf32> to vector<128x2xf32>
    %cst_39 = arith.constant 2.000000e-01 : f32
    %175 = vector.broadcast %cst_39 : f32 to vector<128x2xf32>
    %176 = arith.mulf %174, %175 : vector<128x2xf32>
    %177 = math.exp %176 : vector<128x2xf32>
    %178 = vector.extract_strided_slice %166 {offsets = [0, 2], sizes = [128, 2], strides = [1, 1]} : vector<128x4xf32> to vector<128x2xf32>
    %179 = arith.mulf %177, %178 : vector<128x2xf32>
    %cst_40 = arith.constant 5.000000e-01 : f32
    %180 = vector.broadcast %cst_40 : f32 to vector<128x2xf32>
    %181 = arith.mulf %180, %179 : vector<128x2xf32>
    %182 = arith.subf %173, %181 : vector<128x2xf32>
    %cst_41 = arith.constant 5.000000e-01 : f32
    %183 = vector.broadcast %cst_41 : f32 to vector<128x2xf32>
    %184 = arith.mulf %183, %179 : vector<128x2xf32>
    %185 = arith.addf %173, %184 : vector<128x2xf32>
    %186 = tpu.concatenate %164, %182, %185 in 1 : vector<128x4xf32>, vector<128x2xf32>, vector<128x2xf32> -> vector<128x8xf32>
    %187 = vector.extract_strided_slice %81 {offsets = [0, 12], sizes = [128, 4], strides = [1, 1]} : vector<128x32xf32> to vector<128x4xf32>
    %cst_42 = arith.constant dense<0xFF800000> : vector<128xf32>
    %188 = vector.multi_reduction <maximumf>, %187, %cst_42 [1] : vector<128x4xf32> to vector<128xf32>
    %189 = vector.shape_cast %188 : vector<128xf32> to vector<128x1xf32>
    %190 = vector.broadcast %189 : vector<128x1xf32> to vector<128x4xf32>
    %191 = arith.subf %187, %190 : vector<128x4xf32>
    %192 = math.exp %191 : vector<128x4xf32>
    %cst_43 = arith.constant dense<0.000000e+00> : vector<128xf32>
    %193 = vector.multi_reduction <add>, %192, %cst_43 [1] : vector<128x4xf32> to vector<128xf32>
    %194 = vector.shape_cast %193 : vector<128xf32> to vector<128x1xf32>
    %195 = vector.broadcast %194 : vector<128x1xf32> to vector<128x4xf32>
    %196 = arith.divf %192, %195 : vector<128x4xf32>
    %197 = vector.extract_strided_slice %81 {offsets = [0, 28], sizes = [128, 4], strides = [1, 1]} : vector<128x32xf32> to vector<128x4xf32>
    %198 = vector.extract_strided_slice %90 {offsets = [0, 12], sizes = [128, 4], strides = [1, 1]} : vector<128x16xf32> to vector<128x4xf32>
    %199 = vector.extract_strided_slice %197 {offsets = [0, 0], sizes = [128, 2], strides = [1, 1]} : vector<128x4xf32> to vector<128x2xf32>
    %cst_44 = arith.constant 1.000000e-01 : f32
    %200 = vector.broadcast %cst_44 : f32 to vector<128x2xf32>
    %201 = arith.mulf %199, %200 : vector<128x2xf32>
    %202 = vector.extract_strided_slice %198 {offsets = [0, 2], sizes = [128, 2], strides = [1, 1]} : vector<128x4xf32> to vector<128x2xf32>
    %203 = arith.mulf %201, %202 : vector<128x2xf32>
    %204 = vector.extract_strided_slice %198 {offsets = [0, 0], sizes = [128, 2], strides = [1, 1]} : vector<128x4xf32> to vector<128x2xf32>
    %205 = arith.addf %203, %204 : vector<128x2xf32>
    %206 = vector.extract_strided_slice %197 {offsets = [0, 2], sizes = [128, 2], strides = [1, 1]} : vector<128x4xf32> to vector<128x2xf32>
    %cst_45 = arith.constant 2.000000e-01 : f32
    %207 = vector.broadcast %cst_45 : f32 to vector<128x2xf32>
    %208 = arith.mulf %206, %207 : vector<128x2xf32>
    %209 = math.exp %208 : vector<128x2xf32>
    %210 = vector.extract_strided_slice %198 {offsets = [0, 2], sizes = [128, 2], strides = [1, 1]} : vector<128x4xf32> to vector<128x2xf32>
    %211 = arith.mulf %209, %210 : vector<128x2xf32>
    %cst_46 = arith.constant 5.000000e-01 : f32
    %212 = vector.broadcast %cst_46 : f32 to vector<128x2xf32>
    %213 = arith.mulf %212, %211 : vector<128x2xf32>
    %214 = arith.subf %205, %213 : vector<128x2xf32>
    %cst_47 = arith.constant 5.000000e-01 : f32
    %215 = vector.broadcast %cst_47 : f32 to vector<128x2xf32>
    %216 = arith.mulf %215, %211 : vector<128x2xf32>
    %217 = arith.addf %205, %216 : vector<128x2xf32>
    %218 = tpu.concatenate %196, %214, %217 in 1 : vector<128x4xf32>, vector<128x2xf32>, vector<128x2xf32> -> vector<128x8xf32>
    %219 = tpu.concatenate %122, %154, %186, %218 in 1 : vector<128x8xf32>, vector<128x8xf32>, vector<128x8xf32>, vector<128x8xf32> -> vector<128x32xf32>
    %c0_48 = arith.constant 0 : index
    %c0_49 = arith.constant 0 : index
    %220 = vector.load %arg9[%c0_48, %c0_49] : memref<32x16xf32, #tpu.memory_space<vmem>>, vector<32x16xf32>
    %221 = vector.extract_strided_slice %89 {offsets = [0, 0], sizes = [32, 4], strides = [1, 1]} : vector<32x32xf32> to vector<32x4xf32>
    %cst_50 = arith.constant dense<0xFF800000> : vector<32xf32>
    %222 = vector.multi_reduction <maximumf>, %221, %cst_50 [1] : vector<32x4xf32> to vector<32xf32>
    %223 = vector.shape_cast %222 : vector<32xf32> to vector<32x1xf32>
    %224 = vector.broadcast %223 : vector<32x1xf32> to vector<32x4xf32>
    %225 = arith.subf %221, %224 : vector<32x4xf32>
    %226 = math.exp %225 : vector<32x4xf32>
    %cst_51 = arith.constant dense<0.000000e+00> : vector<32xf32>
    %227 = vector.multi_reduction <add>, %226, %cst_51 [1] : vector<32x4xf32> to vector<32xf32>
    %228 = vector.shape_cast %227 : vector<32xf32> to vector<32x1xf32>
    %229 = vector.broadcast %228 : vector<32x1xf32> to vector<32x4xf32>
    %230 = arith.divf %226, %229 : vector<32x4xf32>
    %231 = vector.extract_strided_slice %89 {offsets = [0, 16], sizes = [32, 4], strides = [1, 1]} : vector<32x32xf32> to vector<32x4xf32>
    %232 = vector.extract_strided_slice %220 {offsets = [0, 0], sizes = [32, 4], strides = [1, 1]} : vector<32x16xf32> to vector<32x4xf32>
    %233 = vector.extract_strided_slice %231 {offsets = [0, 0], sizes = [32, 2], strides = [1, 1]} : vector<32x4xf32> to vector<32x2xf32>
    %cst_52 = arith.constant 1.000000e-01 : f32
    %234 = vector.broadcast %cst_52 : f32 to vector<32x2xf32>
    %235 = arith.mulf %233, %234 : vector<32x2xf32>
    %236 = vector.extract_strided_slice %232 {offsets = [0, 2], sizes = [32, 2], strides = [1, 1]} : vector<32x4xf32> to vector<32x2xf32>
    %237 = arith.mulf %235, %236 : vector<32x2xf32>
    %238 = vector.extract_strided_slice %232 {offsets = [0, 0], sizes = [32, 2], strides = [1, 1]} : vector<32x4xf32> to vector<32x2xf32>
    %239 = arith.addf %237, %238 : vector<32x2xf32>
    %240 = vector.extract_strided_slice %231 {offsets = [0, 2], sizes = [32, 2], strides = [1, 1]} : vector<32x4xf32> to vector<32x2xf32>
    %cst_53 = arith.constant 2.000000e-01 : f32
    %241 = vector.broadcast %cst_53 : f32 to vector<32x2xf32>
    %242 = arith.mulf %240, %241 : vector<32x2xf32>
    %243 = math.exp %242 : vector<32x2xf32>
    %244 = vector.extract_strided_slice %232 {offsets = [0, 2], sizes = [32, 2], strides = [1, 1]} : vector<32x4xf32> to vector<32x2xf32>
    %245 = arith.mulf %243, %244 : vector<32x2xf32>
    %cst_54 = arith.constant 5.000000e-01 : f32
    %246 = vector.broadcast %cst_54 : f32 to vector<32x2xf32>
    %247 = arith.mulf %246, %245 : vector<32x2xf32>
    %248 = arith.subf %239, %247 : vector<32x2xf32>
    %cst_55 = arith.constant 5.000000e-01 : f32
    %249 = vector.broadcast %cst_55 : f32 to vector<32x2xf32>
    %250 = arith.mulf %249, %245 : vector<32x2xf32>
    %251 = arith.addf %239, %250 : vector<32x2xf32>
    %252 = tpu.concatenate %230, %248, %251 in 1 : vector<32x4xf32>, vector<32x2xf32>, vector<32x2xf32> -> vector<32x8xf32>
    %253 = vector.extract_strided_slice %89 {offsets = [0, 4], sizes = [32, 4], strides = [1, 1]} : vector<32x32xf32> to vector<32x4xf32>
    %cst_56 = arith.constant dense<0xFF800000> : vector<32xf32>
    %254 = vector.multi_reduction <maximumf>, %253, %cst_56 [1] : vector<32x4xf32> to vector<32xf32>
    %255 = vector.shape_cast %254 : vector<32xf32> to vector<32x1xf32>
    %256 = vector.broadcast %255 : vector<32x1xf32> to vector<32x4xf32>
    %257 = arith.subf %253, %256 : vector<32x4xf32>
    %258 = math.exp %257 : vector<32x4xf32>
    %cst_57 = arith.constant dense<0.000000e+00> : vector<32xf32>
    %259 = vector.multi_reduction <add>, %258, %cst_57 [1] : vector<32x4xf32> to vector<32xf32>
    %260 = vector.shape_cast %259 : vector<32xf32> to vector<32x1xf32>
    %261 = vector.broadcast %260 : vector<32x1xf32> to vector<32x4xf32>
    %262 = arith.divf %258, %261 : vector<32x4xf32>
    %263 = vector.extract_strided_slice %89 {offsets = [0, 20], sizes = [32, 4], strides = [1, 1]} : vector<32x32xf32> to vector<32x4xf32>
    %264 = vector.extract_strided_slice %220 {offsets = [0, 4], sizes = [32, 4], strides = [1, 1]} : vector<32x16xf32> to vector<32x4xf32>
    %265 = vector.extract_strided_slice %263 {offsets = [0, 0], sizes = [32, 2], strides = [1, 1]} : vector<32x4xf32> to vector<32x2xf32>
    %cst_58 = arith.constant 1.000000e-01 : f32
    %266 = vector.broadcast %cst_58 : f32 to vector<32x2xf32>
    %267 = arith.mulf %265, %266 : vector<32x2xf32>
    %268 = vector.extract_strided_slice %264 {offsets = [0, 2], sizes = [32, 2], strides = [1, 1]} : vector<32x4xf32> to vector<32x2xf32>
    %269 = arith.mulf %267, %268 : vector<32x2xf32>
    %270 = vector.extract_strided_slice %264 {offsets = [0, 0], sizes = [32, 2], strides = [1, 1]} : vector<32x4xf32> to vector<32x2xf32>
    %271 = arith.addf %269, %270 : vector<32x2xf32>
    %272 = vector.extract_strided_slice %263 {offsets = [0, 2], sizes = [32, 2], strides = [1, 1]} : vector<32x4xf32> to vector<32x2xf32>
    %cst_59 = arith.constant 2.000000e-01 : f32
    %273 = vector.broadcast %cst_59 : f32 to vector<32x2xf32>
    %274 = arith.mulf %272, %273 : vector<32x2xf32>
    %275 = math.exp %274 : vector<32x2xf32>
    %276 = vector.extract_strided_slice %264 {offsets = [0, 2], sizes = [32, 2], strides = [1, 1]} : vector<32x4xf32> to vector<32x2xf32>
    %277 = arith.mulf %275, %276 : vector<32x2xf32>
    %cst_60 = arith.constant 5.000000e-01 : f32
    %278 = vector.broadcast %cst_60 : f32 to vector<32x2xf32>
    %279 = arith.mulf %278, %277 : vector<32x2xf32>
    %280 = arith.subf %271, %279 : vector<32x2xf32>
    %cst_61 = arith.constant 5.000000e-01 : f32
    %281 = vector.broadcast %cst_61 : f32 to vector<32x2xf32>
    %282 = arith.mulf %281, %277 : vector<32x2xf32>
    %283 = arith.addf %271, %282 : vector<32x2xf32>
    %284 = tpu.concatenate %262, %280, %283 in 1 : vector<32x4xf32>, vector<32x2xf32>, vector<32x2xf32> -> vector<32x8xf32>
    %285 = vector.extract_strided_slice %89 {offsets = [0, 8], sizes = [32, 4], strides = [1, 1]} : vector<32x32xf32> to vector<32x4xf32>
    %cst_62 = arith.constant dense<0xFF800000> : vector<32xf32>
    %286 = vector.multi_reduction <maximumf>, %285, %cst_62 [1] : vector<32x4xf32> to vector<32xf32>
    %287 = vector.shape_cast %286 : vector<32xf32> to vector<32x1xf32>
    %288 = vector.broadcast %287 : vector<32x1xf32> to vector<32x4xf32>
    %289 = arith.subf %285, %288 : vector<32x4xf32>
    %290 = math.exp %289 : vector<32x4xf32>
    %cst_63 = arith.constant dense<0.000000e+00> : vector<32xf32>
    %291 = vector.multi_reduction <add>, %290, %cst_63 [1] : vector<32x4xf32> to vector<32xf32>
    %292 = vector.shape_cast %291 : vector<32xf32> to vector<32x1xf32>
    %293 = vector.broadcast %292 : vector<32x1xf32> to vector<32x4xf32>
    %294 = arith.divf %290, %293 : vector<32x4xf32>
    %295 = vector.extract_strided_slice %89 {offsets = [0, 24], sizes = [32, 4], strides = [1, 1]} : vector<32x32xf32> to vector<32x4xf32>
    %296 = vector.extract_strided_slice %220 {offsets = [0, 8], sizes = [32, 4], strides = [1, 1]} : vector<32x16xf32> to vector<32x4xf32>
    %297 = vector.extract_strided_slice %295 {offsets = [0, 0], sizes = [32, 2], strides = [1, 1]} : vector<32x4xf32> to vector<32x2xf32>
    %cst_64 = arith.constant 1.000000e-01 : f32
    %298 = vector.broadcast %cst_64 : f32 to vector<32x2xf32>
    %299 = arith.mulf %297, %298 : vector<32x2xf32>
    %300 = vector.extract_strided_slice %296 {offsets = [0, 2], sizes = [32, 2], strides = [1, 1]} : vector<32x4xf32> to vector<32x2xf32>
    %301 = arith.mulf %299, %300 : vector<32x2xf32>
    %302 = vector.extract_strided_slice %296 {offsets = [0, 0], sizes = [32, 2], strides = [1, 1]} : vector<32x4xf32> to vector<32x2xf32>
    %303 = arith.addf %301, %302 : vector<32x2xf32>
    %304 = vector.extract_strided_slice %295 {offsets = [0, 2], sizes = [32, 2], strides = [1, 1]} : vector<32x4xf32> to vector<32x2xf32>
    %cst_65 = arith.constant 2.000000e-01 : f32
    %305 = vector.broadcast %cst_65 : f32 to vector<32x2xf32>
    %306 = arith.mulf %304, %305 : vector<32x2xf32>
    %307 = math.exp %306 : vector<32x2xf32>
    %308 = vector.extract_strided_slice %296 {offsets = [0, 2], sizes = [32, 2], strides = [1, 1]} : vector<32x4xf32> to vector<32x2xf32>
    %309 = arith.mulf %307, %308 : vector<32x2xf32>
    %cst_66 = arith.constant 5.000000e-01 : f32
    %310 = vector.broadcast %cst_66 : f32 to vector<32x2xf32>
    %311 = arith.mulf %310, %309 : vector<32x2xf32>
    %312 = arith.subf %303, %311 : vector<32x2xf32>
    %cst_67 = arith.constant 5.000000e-01 : f32
    %313 = vector.broadcast %cst_67 : f32 to vector<32x2xf32>
    %314 = arith.mulf %313, %309 : vector<32x2xf32>
    %315 = arith.addf %303, %314 : vector<32x2xf32>
    %316 = tpu.concatenate %294, %312, %315 in 1 : vector<32x4xf32>, vector<32x2xf32>, vector<32x2xf32> -> vector<32x8xf32>
    %317 = vector.extract_strided_slice %89 {offsets = [0, 12], sizes = [32, 4], strides = [1, 1]} : vector<32x32xf32> to vector<32x4xf32>
    %cst_68 = arith.constant dense<0xFF800000> : vector<32xf32>
    %318 = vector.multi_reduction <maximumf>, %317, %cst_68 [1] : vector<32x4xf32> to vector<32xf32>
    %319 = vector.shape_cast %318 : vector<32xf32> to vector<32x1xf32>
    %320 = vector.broadcast %319 : vector<32x1xf32> to vector<32x4xf32>
    %321 = arith.subf %317, %320 : vector<32x4xf32>
    %322 = math.exp %321 : vector<32x4xf32>
    %cst_69 = arith.constant dense<0.000000e+00> : vector<32xf32>
    %323 = vector.multi_reduction <add>, %322, %cst_69 [1] : vector<32x4xf32> to vector<32xf32>
    %324 = vector.shape_cast %323 : vector<32xf32> to vector<32x1xf32>
    %325 = vector.broadcast %324 : vector<32x1xf32> to vector<32x4xf32>
    %326 = arith.divf %322, %325 : vector<32x4xf32>
    %327 = vector.extract_strided_slice %89 {offsets = [0, 28], sizes = [32, 4], strides = [1, 1]} : vector<32x32xf32> to vector<32x4xf32>
    %328 = vector.extract_strided_slice %220 {offsets = [0, 12], sizes = [32, 4], strides = [1, 1]} : vector<32x16xf32> to vector<32x4xf32>
    %329 = vector.extract_strided_slice %327 {offsets = [0, 0], sizes = [32, 2], strides = [1, 1]} : vector<32x4xf32> to vector<32x2xf32>
    %cst_70 = arith.constant 1.000000e-01 : f32
    %330 = vector.broadcast %cst_70 : f32 to vector<32x2xf32>
    %331 = arith.mulf %329, %330 : vector<32x2xf32>
    %332 = vector.extract_strided_slice %328 {offsets = [0, 2], sizes = [32, 2], strides = [1, 1]} : vector<32x4xf32> to vector<32x2xf32>
    %333 = arith.mulf %331, %332 : vector<32x2xf32>
    %334 = vector.extract_strided_slice %328 {offsets = [0, 0], sizes = [32, 2], strides = [1, 1]} : vector<32x4xf32> to vector<32x2xf32>
    %335 = arith.addf %333, %334 : vector<32x2xf32>
    %336 = vector.extract_strided_slice %327 {offsets = [0, 2], sizes = [32, 2], strides = [1, 1]} : vector<32x4xf32> to vector<32x2xf32>
    %cst_71 = arith.constant 2.000000e-01 : f32
    %337 = vector.broadcast %cst_71 : f32 to vector<32x2xf32>
    %338 = arith.mulf %336, %337 : vector<32x2xf32>
    %339 = math.exp %338 : vector<32x2xf32>
    %340 = vector.extract_strided_slice %328 {offsets = [0, 2], sizes = [32, 2], strides = [1, 1]} : vector<32x4xf32> to vector<32x2xf32>
    %341 = arith.mulf %339, %340 : vector<32x2xf32>
    %cst_72 = arith.constant 5.000000e-01 : f32
    %342 = vector.broadcast %cst_72 : f32 to vector<32x2xf32>
    %343 = arith.mulf %342, %341 : vector<32x2xf32>
    %344 = arith.subf %335, %343 : vector<32x2xf32>
    %cst_73 = arith.constant 5.000000e-01 : f32
    %345 = vector.broadcast %cst_73 : f32 to vector<32x2xf32>
    %346 = arith.mulf %345, %341 : vector<32x2xf32>
    %347 = arith.addf %335, %346 : vector<32x2xf32>
    %348 = tpu.concatenate %326, %344, %347 in 1 : vector<32x4xf32>, vector<32x2xf32>, vector<32x2xf32> -> vector<32x8xf32>
    %349 = tpu.concatenate %252, %284, %316, %348 in 1 : vector<32x8xf32>, vector<32x8xf32>, vector<32x8xf32>, vector<32x8xf32> -> vector<32x32xf32>
    %350 = vector.shape_cast %219 : vector<128x32xf32> to vector<2x64x32xf32>
    %c0_74 = arith.constant 0 : index
    %c0_75 = arith.constant 0 : index
    %c0_76 = arith.constant 0 : index
    %351 = vector.load %arg10[%c0_74, %c0_75, %c0_76] : memref<2x80x32xf32, #tpu.memory_space<vmem>>, vector<2x64x32xf32>
    tpu.vector_store %arg10[%c0_74, %c0_75, %c0_76], %350 {strides = array<i32>} : memref<2x80x32xf32, #tpu.memory_space<vmem>>, vector<2x64x32xf32>,
    %352 = vector.shape_cast %349 : vector<32x32xf32> to vector<2x16x32xf32>
    %c0_77 = arith.constant 0 : index
    %c64 = arith.constant 64 : index
    %c0_78 = arith.constant 0 : index
    %353 = vector.load %arg10[%c0_77, %c64, %c0_78] : memref<2x80x32xf32, #tpu.memory_space<vmem>>, vector<2x16x32xf32>
    tpu.vector_store %arg10[%c0_77, %c64, %c0_78], %352 {strides = array<i32>} : memref<2x80x32xf32, #tpu.memory_space<vmem>>, vector<2x16x32xf32>,
    return
  }
}

</mosaic_0001>

<bundles_post_ra>
// kernel: _lambda_.1
= control target key start
LH: loop header
LB: loop body
LE: loop exit
PB: predicated region body
PF: predicated region fallthrough
CT: control target
= control target key end

     0   :  { %v79_v0 = vlaneseq  ;;  %vm183_vm0 = vcmask 1046528   ;;  %vm332_vm1 = vcmask 1045504   ;;  %vm1159_vm2 = vcmask 523264   ;;  %s4618_s11 = smov 16   ;;  %s4621_s12 = smov 118   ;;  %s8230_s4 = inlined_call_operand.vmem [shape: f32[64,32], index: 4, kind: input, shape index: {}]   ;;  %s8231_s0 = inlined_call_operand.vmem [shape: f32[2,10,10,64], index: 0, kind: input, shape index: {}]   ;;  %s8232_s2 = inlined_call_operand.vmem [shape: f32[3,3,64], index: 2, kind: input, shape index: {}]   ;;  %s8233_s3 = inlined_call_operand.vmem [shape: f32[1,64], index: 3, kind: input, shape index: {}]   ;;  %s8234_s8 = inlined_call_operand.vmem [shape: f32[128,16], index: 8, kind: input, shape index: {}]   ;;  %s8235_s5 = inlined_call_operand.vmem [shape: f32[1,32], index: 5, kind: input, shape index: {}]   ;;  %s8236_s6 = inlined_call_operand.vmem [shape: f32[32,32], index: 6, kind: input, shape index: {}]   ;;  %s8237_s1 = inlined_call_operand.vmem [shape: f32[32,32], index: 1, kind: input, shape index: {}]   ;;  %s8238_s7 = inlined_call_operand.vmem [shape: f32[1,32], index: 7, kind: input, shape index: {}]   ;;  %s8239_s10 = inlined_call_operand.vmem [shape: f32[2,80,32], index: 10, kind: output, shape index: {}]   ;;  %s8240_s9 = inlined_call_operand.vmem [shape: f32[32,16], index: 9, kind: input, shape index: {}]  }
   0x1   :  { %v1140_v1 = vld [vmem:[%s8230_s4] sm:$0xff]  ;;  %v1141_v2 = vld [vmem:[%s8230_s4 + $0x8] sm:$0xff]  ;;  %v1142_v3 = vld [vmem:[%s8230_s4 + $0x10] sm:$0xff]  ;;  %vm1372_vm3 = vcmask 31744   ;;  %vm2046_vm4 = vcmask 64544   ;;  %s4622_s13 = smov 112  }
   0x2   :  { %v1148_v4 = vpack.c.bf16 %v1141_v2, %v1140_v1  ;;  %v1143_v5 = vld [vmem:[%s8230_s4 + $0x18] sm:$0xff]  ;;  %v80_v6 = vshrl.u32 %v79_v0, 7  ;;  %v1144_v8 = vld [vmem:[%s8230_s4 + $0x20] sm:$0xff]  ;;  %v1145_v9 = vld [vmem:[%s8230_s4 + $0x28] sm:$0xff]  ;;  %s4623_s14 = smov 114   ;;  %s4624_s15 = smov 124  }
   0x3   :  { %v1149_v7 = vpack.c.bf16 %v1143_v5, %v1142_v3  ;;  %v1146_v10 = vld [vmem:[%s8230_s4 + $0x30] sm:$0xff]  ;;  %v1147_v11 = vld [vmem:[%s8230_s4 + $0x38] sm:$0xff]  ;;  %v36_v13 = vld [vmem:[%s8231_s0] sm:$0xff]  ;;  %v1150_v16 = vpack.c.bf16 %v1145_v9, %v1144_v8  ;;  %s4617_s4 = smov 14   ;;  %vm2479_vm5 = vcmask 97344   ;;  %s4626_s16 = smov 108  }
   0x4   :  { %4197 = vmatprep.subr.bf16.mxu0 %v1148_v4  ;;  %4229 = vmatprep.subr.bf16.mxu1 %v1148_v4  ;;  %v81_v12 = vsub.s32 0, %v80_v6  ;;  %v117_v14 = vsub.s32 1, %v80_v6  ;;  %v4714_v15 = vsub.s32 2, %v80_v6  ;;  %v37_v17 = vld [vmem:[%s8231_s0 + $0x8] sm:$0x3]  ;;  %v1151_v20 = vpack.c.bf16 %v1147_v11, %v1146_v10  ;;  %v4728_v21 = vld [vmem:[%s8231_s0 + $0x10] sm:$0xff] }
   0x5   :  { %4198 = vmatpush3.bf16.msra.mxu0 %v1148_v4  ;;  %4233 = vmatpush3.bf16.msra.mxu1 %v1148_v4  ;;  %v76_v18 = vld [vmem:[%s8232_s2] sm:$0x7]  ;;  %v77_v19 = vld [vmem:[%s8232_s2 + $0x4] sm:$0x7]  ;;  %v4733_v22 = vld [vmem:[%s8231_s0 + $0x18] sm:$0x3] }
   0x6   :  { %4199 = vmatprep.subr.bf16.mxu0 %v1149_v7  ;;  %4230 = vmatprep.subr.bf16.mxu1 %v1149_v7  ;;  %v4738_v23 = vld [vmem:[%s8232_s2 + $0x8] sm:$0x7]  ;;  %v4740_v24 = vrot.slane %v76_v18, %v81_v12  ;;  %v4742_v25 = vrot.slane %v76_v18, %v117_v14  ;;  %v4745_v26 = vrot.slane %v76_v18, %v4714_v15  ;;  %v4770_v35 = vld [vmem:[%s8231_s0 + $0x38] sm:$0x3]  ;;  %v4799_v55 = vld [vmem:[%s8231_s0 + $0x20] sm:$0xff]  ;;  %s4627_s17 = smov 110  }
   0x7   :  { %v4750_v27 = vld [vmem:[%s8231_s0 + $0x28] sm:$0x3]  ;;  %v4752_v28 = vrot.slane %v77_v19, %v81_v12  ;;  %v4754_v29 = vrot.slane %v77_v19, %v117_v14  ;;  %v4757_v30 = vrot.slane %v77_v19, %v4714_v15  ;;  %v4760_v31 = vrot.slane %v4738_v23, %v81_v12  ;;  %s4629_s18 = smov 106   ;;  %s4630_s19 = smov 8  }
   0x8   :  { %v83_v32 = vmul.f32 %v4740_v24, %v36_v13  ;;  %v119_v33 = vmul.f32 %v4742_v25, %v36_v13  ;;  %v4765_v34 = vrot.slane %v4738_v23, %v117_v14  ;;  %v120_v36 = vmul.f32 %v4742_v25, %v37_v17  ;;  %s4631_s20 = smov 24  }
   0x9   :  { %4200 = vmatpush3.bf16.msra.mxu0 %v1149_v7  ;;  %4234 = vmatpush3.bf16.msra.mxu1 %v1149_v7  ;;  %v121_v37 = vmul.f32 %v4742_v25, %v4728_v21  ;;  %v122_v38 = vmul.f32 %v4742_v25, %v4733_v22  ;;  %v84_v39 = vmul.f32 %v4740_v24, %v4728_v21  ;;  %vm2912_vm6 = vcmask 130144  }
   0xa   :  { %4201 = vmatprep.subr.bf16.mxu0 %v1150_v16  ;;  %4231 = vmatprep.subr.bf16.mxu1 %v1150_v16  ;;  %v4781_v40 = vmul.f32 %v4742_v25, %v4750_v27  ;;  %v184_v41 = vrot.slane %v119_v33, 1  ;;  %v268_v42 = vmul.f32 %v4745_v26, %v36_v13  ;;  %v185_v43 = vrot.slane %v120_v36, 1 }
   0xb   :  { %v187_v44 = vrot.slane %v121_v37, 1  ;;  %v188_v45 = vrot.slane %v122_v38, 1  ;;  %v269_v46 = vmul.f32 %v4745_v26, %v37_v17  ;;  %v4787_v47 = vmul.f32 %v4742_v25, %v4770_v35 }
   0xc   :  { %v191_v48 = vrot.slane %v4781_v40, 1  ;;  %v270_v49 = vmul.f32 %v4745_v26, %v4728_v21  ;;  %v271_v50 = vmul.f32 %v4745_v26, %v4733_v22  ;;  %v186_v51 = vsel %vm183_vm0, %v184_v41, %v185_v43 }
   0xd   :  { %4202 = vmatpush3.bf16.msra.mxu0 %v1150_v16  ;;  %4235 = vmatpush3.bf16.msra.mxu1 %v1150_v16  ;;  %v189_v52 = vsel %vm183_vm0, %v187_v44, %v188_v45  ;;  %v333_v53 = vrot.slane %v268_v42, 2  ;;  %v334_v54 = vrot.slane %v269_v46, 2  ;;  %v248_v56 = vadd.f32 %v186_v51, %v83_v32  ;;  %v64_v46 = vld [vmem:[%s8231_s0 + $0xe0] sm:$0xff] }
   0xe   :  { %4203 = vmatprep.subr.bf16.mxu0 %v1151_v20  ;;  %4232 = vmatprep.subr.bf16.mxu1 %v1151_v20  ;;  %v249_v57 = vadd.f32 %v189_v52, %v84_v39  ;;  %v336_v58 = vrot.slane %v270_v49, 2  ;;  %v337_v59 = vrot.slane %v271_v50, 2  ;;  %v417_v61 = vmul.f32 %v4752_v28, %v4728_v21 }
   0xf   :  { %v335_v60 = vsel %vm332_vm1, %v333_v53, %v334_v54  ;;  %v418_v62 = vmul.f32 %v4752_v28, %v4799_v55  ;;  %v453_v63 = vmul.f32 %v4754_v29, %v4728_v21  ;;  %v194_v0 = vrot.slane %v4787_v47, 1 }
  0x10   :  { %v338_v1 = vsel %vm332_vm1, %v336_v58, %v337_v59  ;;  %v397_v2 = vadd.f32 %v335_v60, %v248_v56  ;;  %v454_v3 = vmul.f32 %v4754_v29, %v4733_v22  ;;  %v455_v5 = vmul.f32 %v4754_v29, %v4799_v55 }
  0x11   :  { %4204 = vmatpush3.bf16.msra.mxu0 %v1151_v20  ;;  %4236 = vmatpush3.bf16.msra.mxu1 %v1151_v20  ;;  %v398_v4 = vadd.f32 %v338_v1, %v249_v57  ;;  %v456_v6 = vmul.f32 %v4754_v29, %v4750_v27  ;;  %v517_v7 = vrot.slane %v453_v63, 1  ;;  %v601_v10 = vmul.f32 %v4757_v30, %v4728_v21  ;;  %v4828_v21 = vld [vmem:[%s8231_s0 + $0x30] sm:$0xff]  ;;  %v65_v1 = vld [vmem:[%s8231_s0 + $0xe8] sm:$0x3] }
  0x12   :  { %v433_v8 = vadd.f32 %v417_v61, %v397_v2  ;;  %v518_v9 = vrot.slane %v454_v3, 1  ;;  %v602_v11 = vmul.f32 %v4757_v30, %v4733_v22  ;;  %v520_v13 = vrot.slane %v455_v5, 1  ;;  %v4868_v2 = vld [vmem:[%s8231_s0 + $0xf0] sm:$0xff] }
  0x13   :  { %v434_v12 = vadd.f32 %v418_v62, %v398_v4  ;;  %v521_v14 = vrot.slane %v456_v6, 1  ;;  %v603_v16 = vmul.f32 %v4757_v30, %v4799_v55  ;;  %v604_v18 = vmul.f32 %v4757_v30, %v4750_v27 }
  0x14   :  { %v519_v17 = vsel %vm183_vm0, %v517_v7, %v518_v9  ;;  %v665_v19 = vrot.slane %v601_v10, 2  ;;  %v666_v20 = vrot.slane %v602_v11, 2  ;;  %v749_v36 = vmul.f32 %v4760_v31, %v4799_v55  ;;  %v67_v7 = vld [vmem:[%s8231_s0 + $0xf8] sm:$0x3] }
  0x15   :  { %v522_v22 = vsel %vm183_vm0, %v520_v13, %v521_v14  ;;  %v581_v32 = vadd.f32 %v519_v17, %v433_v8  ;;  %v668_v33 = vrot.slane %v603_v16, 2  ;;  %v669_v39 = vrot.slane %v604_v18, 2  ;;  %v4877_v8 = vld [vmem:[%s8231_s0 + $0x108] sm:$0x3]  ;;  %v4890_v16 = vld [vmem:[%s8233_s3] ss:$0 sm:$0xff] }
  0x16   :  { %v582_v37 = vadd.f32 %v522_v22, %v434_v12  ;;  %v667_v38 = vsel %vm332_vm1, %v665_v19, %v666_v20  ;;  %v750_v41 = vmul.f32 %v4760_v31, %v4828_v21  ;;  %v785_v43 = vmul.f32 %v4765_v34, %v4799_v55  ;;  %v4882_v12 = vld [vmem:[%s8231_s0 + $0x118] sm:$0x3] }
  0x17   :  { %v729_v42 = vadd.f32 %v667_v38, %v581_v32  ;;  %v786_v44 = vmul.f32 %v4765_v34, %v4750_v27  ;;  %v787_v45 = vmul.f32 %v4765_v34, %v4828_v21  ;;  %v670_v49 = vsel %vm332_vm1, %v668_v33, %v669_v39 }
  0x18   :  { %v788_v50 = vmul.f32 %v4765_v34, %v4770_v35  ;;  %v4850_v51 = vrot.slane %v4738_v23, %v4714_v15  ;;  %v95_v52 = vmul.f32 %v4740_v24, %v64_v46  ;;  %v730_v53 = vadd.f32 %v670_v49, %v582_v37 }
  0x19   :  { %v765_v54 = vadd.f32 %v749_v36, %v729_v42  ;;  %v849_v56 = vrot.slane %v785_v43, 1  ;;  %v850_v57 = vrot.slane %v786_v44, 1  ;;  %v852_v58 = vrot.slane %v787_v45, 1 }
  0x1a   :  { %v853_v59 = vrot.slane %v788_v50, 1  ;;  %v933_v60 = vmul.f32 %v4850_v51, %v4799_v55  ;;  %v934_v61 = vmul.f32 %v4850_v51, %v4750_v27  ;;  %v766_v62 = vadd.f32 %v750_v41, %v730_v53 }
  0x1b   :  { %v851_v63 = vsel %vm183_vm0, %v849_v56, %v850_v57  ;;  %v935_v15 = vmul.f32 %v4850_v51, %v4828_v21  ;;  %v936_v23 = vmul.f32 %v4850_v51, %v4770_v35  ;;  %v96_v13 = vmul.f32 %v4740_v24, %v4868_v2 }
  0x1c   :  { %v854_v3 = vsel %vm183_vm0, %v852_v58, %v853_v59  ;;  %v913_v4 = vadd.f32 %v851_v63, %v765_v54  ;;  %v997_v5 = vrot.slane %v933_v60, 2  ;;  %v998_v6 = vrot.slane %v934_v61, 2 }
  0x1d   :  { %v914_v9 = vadd.f32 %v854_v3, %v766_v62  ;;  %v1000_v10 = vrot.slane %v935_v15, 2  ;;  %v1001_v11 = vrot.slane %v936_v23, 2  ;;  %v143_v17 = vmul.f32 %v4742_v25, %v64_v46  ;;  %v4920_v15 = vld [vmem:[%s8231_s0 + $0x100] sm:$0xff] }
  0x1e   :  { %v999_v14 = vsel %vm332_vm1, %v997_v5, %v998_v6  ;;  %v144_v18 = vmul.f32 %v4742_v25, %v65_v1  ;;  %v145_v19 = vmul.f32 %v4742_v25, %v4868_v2  ;;  %v146_v32 = vmul.f32 %v4742_v25, %v67_v7 }
  0x1f   :  { %v1002_v20 = vsel %vm332_vm1, %v1000_v10, %v1001_v11  ;;  %v1061_v22 = vadd.f32 %v999_v14, %v913_v4  ;;  %v4900_v33 = vmul.f32 %v4742_v25, %v4877_v8  ;;  %v4904_v37 = vmul.f32 %v4742_v25, %v4882_v12 }
  0x20   :  { %v1062_v36 = vadd.f32 %v1002_v20, %v914_v9  ;;  %v220_v38 = vrot.slane %v143_v17, 1  ;;  %v221_v39 = vrot.slane %v144_v18, 1  ;;  %v223_v42 = vrot.slane %v145_v19, 1 }
  0x21   :  { %v1084_v41 = vadd.f32 %v4890_v16, %v1061_v22  ;;  %v224_v43 = vrot.slane %v146_v32, 1  ;;  %v227_v44 = vrot.slane %v4900_v33, 1  ;;  %v230_v50 = vrot.slane %v4904_v37, 1 }
  0x22   :  { %v1085_v45 = vadd.f32 %v4890_v16, %v1062_v36  ;;  %v222_v49 = vsel %vm183_vm0, %v220_v38, %v221_v39  ;;  %v292_v53 = vmul.f32 %v4745_v26, %v64_v46  ;;  %v293_v58 = vmul.f32 %v4745_v26, %v65_v1 }
  0x23   :  { %v1100_v54 = vmax.f32 %v1084_v41, 0.0  ;;  %v225_v56 = vsel %vm183_vm0, %v223_v42, %v224_v43  ;;  %v260_v57 = vadd.f32 %v222_v49, %v95_v52  ;;  %v294_v61 = vmul.f32 %v4745_v26, %v4868_v2 }
  0x24   :  { %v1101_v59 = vmax.f32 %v1085_v45, 0.0  ;;  %v261_v60 = vadd.f32 %v225_v56, %v96_v13  ;;  %v295_v62 = vmul.f32 %v4745_v26, %v67_v7  ;;  %v369_v46 = vrot.slane %v292_v53, 2 }
  0x25   :  { %v1116_v63 = vmin.f32 %v1100_v54, 6.0  ;;  %v370_v23 = vrot.slane %v293_v58, 2  ;;  %v429_v52 = vmul.f32 %v4752_v28, %v4868_v2  ;;  %v372_v1 = vrot.slane %v294_v61, 2 }
  0x26   :  { %v1117_v3 = vmin.f32 %v1101_v59, 6.0  ;;  %v373_v4 = vrot.slane %v295_v62, 2  ;;  %v430_v5 = vmul.f32 %v4752_v28, %v4920_v15  ;;  %v477_v9 = vmul.f32 %v4754_v29, %v4868_v2 }
  0x27   :  { %v371_v6 = vsel %vm332_vm1, %v369_v46, %v370_v23  ;;  %v478_v10 = vmul.f32 %v4754_v29, %v67_v7  ;;  %v479_v11 = vmul.f32 %v4754_v29, %v4920_v15  ;;  %v480_v18 = vmul.f32 %v4754_v29, %v4877_v8 }
  0x28   :  { %v1132_v13 = vpack.c.bf16 %v1117_v3, %v1116_v63  ;;  %v374_v14 = vsel %vm332_vm1, %v372_v1, %v373_v4  ;;  %v409_v17 = vadd.f32 %v371_v6, %v260_v57  ;;  %v553_v20 = vrot.slane %v477_v9, 1 }
  0x29   :  { %v410_v19 = vadd.f32 %v374_v14, %v261_v60  ;;  %v554_v22 = vrot.slane %v478_v10, 1  ;;  %v556_v32 = vrot.slane %v479_v11, 1  ;;  %v557_v38 = vrot.slane %v480_v18, 1 }
  0x2a   :  { %4205 = vmatprep.mubr.msk.bf16.mxu0 %vm1159_vm2, %v1132_v13  ;;  %v445_v36 = vadd.f32 %v429_v52, %v409_v17  ;;  %v625_v39 = vmul.f32 %v4757_v30, %v4868_v2  ;;  %v626_v41 = vmul.f32 %v4757_v30, %v67_v7  ;;  %v627_v45 = vmul.f32 %v4757_v30, %v4920_v15  ;;  %v4948_v2 = vld [vmem:[%s8231_s0 + $0x110] sm:$0xff] }
  0x2b   :  { %v446_v42 = vadd.f32 %v430_v5, %v410_v19  ;;  %v555_v43 = vsel %vm183_vm0, %v553_v20, %v554_v22  ;;  %v628_v49 = vmul.f32 %v4757_v30, %v4877_v8  ;;  %v558_v53 = vsel %vm183_vm0, %v556_v32, %v557_v38 }
  0x2c   :  { %v593_v54 = vadd.f32 %v555_v43, %v445_v36  ;;  %v701_v56 = vrot.slane %v625_v39, 2  ;;  %v702_v57 = vrot.slane %v626_v41, 2  ;;  %v704_v58 = vrot.slane %v627_v45, 2 }
  0x2d   :  { %v594_v7 = vadd.f32 %v558_v53, %v446_v42  ;;  %v705_v59 = vrot.slane %v628_v49, 2  ;;  %v761_v60 = vmul.f32 %v4760_v31, %v4920_v15  ;;  %v762_v62 = vmul.f32 %v4760_v31, %v4948_v2 }
  0x2e   :  { %v703_v61 = vsel %vm332_vm1, %v701_v56, %v702_v57  ;;  %v809_v63 = vmul.f32 %v4765_v34, %v4920_v15  ;;  %v810_v46 = vmul.f32 %v4765_v34, %v4877_v8  ;;  %v811_v3 = vmul.f32 %v4765_v34, %v4948_v2 }
  0x2f   :  { %v706_v23 = vsel %vm332_vm1, %v704_v58, %v705_v59  ;;  %v741_v52 = vadd.f32 %v703_v61, %v593_v54  ;;  %v812_v1 = vmul.f32 %v4765_v34, %v4882_v12  ;;  %v957_v9 = vmul.f32 %v4850_v51, %v4920_v15 }
  0x30   :  { %v742_v4 = vadd.f32 %v706_v23, %v594_v7  ;;  %v885_v5 = vrot.slane %v809_v63, 1  ;;  %v886_v6 = vrot.slane %v810_v46, 1  ;;  %v888_v11 = vrot.slane %v811_v3, 1  ;;  %v4994_v46 = vld [vmem:[%s8231_s0 + $0x40] sm:$0xff] }
  0x31   :  { %v777_v10 = vadd.f32 %v761_v60, %v741_v52  ;;  %v889_v13 = vrot.slane %v812_v1, 1  ;;  %v958_v14 = vmul.f32 %v4850_v51, %v4877_v8  ;;  %v959_v19 = vmul.f32 %v4850_v51, %v4948_v2 }
  0x32   :  { %v778_v17 = vadd.f32 %v762_v62, %v742_v4  ;;  %v887_v18 = vsel %vm183_vm0, %v885_v5, %v886_v6  ;;  %v960_v20 = vmul.f32 %v4850_v51, %v4882_v12  ;;  %v1033_v36 = vrot.slane %v957_v9, 2  ;;  %v5008_v6 = vld [vmem:[%s8231_s0 + $0x48] sm:$0x3] }
  0x33   :  { %v890_v22 = vsel %vm183_vm0, %v888_v11, %v889_v13  ;;  %v925_v32 = vadd.f32 %v887_v18, %v777_v10  ;;  %v1034_v38 = vrot.slane %v958_v14, 2  ;;  %v1036_v41 = vrot.slane %v959_v19, 2 }
  0x34   :  { %v926_v39 = vadd.f32 %v890_v22, %v778_v17  ;;  %v1037_v42 = vrot.slane %v960_v20, 2  ;;  %v85_v43 = vmul.f32 %v4740_v24, %v4799_v55  ;;  %v86_v49 = vmul.f32 %v4740_v24, %v4828_v21 }
  0x35   :  { %v1035_v45 = vsel %vm332_vm1, %v1033_v36, %v1034_v38  ;;  %v123_v53 = vmul.f32 %v4742_v25, %v4799_v55  ;;  %v125_v54 = vmul.f32 %v4742_v25, %v4828_v21  ;;  %v272_v7 = vmul.f32 %v4745_v26, %v4799_v55 }
  0x36   :  { %v1038_v56 = vsel %vm332_vm1, %v1036_v41, %v1037_v42  ;;  %v1073_v57 = vadd.f32 %v1035_v45, %v925_v32  ;;  %v273_v58 = vmul.f32 %v4745_v26, %v4750_v27  ;;  %v274_v62 = vmul.f32 %v4745_v26, %v4828_v21 }
  0x37   :  { %v1074_v59 = vadd.f32 %v1038_v56, %v926_v39  ;;  %v190_v60 = vrot.slane %v123_v53, 1  ;;  %v193_v61 = vrot.slane %v125_v54, 1  ;;  %v275_v23 = vmul.f32 %v4745_v26, %v4770_v35  ;;  %v5029_v53 = vld [vmem:[%s8231_s0 + $0x50] sm:$0xff] }
  0x38   :  { %v1096_v63 = vadd.f32 %v4890_v16, %v1073_v57  ;;  %v339_v55 = vrot.slane %v272_v7, 2  ;;  %v340_v52 = vrot.slane %v273_v58, 2  ;;  %v342_v4 = vrot.slane %v274_v62, 2 }
  0x39   :  { %v1097_v27 = vadd.f32 %v4890_v16, %v1074_v59  ;;  %v192_v3 = vsel %vm183_vm0, %v190_v60, %v191_v48  ;;  %v195_v1 = vsel %vm183_vm0, %v193_v61, %v194_v0  ;;  %v343_v14 = vrot.slane %v275_v23, 2 }
  0x3a   :  { %v1112_v5 = vmax.f32 %v1096_v63, 0.0  ;;  %v250_v9 = vadd.f32 %v192_v3, %v85_v43  ;;  %v251_v10 = vadd.f32 %v195_v1, %v86_v49  ;;  %v341_v11 = vsel %vm332_vm1, %v339_v55, %v340_v52 }
  0x3b   :  { %v1113_v13 = vmax.f32 %v1097_v27, 0.0  ;;  %v419_v40 = vmul.f32 %v4752_v28, %v4828_v21  ;;  %v420_v47 = vmul.f32 %v4752_v28, %v4994_v46  ;;  %v457_v17 = vmul.f32 %v4754_v29, %v4828_v21 }
  0x3c   :  { %v1128_v48 = vmin.f32 %v1112_v5, 6.0  ;;  %v399_v0 = vadd.f32 %v341_v11, %v250_v9  ;;  %v458_v18 = vmul.f32 %v4754_v29, %v4770_v35  ;;  %v344_v20 = vsel %vm332_vm1, %v342_v4, %v343_v14 }
  0x3d   :  { %v1129_v19 = vmin.f32 %v1113_v13, 6.0  ;;  %v459_v22 = vmul.f32 %v4754_v29, %v4994_v46  ;;  %v460_v32 = vmul.f32 %v4754_v29, %v5008_v6  ;;  %v400_v36 = vadd.f32 %v344_v20, %v251_v10 }
  0x3e   :  { %v435_v38 = vadd.f32 %v419_v40, %v399_v0  ;;  %v523_v39 = vrot.slane %v457_v17, 1  ;;  %v524_v41 = vrot.slane %v458_v18, 1  ;;  %v605_v49 = vmul.f32 %v4757_v30, %v4828_v21  ;;  %v5040_v21 = vld [vmem:[%s8231_s0 + $0x58] sm:$0x3]  ;;  %v5064_v40 = vld [vmem:[%s8234_s8 + $0x8] sm:$0xff]  ;;  %v5073_v18 = vld [vmem:[%s8234_s8] sm:$0xff] }
  0x3f   :  { %v1138_v42 = vpack.c.bf16 %v1129_v19, %v1128_v48  ;;  %v526_v43 = vrot.slane %v459_v22, 1  ;;  %v527_v45 = vrot.slane %v460_v32, 1  ;;  %v436_v54 = vadd.f32 %v420_v47, %v400_v36  ;;  %1583 = vrot.lane.b32.xlu1 %v5064_v40, %s4617_s4  ;;  %v5083_v36 = vld [vmem:[%s8234_s8 + $0x10] sm:$0xff]  ;;  %1581 = vrot.lane.b32.xlu0 %v5073_v18, %s4617_s4 }
  0x40   :  { %v525_v56 = vsel %vm183_vm0, %v523_v39, %v524_v41  ;;  %v606_v57 = vmul.f32 %v4757_v30, %v4770_v35  ;;  %v607_v7 = vmul.f32 %v4757_v30, %v4994_v46  ;;  %v608_v60 = vmul.f32 %v4757_v30, %v5008_v6 }
  0x41   :  { %4217 = vmatprep.mubr.msk.bf16.mxu1 %vm1159_vm2, %v1138_v42  ;;  %v528_v58 = vsel %vm183_vm0, %v526_v43, %v527_v45  ;;  %v583_v59 = vadd.f32 %v525_v56, %v435_v38  ;;  %v671_v61 = vrot.slane %v605_v49, 2  ;;  %v751_v23 = vmul.f32 %v4760_v31, %v4994_v46  ;;  %v5091_v43 = vld [vmem:[%s8234_s8 + $0x20] sm:$0xff] }
  0x42   :  { %v584_v62 = vadd.f32 %v528_v58, %v436_v54  ;;  %v672_v63 = vrot.slane %v606_v57, 2  ;;  %v674_v35 = vrot.slane %v607_v7, 2  ;;  %v675_v55 = vrot.slane %v608_v60, 2 }
  0x43   :  { %v752_v52 = vmul.f32 %v4760_v31, %v5029_v53  ;;  %v789_v27 = vmul.f32 %v4765_v34, %v4994_v46  ;;  %v790_v3 = vmul.f32 %v4765_v34, %v5008_v6  ;;  %v791_v4 = vmul.f32 %v4765_v34, %v5029_v53  ;;  %1585 = vrot.lane.b32.xlu1 %v5083_v36, %s4617_s4 }
  0x44   :  { %v673_v1 = vsel %vm332_vm1, %v671_v61, %v672_v63  ;;  %v792_v5 = vmul.f32 %v4765_v34, %v5040_v21  ;;  %v937_v9 = vmul.f32 %v4850_v51, %v4994_v46  ;;  %v676_v10 = vsel %vm332_vm1, %v674_v35, %v675_v55  ;;  %v5110_v35 = vld [vmem:[%s8234_s8 + $0x18] sm:$0xff]  ;;  %1589 = vrot.lane.b32.xlu0 %v5091_v43, %s4617_s4 }
  0x45   :  { %v731_v11 = vadd.f32 %v673_v1, %v583_v59  ;;  %v855_v13 = vrot.slane %v789_v27, 1  ;;  %v856_v14 = vrot.slane %v790_v3, 1  ;;  %v732_v47 = vadd.f32 %v676_v10, %v584_v62 }
  0x46   :  { %v858_v48 = vrot.slane %v791_v4, 1  ;;  %v859_v0 = vrot.slane %v792_v5, 1  ;;  %v938_v17 = vmul.f32 %v4850_v51, %v5008_v6  ;;  %v939_v22 = vmul.f32 %v4850_v51, %v5029_v53 }
  0x47   :  { %v767_v19 = vadd.f32 %v751_v23, %v731_v11  ;;  %v857_v20 = vsel %vm183_vm0, %v855_v13, %v856_v14  ;;  %v940_v32 = vmul.f32 %v4850_v51, %v5040_v21  ;;  %v768_v38 = vadd.f32 %v752_v52, %v732_v47  ;;  %1587 = vrot.lane.b32.xlu1 %v5110_v35, %s4617_s4 }
  0x48   :  { %v860_v39 = vsel %vm183_vm0, %v858_v48, %v859_v0  ;;  %v1003_v41 = vrot.slane %v937_v9, 2  ;;  %v1004_v42 = vrot.slane %v938_v17, 2  ;;  %v1006_v49 = vrot.slane %v939_v22, 2  ;;  %v5143_v17 = vld [vmem:[%s8234_s8 + $0x28] sm:$0xff] }
  0x49   :  { %v915_v45 = vadd.f32 %v857_v20, %v767_v19  ;;  %v1007_v54 = vrot.slane %v940_v32, 2  ;;  %v97_v56 = vmul.f32 %v4740_v24, %v4920_v15  ;;  %v916_v57 = vadd.f32 %v860_v39, %v768_v38  ;;  %v5158_v20 = vld [vmem:[%s8234_s8 + $0x40] sm:$0xff] }
  0x4a   :  { %v1005_v7 = vsel %vm332_vm1, %v1003_v41, %v1004_v42  ;;  %v98_v58 = vmul.f32 %v4740_v24, %v4948_v2  ;;  %v147_v59 = vmul.f32 %v4742_v25, %v4920_v15  ;;  %v149_v62 = vmul.f32 %v4742_v25, %v4948_v2 }
  0x4b   :  { %v1008_v60 = vsel %vm332_vm1, %v1006_v49, %v1007_v54  ;;  %v1063_v61 = vadd.f32 %v1005_v7, %v915_v45  ;;  %v296_v63 = vmul.f32 %v4745_v26, %v4920_v15  ;;  %v297_v52 = vmul.f32 %v4745_v26, %v4877_v8  ;;  %v5121_v15 = vld [vmem:[%s8234_s8 + $0x30] sm:$0xff]  ;;  %v5130_v8 = vld [vmem:[%s8231_s0 + $0x120] sm:$0xff]  ;;  %1591 = vrot.lane.b32.xlu1 %v5143_v17, %s4617_s4 }
  0x4c   :  { %v1064_v23 = vadd.f32 %v1008_v60, %v916_v57  ;;  %v226_v55 = vrot.slane %v147_v59, 1  ;;  %v298_v27 = vmul.f32 %v4745_v26, %v4948_v2  ;;  %v229_v1 = vrot.slane %v149_v62, 1  ;;  %1593 = vrot.lane.b32.xlu0 %v5121_v15, %s4617_s4 }
  0x4d   :  { %v1086_v3 = vadd.f32 %v4890_v16, %v1063_v61  ;;  %v299_v4 = vmul.f32 %v4745_v26, %v4882_v12  ;;  %v375_v5 = vrot.slane %v296_v63, 2  ;;  %v376_v11 = vrot.slane %v297_v52, 2  ;;  %v5185_v63 = vld [vmem:[%s8234_s8 + $0x50] sm:$0xff] }
  0x4e   :  { %v1087_v9 = vadd.f32 %v4890_v16, %v1064_v23  ;;  %v228_v10 = vsel %vm183_vm0, %v226_v55, %v227_v44  ;;  %v378_v13 = vrot.slane %v298_v27, 2  ;;  %v231_v47 = vsel %vm183_vm0, %v229_v1, %v230_v50  ;;  %v5150_v44 = vld [vmem:[%s8231_s0 + $0x128] sm:$0x3] }
  0x4f   :  { %v1102_v14 = vmax.f32 %v1086_v3, 0.0  ;;  %v262_v48 = vadd.f32 %v228_v10, %v97_v56  ;;  %v379_v0 = vrot.slane %v299_v4, 2  ;;  %v263_v19 = vadd.f32 %v231_v47, %v98_v58  ;;  %v5178_v58 = vld [vmem:[%s8234_s8 + $0x38] sm:$0xff] }
  0x50   :  { %v1103_v33 = vmax.f32 %v1087_v9, 0.0  ;;  %v377_v37 = vsel %vm332_vm1, %v375_v5, %v376_v11  ;;  %v431_v50 = vmul.f32 %v4752_v28, %v4948_v2  ;;  %v432_v39 = vmul.f32 %v4752_v28, %v5130_v8  ;;  %1597 = vrot.lane.b32.xlu0 %v5158_v20, %s4617_s4  ;;  %v75_v3 = vld [vmem:[%s8231_s0 + $0x138] sm:$0x3]  ;;  %1595 = vrot.lane.b32.xlu1 %v5178_v58, %s4617_s4 }
  0x51   :  { %v1118_v22 = vmin.f32 %v1102_v14, 6.0  ;;  %v380_v32 = vsel %vm332_vm1, %v378_v13, %v379_v0  ;;  %v411_v38 = vadd.f32 %v377_v37, %v262_v48  ;;  %v481_v45 = vmul.f32 %v4754_v29, %v4948_v2  ;;  %v5209_v14 = vld [vmem:[%s8234_s8 + $0x48] sm:$0xff] }
  0x52   :  { %v1119_v41 = vmin.f32 %v1103_v33, 6.0  ;;  %v412_v42 = vadd.f32 %v380_v32, %v263_v19  ;;  %v482_v49 = vmul.f32 %v4754_v29, %v4882_v12  ;;  %v483_v56 = vmul.f32 %v4754_v29, %v5130_v8  ;;  %v5219_v19 = vld [vmem:[%s8234_s8 + $0x60] sm:$0xff] }
  0x53   :  { %v447_v54 = vadd.f32 %v431_v50, %v411_v38  ;;  %v484_v57 = vmul.f32 %v4754_v29, %v5150_v44  ;;  %v629_v7 = vmul.f32 %v4757_v30, %v4948_v2  ;;  %v559_v61 = vrot.slane %v481_v45, 1  ;;  %v74_v2 = vld [vmem:[%s8231_s0 + $0x130] sm:$0xff] }
  0x54   :  { %v1133_v59 = vpack.c.bf16 %v1119_v41, %v1118_v22  ;;  %v448_v60 = vadd.f32 %v432_v39, %v412_v42  ;;  %v560_v62 = vrot.slane %v482_v49, 1  ;;  %v562_v23 = vrot.slane %v483_v56, 1  ;;  %1601 = vrot.lane.b32.xlu0 %v5185_v63, %s4617_s4  ;;  %1599 = vrot.lane.b32.xlu1 %v5209_v14, %s4617_s4 }
  0x55   :  { %v563_v55 = vrot.slane %v484_v57, 1  ;;  %v630_v52 = vmul.f32 %v4757_v30, %v4882_v12  ;;  %v631_v27 = vmul.f32 %v4757_v30, %v5130_v8  ;;  %v632_v4 = vmul.f32 %v4757_v30, %v5150_v44  ;;  %v5234_v57 = vld [vmem:[%s8234_s8 + $0x58] sm:$0xff] }
  0x56   :  { %4206 = vmatmul.mubr.msk.bf16.vlgmr.msra.gmra.mrb[0].mxu0 %vm1159_vm2, %v1133_v59  ;;  %v561_v1 = vsel %vm183_vm0, %v559_v61, %v560_v62  ;;  %v707_v5 = vrot.slane %v629_v7, 2  ;;  %v763_v9 = vmul.f32 %v4760_v31, %v5130_v8  ;;  %v764_v0 = vmul.f32 %v4760_v31, %v74_v2  ;;  %v5245_v61 = vld [vmem:[%s8234_s8 + $0x70] sm:$0xff] }
  0x57   :  { %v564_v12 = vsel %vm183_vm0, %v562_v23, %v563_v55  ;;  %v595_v10 = vadd.f32 %v561_v1, %v447_v54  ;;  %v708_v11 = vrot.slane %v630_v52, 2  ;;  %v710_v13 = vrot.slane %v631_v27, 2 }
  0x58   :  { %v596_v47 = vadd.f32 %v564_v12, %v448_v60  ;;  %v711_v48 = vrot.slane %v632_v4, 2  ;;  %v813_v33 = vmul.f32 %v4765_v34, %v5130_v8  ;;  %v814_v50 = vmul.f32 %v4765_v34, %v5150_v44  ;;  %1605 = vrot.lane.b32.xlu0 %v5219_v19, %s4617_s4  ;;  %1603 = vrot.lane.b32.xlu1 %v5234_v57, %s4617_s4  ;;  %v5260_v12 = vld [vmem:[%s8234_s8 + $0x68] sm:$0xff] }
  0x59   :  { %v709_v37 = vsel %vm332_vm1, %v707_v5, %v708_v11  ;;  %v815_v22 = vmul.f32 %v4765_v34, %v74_v2  ;;  %v816_v32 = vmul.f32 %v4765_v34, %v75_v3  ;;  %v961_v42 = vmul.f32 %v4850_v51, %v5130_v8 }
  0x5a   :  { %v712_v38 = vsel %vm332_vm1, %v710_v13, %v711_v48  ;;  %v743_v39 = vadd.f32 %v709_v37, %v595_v10  ;;  %v891_v41 = vrot.slane %v813_v33, 1  ;;  %v892_v49 = vrot.slane %v814_v50, 1 }
  0x5b   :  { %v744_v45 = vadd.f32 %v712_v38, %v596_v47  ;;  %v894_v54 = vrot.slane %v815_v22, 1  ;;  %v895_v56 = vrot.slane %v816_v32, 1  ;;  %v962_v59 = vmul.f32 %v4850_v51, %v5150_v44 }
  0x5c   :  { %v779_v7 = vadd.f32 %v763_v9, %v743_v39  ;;  %v963_v8 = vmul.f32 %v4850_v51, %v74_v2  ;;  %v964_v60 = vmul.f32 %v4850_v51, %v75_v3  ;;  %v893_v23 = vsel %vm183_vm0, %v891_v41, %v892_v49  ;;  %1609 = vrot.lane.b32.xlu0 %v5245_v61, %s4617_s4  ;;  %v5285_v49 = vld [vmem:[%s8234_s8 + $0x78] sm:$0xff]  ;;  %s4620_s8 = smov 116  }
  0x5d   :  { %v780_v62 = vadd.f32 %v764_v0, %v744_v45  ;;  %v896_v55 = vsel %vm183_vm0, %v894_v54, %v895_v56  ;;  %v1039_v52 = vrot.slane %v961_v42, 2  ;;  %v1040_v1 = vrot.slane %v962_v59, 2  ;;  %1607 = vrot.lane.b32.xlu1 %v5260_v12, %s4617_s4 }
  0x5e   :  { %v927_v27 = vadd.f32 %v893_v23, %v779_v7  ;;  %v1042_v4 = vrot.slane %v963_v8, 2  ;;  %v1043_v5 = vrot.slane %v964_v60, 2  ;;  %v87_v2 = vmul.f32 %v4740_v24, %v4994_v46 }
  0x5f   :  { %v928_v44 = vadd.f32 %v896_v55, %v780_v62  ;;  %v88_v3 = vmul.f32 %v4740_v24, %v5029_v53  ;;  %v127_v9 = vmul.f32 %v4742_v25, %v4994_v46  ;;  %v1041_v10 = vsel %vm332_vm1, %v1039_v52, %v1040_v1  ;;  %v5299_v1 = vld [vmem:[%s8231_s0 + $0x60] sm:$0xff] }
  0x60   :  { %v1044_v11 = vsel %vm332_vm1, %v1042_v4, %v1043_v5  ;;  %v128_v13 = vmul.f32 %v4742_v25, %v5008_v6  ;;  %v129_v47 = vmul.f32 %v4742_v25, %v5029_v53  ;;  %v1075_v48 = vadd.f32 %v1041_v10, %v927_v27  ;;  %1645 = vrot.lane.b32.xlu0 %v5073_v18, %s4618_s11 }
  0x61   :  { %v1076_v0 = vadd.f32 %v1044_v11, %v928_v44  ;;  %v130_v33 = vmul.f32 %v4742_v25, %v5040_v21  ;;  %v196_v37 = vrot.slane %v127_v9, 1  ;;  %v276_v32 = vmul.f32 %v4745_v26, %v4994_v46  ;;  %1611 = vrot.lane.b32.xlu1 %v5285_v49, %s4617_s4  ;;  %v5315_v11 = vld [vmem:[%s8231_s0 + $0x68] sm:$0x3] }
  0x62   :  { %v197_v50 = vrot.slane %v128_v13, 1  ;;  %v199_v22 = vrot.slane %v129_v47, 1  ;;  %v277_v38 = vmul.f32 %v4745_v26, %v5008_v6  ;;  %v1098_v39 = vadd.f32 %v4890_v16, %v1075_v48 }
  0x63   :  { %v1099_v41 = vadd.f32 %v4890_v16, %v1076_v0  ;;  %v200_v42 = vrot.slane %v130_v33, 1  ;;  %v278_v45 = vmul.f32 %v4745_v26, %v5029_v53  ;;  %v279_v6 = vmul.f32 %v4745_v26, %v5040_v21 }
  0x64   :  { %v198_v46 = vsel %vm183_vm0, %v196_v37, %v197_v50  ;;  %v345_v54 = vrot.slane %v276_v32, 2  ;;  %v346_v56 = vrot.slane %v277_v38, 2  ;;  %v1114_v7 = vmax.f32 %v1098_v39, 0.0  ;;  %1649 = vrot.lane.b32.xlu0 %v5083_v36, %s4618_s11 }
  0x65   :  { %v1115_v59 = vmax.f32 %v1099_v41, 0.0  ;;  %v201_v8 = vsel %vm183_vm0, %v199_v22, %v200_v42  ;;  %v252_v60 = vadd.f32 %v198_v46, %v87_v2  ;;  %v348_v55 = vrot.slane %v278_v45, 2  ;;  %1647 = vrot.lane.b32.xlu1 %v5064_v40, %s4618_s11  ;;  %v5338_v42 = vld [vmem:[%s8231_s0 + $0x70] sm:$0xff] }
  0x66   :  { %v253_v62 = vadd.f32 %v201_v8, %v88_v3  ;;  %v347_v23 = vsel %vm332_vm1, %v345_v54, %v346_v56  ;;  %v349_v52 = vrot.slane %v279_v6, 2  ;;  %v1130_v18 = vmin.f32 %v1114_v7, 6.0 }
  0x67   :  { %v1131_v27 = vmin.f32 %v1115_v59, 6.0  ;;  %v401_v4 = vadd.f32 %v347_v23, %v252_v60  ;;  %v421_v5 = vmul.f32 %v4752_v28, %v5029_v53  ;;  %v422_v2 = vmul.f32 %v4752_v28, %v5299_v1  ;;  %v5352_v59 = vld [vmem:[%s8231_s0 + $0x78] sm:$0x3] }
  0x68   :  { %v350_v44 = vsel %vm332_vm1, %v348_v55, %v349_v52  ;;  %v461_v3 = vmul.f32 %v4754_v29, %v5029_v53  ;;  %v462_v9 = vmul.f32 %v4754_v29, %v5040_v21  ;;  %v463_v36 = vmul.f32 %v4754_v29, %v5299_v1  ;;  %1653 = vrot.lane.b32.xlu0 %v5091_v43, %s4618_s11 }
  0x69   :  { %v1139_v10 = vpack.c.bf16 %v1131_v27, %v1130_v18  ;;  %v402_v13 = vadd.f32 %v350_v44, %v253_v62  ;;  %v437_v47 = vadd.f32 %v421_v5, %v401_v4  ;;  %v464_v48 = vmul.f32 %v4754_v29, %v5315_v11  ;;  %1651 = vrot.lane.b32.xlu1 %v5110_v35, %s4618_s11 }
  0x6a   :  { %v529_v0 = vrot.slane %v461_v3, 1  ;;  %v530_v33 = vrot.slane %v462_v9, 1  ;;  %v609_v37 = vmul.f32 %v4757_v30, %v5029_v53  ;;  %v532_v22 = vrot.slane %v463_v36, 1 }
  0x6b   :  { %4218 = vmatmul.mubr.msk.bf16.vlgmr.msra.gmra.mrb[0].mxu1 %vm1159_vm2, %v1139_v10  ;;  %v438_v50 = vadd.f32 %v422_v2, %v402_v13  ;;  %v610_v32 = vmul.f32 %v4757_v30, %v5040_v21  ;;  %v611_v38 = vmul.f32 %v4757_v30, %v5299_v1  ;;  %v533_v41 = vrot.slane %v464_v48, 1 }
  0x6c   :  { %v531_v39 = vsel %vm183_vm0, %v529_v0, %v530_v33  ;;  %v612_v53 = vmul.f32 %v4757_v30, %v5315_v11  ;;  %v677_v40 = vrot.slane %v609_v37, 2  ;;  %v753_v6 = vmul.f32 %v4760_v31, %v5299_v1  ;;  %1657 = vrot.lane.b32.xlu0 %v5121_v15, %s4618_s11 }
  0x6d   :  { %v585_v45 = vadd.f32 %v531_v39, %v437_v47  ;;  %v678_v21 = vrot.slane %v610_v32, 2  ;;  %v680_v46 = vrot.slane %v611_v38, 2  ;;  %v534_v43 = vsel %vm183_vm0, %v532_v22, %v533_v41  ;;  %1655 = vrot.lane.b32.xlu1 %v5143_v17, %s4618_s11 }
  0x6e   :  { %v681_v54 = vrot.slane %v612_v53, 2  ;;  %v754_v56 = vmul.f32 %v4760_v31, %v5338_v42  ;;  %v793_v7 = vmul.f32 %v4765_v34, %v5299_v1  ;;  %v586_v8 = vadd.f32 %v534_v43, %v438_v50 }
  0x6f   :  { %v679_v60 = vsel %vm332_vm1, %v677_v40, %v678_v21  ;;  %v794_v62 = vmul.f32 %v4765_v34, %v5315_v11  ;;  %v795_v23 = vmul.f32 %v4765_v34, %v5338_v42  ;;  %v796_v52 = vmul.f32 %v4765_v34, %v5352_v59 }
  0x70   :  { %v682_v55 = vsel %vm332_vm1, %v680_v46, %v681_v54  ;;  %v733_v35 = vadd.f32 %v679_v60, %v585_v45  ;;  %v861_v18 = vrot.slane %v793_v7, 1  ;;  %v941_v44 = vmul.f32 %v4850_v51, %v5299_v1  ;;  %1661 = vrot.lane.b32.xlu0 %v5158_v20, %s4618_s11 }
  0x71   :  { %v734_v27 = vadd.f32 %v682_v55, %v586_v8  ;;  %v862_v4 = vrot.slane %v794_v62, 1  ;;  %v864_v5 = vrot.slane %v795_v23, 1  ;;  %v865_v3 = vrot.slane %v796_v52, 1  ;;  %1659 = vrot.lane.b32.xlu1 %v5178_v58, %s4618_s11 }
  0x72   :  { %v769_v2 = vadd.f32 %v753_v6, %v733_v35  ;;  %v942_v9 = vmul.f32 %v4850_v51, %v5315_v11  ;;  %v943_v15 = vmul.f32 %v4850_v51, %v5338_v42  ;;  %v944_v47 = vmul.f32 %v4850_v51, %v5352_v59 }
  0x73   :  { %v770_v10 = vadd.f32 %v754_v56, %v734_v27  ;;  %v863_v13 = vsel %vm183_vm0, %v861_v18, %v862_v4  ;;  %v1009_v36 = vrot.slane %v941_v44, 2  ;;  %v866_v48 = vsel %vm183_vm0, %v864_v5, %v865_v3  ;;  %v53_v18 = vld [vmem:[%s8231_s0 + $0x88] sm:$0x3] }
  0x74   :  { %v917_v0 = vadd.f32 %v863_v13, %v769_v2  ;;  %v1010_v33 = vrot.slane %v942_v9, 2  ;;  %v1012_v37 = vrot.slane %v943_v15, 2  ;;  %v1013_v22 = vrot.slane %v944_v47, 2  ;;  %1665 = vrot.lane.b32.xlu0 %v5185_v63, %s4618_s11 }
  0x75   :  { %v918_v50 = vadd.f32 %v866_v48, %v770_v10  ;;  %v89_v17 = vmul.f32 %v4740_v24, %v5299_v1  ;;  %v90_v32 = vmul.f32 %v4740_v24, %v5338_v42  ;;  %v131_v39 = vmul.f32 %v4742_v25, %v5299_v1  ;;  %1663 = vrot.lane.b32.xlu1 %v5209_v14, %s4618_s11 }
  0x76   :  { %v1011_v38 = vsel %vm332_vm1, %v1009_v36, %v1010_v33  ;;  %v132_v20 = vmul.f32 %v4742_v25, %v5315_v11  ;;  %v133_v41 = vmul.f32 %v4742_v25, %v5338_v42  ;;  %v1014_v53 = vsel %vm332_vm1, %v1012_v37, %v1013_v22  ;;  %v54_v33 = vld [vmem:[%s8231_s0 + $0x90] sm:$0xff] }
  0x77   :  { %v1065_v40 = vadd.f32 %v1011_v38, %v917_v0  ;;  %v134_v45 = vmul.f32 %v4742_v25, %v5352_v59  ;;  %v280_v21 = vmul.f32 %v4745_v26, %v5299_v1  ;;  %v1066_v46 = vadd.f32 %v1014_v53, %v918_v50  ;;  %v52_v1 = vld [vmem:[%s8231_s0 + $0x80] sm:$0xff] }
  0x78   :  { %v202_v6 = vrot.slane %v131_v39, 1  ;;  %v203_v43 = vrot.slane %v132_v20, 1  ;;  %v205_v54 = vrot.slane %v133_v41, 1  ;;  %v281_v58 = vmul.f32 %v4745_v26, %v5315_v11  ;;  %1669 = vrot.lane.b32.xlu0 %v5219_v19, %s4618_s11 }
  0x79   :  { %v1088_v56 = vadd.f32 %v4890_v16, %v1065_v40  ;;  %v206_v7 = vrot.slane %v134_v45, 1  ;;  %v282_v8 = vmul.f32 %v4745_v26, %v5338_v42  ;;  %v1089_v60 = vadd.f32 %v4890_v16, %v1066_v46  ;;  %1667 = vrot.lane.b32.xlu1 %v5234_v57, %s4618_s11 }
  0x7a   :  { %v204_v63 = vsel %vm183_vm0, %v202_v6, %v203_v43  ;;  %v283_v62 = vmul.f32 %v4745_v26, %v5352_v59  ;;  %v351_v23 = vrot.slane %v280_v21, 2  ;;  %v352_v52 = vrot.slane %v281_v58, 2 }
  0x7b   :  { %v1104_v55 = vmax.f32 %v1088_v56, 0.0  ;;  %v207_v11 = vsel %vm183_vm0, %v205_v54, %v206_v7  ;;  %v254_v35 = vadd.f32 %v204_v63, %v89_v17  ;;  %v1105_v16 = vmax.f32 %v1089_v60, 0.0 }
  0x7c   :  { %v255_v27 = vadd.f32 %v207_v11, %v90_v32  ;;  %v354_v4 = vrot.slane %v282_v8, 2  ;;  %v355_v5 = vrot.slane %v283_v62, 2  ;;  %v353_v2 = vsel %vm332_vm1, %v351_v23, %v352_v52  ;;  %1673 = vrot.lane.b32.xlu0 %v5245_v61, %s4618_s11 }
  0x7d   :  { %v1120_v44 = vmin.f32 %v1104_v55, 6.0  ;;  %v423_v14 = vmul.f32 %v4752_v28, %v5338_v42  ;;  %v424_v3 = vmul.f32 %v4752_v28, %v52_v1  ;;  %v1121_v9 = vmin.f32 %v1105_v16, 6.0  ;;  %1671 = vrot.lane.b32.xlu1 %v5260_v12, %s4618_s11 }
  0x7e   :  { %v356_v15 = vsel %vm332_vm1, %v354_v4, %v355_v5  ;;  %v403_v19 = vadd.f32 %v353_v2, %v254_v35  ;;  %v465_v10 = vmul.f32 %v4754_v29, %v5338_v42  ;;  %v466_v47 = vmul.f32 %v4754_v29, %v5352_v59 }
  0x7f   :  { %v404_v13 = vadd.f32 %v356_v15, %v255_v27  ;;  %v467_v36 = vmul.f32 %v4754_v29, %v52_v1  ;;  %v468_v48 = vmul.f32 %v4754_v29, %v53_v18  ;;  %v1134_v0 = vpack.c.bf16 %v1121_v9, %v1120_v44  ;;  %v58_v15 = vld [vmem:[%s8231_s0 + $0xb0] sm:$0xff] }
  0x80   :  { %v439_v37 = vadd.f32 %v423_v14, %v403_v19  ;;  %v535_v50 = vrot.slane %v465_v10, 1  ;;  %v613_v57 = vmul.f32 %v4757_v30, %v5338_v42  ;;  %v536_v17 = vrot.slane %v466_v47, 1  ;;  %v55_v42 = vld [vmem:[%s8231_s0 + $0x98] sm:$0x3] }
  0x81   :  { %v440_v22 = vadd.f32 %v424_v3, %v404_v13  ;;  %v538_v32 = vrot.slane %v467_v36, 1  ;;  %v539_v38 = vrot.slane %v468_v48, 1  ;;  %4209 = vmatprep.mubr.msk.bf16.mxu0 %vm1159_vm2, %v1134_v0  ;;  %v614_v39 = vmul.f32 %v4757_v30, %v5352_v59  ;;  %1675 = vrot.lane.b32.xlu1 %v5285_v49, %s4618_s11  ;;  %v56_v49 = vld [vmem:[%s8231_s0 + $0xa0] sm:$0xff]  ;;  %v59_v19 = vld [vmem:[%s8231_s0 + $0xb8] sm:$0x3] }
  0x82   :  { %v615_v61 = vmul.f32 %v4757_v30, %v52_v1  ;;  %v616_v20 = vmul.f32 %v4757_v30, %v53_v18  ;;  %v683_v41 = vrot.slane %v613_v57, 2  ;;  %v537_v53 = vsel %vm183_vm0, %v535_v50, %v536_v17 }
  0x83   :  { %v540_v40 = vsel %vm183_vm0, %v538_v32, %v539_v38  ;;  %v755_v45 = vmul.f32 %v4760_v31, %v52_v1  ;;  %v756_v59 = vmul.f32 %v4760_v31, %v54_v33  ;;  %v587_v21 = vadd.f32 %v537_v53, %v439_v37 }
  0x84   :  { %v588_v46 = vadd.f32 %v540_v40, %v440_v22  ;;  %v684_v6 = vrot.slane %v614_v39, 2  ;;  %v686_v43 = vrot.slane %v615_v61, 2  ;;  %v687_v54 = vrot.slane %v616_v20, 2  ;;  %v5490_v20 = vld [vmem:[%s8233_s3] ss:$0 sm:$0xff]  ;;  %s4625_s3 = smov 120  }
  0x85   :  { %v797_v56 = vmul.f32 %v4765_v34, %v52_v1  ;;  %v798_v12 = vmul.f32 %v4765_v34, %v53_v18  ;;  %v799_v7 = vmul.f32 %v4765_v34, %v54_v33  ;;  %v800_v8 = vmul.f32 %v4765_v34, %v55_v42 }
  0x86   :  { %v685_v58 = vsel %vm332_vm1, %v683_v41, %v684_v6  ;;  %v945_v60 = vmul.f32 %v4850_v51, %v52_v1  ;;  %v946_v63 = vmul.f32 %v4850_v51, %v53_v18  ;;  %v688_v62 = vsel %vm332_vm1, %v686_v43, %v687_v54  ;;  %v57_v18 = vld [vmem:[%s8231_s0 + $0xa8] sm:$0x3] }
  0x87   :  { %v735_v23 = vadd.f32 %v685_v58, %v587_v21  ;;  %v867_v55 = vrot.slane %v797_v56, 1  ;;  %v868_v11 = vrot.slane %v798_v12, 1  ;;  %v736_v35 = vadd.f32 %v688_v62, %v588_v46 }
  0x88   :  { %v870_v52 = vrot.slane %v799_v7, 1  ;;  %v871_v16 = vrot.slane %v800_v8, 1  ;;  %v947_v27 = vmul.f32 %v4850_v51, %v54_v33  ;;  %v948_v1 = vmul.f32 %v4850_v51, %v55_v42  ;;  %v5502_v7 = vld [vmem:[%s8231_s0 + $0xc0] sm:$0xff] }
  0x89   :  { %v771_v4 = vadd.f32 %v755_v45, %v735_v23  ;;  %v869_v5 = vsel %vm183_vm0, %v867_v55, %v868_v11  ;;  %v1015_v44 = vrot.slane %v945_v60, 2  ;;  %v772_v2 = vadd.f32 %v756_v59, %v736_v35  ;;  %v5510_v35 = vld [vmem:[%s8231_s0 + $0xc8] sm:$0x3] }
  0x8a   :  { %v872_v14 = vsel %vm183_vm0, %v870_v52, %v871_v16  ;;  %v1016_v3 = vrot.slane %v946_v63, 2  ;;  %v1018_v9 = vrot.slane %v947_v27, 2  ;;  %v1019_v13 = vrot.slane %v948_v1, 2 }
  0x8b   :  { %v919_v10 = vadd.f32 %v869_v5, %v771_v4  ;;  %v91_v47 = vmul.f32 %v4740_v24, %v56_v49  ;;  %v92_v36 = vmul.f32 %v4740_v24, %v58_v15  ;;  %v920_v48 = vadd.f32 %v872_v14, %v772_v2 }
  0x8c   :  { %v1017_v0 = vsel %vm332_vm1, %v1015_v44, %v1016_v3  ;;  %v135_v33 = vmul.f32 %v4742_v25, %v56_v49  ;;  %v136_v37 = vmul.f32 %v4742_v25, %v57_v18  ;;  %v1020_v50 = vsel %vm332_vm1, %v1018_v9, %v1019_v13 }
  0x8d   :  { %v1067_v57 = vadd.f32 %v1017_v0, %v919_v10  ;;  %v137_v22 = vmul.f32 %v4742_v25, %v58_v15  ;;  %v138_v17 = vmul.f32 %v4742_v25, %v59_v19  ;;  %v1068_v32 = vadd.f32 %v1020_v50, %v920_v48 }
  0x8e   :  { %v208_v38 = vrot.slane %v135_v33, 1  ;;  %v209_v39 = vrot.slane %v136_v37, 1  ;;  %v284_v61 = vmul.f32 %v4745_v26, %v56_v49  ;;  %v285_v40 = vmul.f32 %v4745_v26, %v57_v18 }
  0x8f   :  { %v1090_v41 = vadd.f32 %v5490_v20, %v1067_v57  ;;  %v211_v42 = vrot.slane %v137_v22, 1  ;;  %v212_v53 = vrot.slane %v138_v17, 1  ;;  %v1091_v45 = vadd.f32 %v5490_v20, %v1068_v32 }
  0x90   :  { %v210_v59 = vsel %vm183_vm0, %v208_v38, %v209_v39  ;;  %v286_v21 = vmul.f32 %v4745_v26, %v58_v15  ;;  %v287_v46 = vmul.f32 %v4745_v26, %v59_v19  ;;  %v357_v56 = vrot.slane %v284_v61, 2  ;;  %v5539_v38 = vld [vmem:[%s8231_s0 + $0xd8] sm:$0x3] }
  0x91   :  { %v1106_v6 = vmax.f32 %v1090_v41, 0.0  ;;  %v213_v43 = vsel %vm183_vm0, %v211_v42, %v212_v53  ;;  %v256_v54 = vadd.f32 %v210_v59, %v91_v47  ;;  %v1107_v12 = vmax.f32 %v1091_v45, 0.0 }
  0x92   :  { %v257_v58 = vadd.f32 %v213_v43, %v92_v36  ;;  %v358_v8 = vrot.slane %v285_v40, 2  ;;  %v360_v60 = vrot.slane %v286_v21, 2  ;;  %v361_v62 = vrot.slane %v287_v46, 2 }
  0x93   :  { %v1122_v63 = vmin.f32 %v1106_v6, 6.0  ;;  %v425_v23 = vmul.f32 %v4752_v28, %v58_v15  ;;  %v426_v55 = vmul.f32 %v4752_v28, %v5502_v7  ;;  %v1123_v11 = vmin.f32 %v1107_v12, 6.0 }
  0x94   :  { %v359_v52 = vsel %vm332_vm1, %v357_v56, %v358_v8  ;;  %v469_v16 = vmul.f32 %v4754_v29, %v58_v15  ;;  %v470_v27 = vmul.f32 %v4754_v29, %v59_v19  ;;  %v362_v4 = vsel %vm332_vm1, %v360_v60, %v361_v62 }
  0x95   :  { %v405_v5 = vadd.f32 %v359_v52, %v256_v54  ;;  %v471_v1 = vmul.f32 %v4754_v29, %v5502_v7  ;;  %v472_v44 = vmul.f32 %v4754_v29, %v5510_v35  ;;  %v1135_v49 = vpack.c.bf16 %v1123_v11, %v1122_v63 }
  0x96   :  { %v406_v18 = vadd.f32 %v362_v4, %v257_v58  ;;  %v541_v2 = vrot.slane %v469_v16, 1  ;;  %v542_v14 = vrot.slane %v470_v27, 1  ;;  %v617_v13 = vmul.f32 %v4757_v30, %v58_v15  ;;  %v5532_v15 = vld [vmem:[%s8231_s0 + $0xd0] sm:$0xff] }
  0x97   :  { %v441_v3 = vadd.f32 %v425_v23, %v405_v5  ;;  %v544_v9 = vrot.slane %v471_v1, 1  ;;  %v545_v10 = vrot.slane %v472_v44, 1  ;;  %4210 = vmatmul.mubr.msk.bf16.gmra.mrb[4].mxu0 %vm1159_vm2, %v1135_v49  ;;  %v618_v48 = vmul.f32 %v4757_v30, %v59_v19 }
  0x98   :  { %v442_v47 = vadd.f32 %v426_v55, %v406_v18  ;;  %v543_v36 = vsel %vm183_vm0, %v541_v2, %v542_v14  ;;  %v619_v0 = vmul.f32 %v4757_v30, %v5502_v7  ;;  %v620_v50 = vmul.f32 %v4757_v30, %v5510_v35 }
  0x99   :  { %v546_v33 = vsel %vm183_vm0, %v544_v9, %v545_v10  ;;  %v589_v37 = vadd.f32 %v543_v36, %v441_v3  ;;  %v689_v57 = vrot.slane %v617_v13, 2  ;;  %v690_v17 = vrot.slane %v618_v48, 2 }
  0x9a   :  { %v590_v22 = vadd.f32 %v546_v33, %v442_v47  ;;  %v692_v32 = vrot.slane %v619_v0, 2  ;;  %v757_v19 = vmul.f32 %v4760_v31, %v5502_v7  ;;  %v693_v39 = vrot.slane %v620_v50, 2 }
  0x9b   :  { %v758_v61 = vmul.f32 %v4760_v31, %v5532_v15  ;;  %v801_v41 = vmul.f32 %v4765_v34, %v5502_v7  ;;  %v802_v42 = vmul.f32 %v4765_v34, %v5510_v35  ;;  %v691_v53 = vsel %vm332_vm1, %v689_v57, %v690_v17 }
  0x9c   :  { %v803_v40 = vmul.f32 %v4765_v34, %v5532_v15  ;;  %v804_v45 = vmul.f32 %v4765_v34, %v5539_v38  ;;  %v949_v59 = vmul.f32 %v4850_v51, %v5502_v7  ;;  %v694_v21 = vsel %vm332_vm1, %v692_v32, %v693_v39 }
  0x9d   :  { %v737_v46 = vadd.f32 %v691_v53, %v589_v37  ;;  %v873_v6 = vrot.slane %v801_v41, 1  ;;  %v874_v43 = vrot.slane %v802_v42, 1  ;;  %v738_v54 = vadd.f32 %v694_v21, %v590_v22  ;;  %v4613_v21 = vld [vmem:[%s8231_s0 + $0xe0] sm:$0xff] }
  0x9e   :  { %v876_v56 = vrot.slane %v803_v40, 1  ;;  %v877_v12 = vrot.slane %v804_v45, 1  ;;  %v950_v58 = vmul.f32 %v4850_v51, %v5510_v35  ;;  %v951_v63 = vmul.f32 %v4850_v51, %v5532_v15 }
  0x9f   :  { %v773_v8 = vadd.f32 %v757_v19, %v737_v46  ;;  %v875_v60 = vsel %vm183_vm0, %v873_v6, %v874_v43  ;;  %v952_v62 = vmul.f32 %v4850_v51, %v5539_v38  ;;  %v774_v23 = vadd.f32 %v758_v61, %v738_v54 }
  0xa0   :  { %v878_v55 = vsel %vm183_vm0, %v876_v56, %v877_v12  ;;  %v1021_v11 = vrot.slane %v949_v59, 2  ;;  %v1022_v52 = vrot.slane %v950_v58, 2  ;;  %v1024_v27 = vrot.slane %v951_v63, 2 }
  0xa1   :  { %v921_v16 = vadd.f32 %v875_v60, %v773_v8  ;;  %v1025_v4 = vrot.slane %v952_v62, 2  ;;  %v93_v5 = vmul.f32 %v4740_v24, %v5502_v7  ;;  %v922_v1 = vadd.f32 %v878_v55, %v774_v23  ;;  %v4614_v60 = vld [vmem:[%s8231_s0 + $0xe8] sm:$0x3] }
  0xa2   :  { %v1023_v44 = vsel %vm332_vm1, %v1021_v11, %v1022_v52  ;;  %v94_v49 = vmul.f32 %v4740_v24, %v5532_v15  ;;  %v139_v18 = vmul.f32 %v4742_v25, %v5502_v7  ;;  %v140_v3 = vmul.f32 %v4742_v25, %v5510_v35 }
  0xa3   :  { %v1026_v2 = vsel %vm332_vm1, %v1024_v27, %v1025_v4  ;;  %v1069_v14 = vadd.f32 %v1023_v44, %v921_v16  ;;  %v141_v9 = vmul.f32 %v4742_v25, %v5532_v15  ;;  %v142_v13 = vmul.f32 %v4742_v25, %v5539_v38 }
  0xa4   :  { %v1070_v10 = vadd.f32 %v1026_v2, %v922_v1  ;;  %v214_v47 = vrot.slane %v139_v18, 1  ;;  %v288_v24 = vmul.f32 %v4745_v26, %v5502_v7  ;;  %v215_v48 = vrot.slane %v140_v3, 1 }
  0xa5   :  { %v1092_v36 = vadd.f32 %v5490_v20, %v1069_v14  ;;  %v217_v0 = vrot.slane %v141_v9, 1  ;;  %v289_v33 = vmul.f32 %v4745_v26, %v5510_v35  ;;  %v218_v50 = vrot.slane %v142_v13, 1 }
  0xa6   :  { %v1093_v37 = vadd.f32 %v5490_v20, %v1070_v10  ;;  %v290_v57 = vmul.f32 %v4745_v26, %v5532_v15  ;;  %v291_v25 = vmul.f32 %v4745_v26, %v5539_v38  ;;  %v216_v17 = vsel %vm183_vm0, %v214_v47, %v215_v48  ;;  %v4616_v47 = vld [vmem:[%s8231_s0 + $0xf8] sm:$0x3] }
  0xa7   :  { %v1108_v22 = vmax.f32 %v1092_v36, 0.0  ;;  %v363_v7 = vrot.slane %v288_v24, 2  ;;  %v364_v32 = vrot.slane %v289_v33, 2  ;;  %v219_v39 = vsel %vm183_vm0, %v217_v0, %v218_v50 }
  0xa8   :  { %v1109_v19 = vmax.f32 %v1093_v37, 0.0  ;;  %v258_v61 = vadd.f32 %v216_v17, %v93_v5  ;;  %v366_v41 = vrot.slane %v290_v57, 2  ;;  %v259_v42 = vadd.f32 %v219_v39, %v94_v49 }
  0xa9   :  { %v1124_v35 = vmin.f32 %v1108_v22, 6.0  ;;  %v365_v53 = vsel %vm332_vm1, %v363_v7, %v364_v32  ;;  %v367_v40 = vrot.slane %v291_v25, 2  ;;  %v427_v26 = vmul.f32 %v4752_v28, %v5532_v15 }
  0xaa   :  { %v1125_v45 = vmin.f32 %v1109_v19, 6.0  ;;  %v407_v59 = vadd.f32 %v365_v53, %v258_v61  ;;  %v428_v46 = vmul.f32 %v4613_v21, %v4752_v28  ;;  %v473_v43 = vmul.f32 %v4754_v29, %v5532_v15 }
  0xab   :  { %v368_v6 = vsel %vm332_vm1, %v366_v41, %v367_v40  ;;  %v474_v54 = vmul.f32 %v4754_v29, %v5539_v38  ;;  %v475_v56 = vmul.f32 %v4613_v21, %v4754_v29  ;;  %v476_v63 = vmul.f32 %v4614_v60, %v4754_v29 }
  0xac   :  { %v1136_v12 = vpack.c.bf16 %v1125_v45, %v1124_v35  ;;  %v408_v58 = vadd.f32 %v368_v6, %v259_v42  ;;  %v443_v8 = vadd.f32 %v427_v26, %v407_v59  ;;  %v547_v28 = vrot.slane %v473_v43, 1 }
  0xad   :  { %v548_v62 = vrot.slane %v474_v54, 1  ;;  %v550_v23 = vrot.slane %v475_v56, 1  ;;  %v621_v55 = vmul.f32 %v4757_v30, %v5532_v15  ;;  %v551_v52 = vrot.slane %v476_v63, 1 }
  0xae   :  { %4213 = vmatprep.mubr.msk.bf16.mxu0 %vm1159_vm2, %v1136_v12  ;;  %v444_v11 = vadd.f32 %v428_v46, %v408_v58  ;;  %v622_v16 = vmul.f32 %v4757_v30, %v5539_v38  ;;  %v623_v27 = vmul.f32 %v4613_v21, %v4757_v30  ;;  %v624_v5 = vmul.f32 %v4614_v60, %v4757_v30  ;;  %v4615_v38 = vld [vmem:[%s8231_s0 + $0xf0] sm:$0xff]  ;;  %v5643_v12 = vld [vmem:[%s8235_s5] ss:$0 sm:$0xff]  ;;  %s4619_s5 = smov 126  }
  0xaf   :  { %v549_v4 = vsel %vm183_vm0, %v547_v28, %v548_v62  ;;  %v695_v29 = vrot.slane %v621_v55, 2  ;;  %v759_v1 = vmul.f32 %v4613_v21, %v4760_v31  ;;  %v552_v44 = vsel %vm183_vm0, %v550_v23, %v551_v52 }
  0xb0   :  { %v591_v49 = vadd.f32 %v549_v4, %v443_v8  ;;  %v696_v15 = vrot.slane %v622_v16, 2  ;;  %v698_v18 = vrot.slane %v623_v27, 2  ;;  %v592_v2 = vadd.f32 %v552_v44, %v444_v11 }
  0xb1   :  { %v699_v14 = vrot.slane %v624_v5, 2  ;;  %v760_v3 = vmul.f32 %v4615_v38, %v4760_v31  ;;  %v805_v9 = vmul.f32 %v4613_v21, %v4765_v34  ;;  %v806_v10 = vmul.f32 %v4614_v60, %v4765_v34 }
  0xb2   :  { %v697_v30 = vsel %vm332_vm1, %v695_v29, %v696_v15  ;;  %v807_v13 = vmul.f32 %v4615_v38, %v4765_v34  ;;  %v808_v24 = vmul.f32 %v4616_v47, %v4765_v34  ;;  %v953_v31 = vmul.f32 %v4613_v21, %v4850_v51 }
  0xb3   :  { %v700_v36 = vsel %vm332_vm1, %v698_v18, %v699_v14  ;;  %v739_v48 = vadd.f32 %v697_v30, %v591_v49  ;;  %v879_v0 = vrot.slane %v805_v9, 1  ;;  %v880_v37 = vrot.slane %v806_v10, 1 }
  0xb4   :  { %v740_v33 = vadd.f32 %v700_v36, %v592_v2  ;;  %v882_v50 = vrot.slane %v807_v13, 1  ;;  %v883_v57 = vrot.slane %v808_v24, 1  ;;  %v954_v22 = vmul.f32 %v4614_v60, %v4850_v51  ;;  %v5693_v13 = vpop.permute.xlu1 %1583 }
  0xb5   :  { %v775_v25 = vadd.f32 %v759_v1, %v739_v48  ;;  %v955_v17 = vmul.f32 %v4615_v38, %v4850_v51  ;;  %v956_v7 = vmul.f32 %v4616_v47, %v4850_v51  ;;  %v881_v34 = vsel %vm183_vm0, %v879_v0, %v880_v37 }
  0xb6   :  { %v776_v32 = vadd.f32 %v760_v3, %v740_v33  ;;  %v884_v19 = vsel %vm183_vm0, %v882_v50, %v883_v57  ;;  %v1027_v39 = vrot.slane %v953_v31, 2  ;;  %v1028_v41 = vrot.slane %v954_v22, 2  ;;  %v5707_v33 = vpop.permute.xlu0 %1581 }
  0xb7   :  { %v923_v61 = vadd.f32 %v881_v34, %v775_v25  ;;  %v1030_v35 = vrot.slane %v955_v17, 2  ;;  %v1031_v42 = vrot.slane %v956_v7, 2  ;;  %vm1300_vm7 = vcmask 261120  }
  0xb8   :  { %v924_v53 = vadd.f32 %v884_v19, %v776_v32  ;;  %v1029_v40 = vsel %vm332_vm1, %v1027_v39, %v1028_v41  ;;  %v5699_v36 = vpop.permute.xlu1 %1585  ;;  %vm2029_vm8 = vcmask 48128   ;;  %vm3537_vm9 = vcmask 64512  }
  0xb9   :  { %v1032_v45 = vsel %vm332_vm1, %v1030_v35, %v1031_v42  ;;  %v1071_v59 = vadd.f32 %v1029_v40, %v923_v61  ;;  %vm3554_vm10 = vcmask 130048   ;;  %vm3571_vm11 = vcmask 195584  }
  0xba   :  { %v1072_v26 = vadd.f32 %v1032_v45, %v924_v53  ;;  %v5711_v57 = vpop.permute.xlu0 %1589 }
  0xbb   :  { %v1094_v21 = vadd.f32 %v5490_v20, %v1071_v59 }
  0xbc   :  { %v1095_v51 = vadd.f32 %v5490_v20, %v1072_v26  ;;  %v5705_v31 = vpop.permute.xlu1 %1587 }
  0xbd   :  { %v1110_v46 = vmax.f32 %v1094_v21, 0.0 }
  0xbe   :  { %v1111_v6 = vmax.f32 %v1095_v51, 0.0  ;;  %v5725_v61 = vpop.permute.xlu0 %1593 }
  0xbf   :  { %v1126_v43 = vmin.f32 %v1110_v46, 6.0 }
  0xc0   :  { %v1127_v54 = vmin.f32 %v1111_v6, 6.0  ;;  %v5709_v37 = vpop.permute.xlu1 %1591 }
  0xc2   :  { %v1137_v56 = vpack.c.bf16 %v1127_v54, %v1126_v43  ;;  %v5741_v59 = vpop.permute.xlu0 %1597 }
  0xc3   :  { %8363 = vst [vmem:[#allocation15_spill] sm:$0xff] %v5741_v59 }
  0xc4   :  { %4214 = vmatmul.mubr.msk.bf16.gmra.mrb[8].mxu0 %vm1159_vm2, %v1137_v56  ;;  %v5721_v19 = vpop.permute.xlu1 %1595 }
  0xc6   :  { %v5751_v6 = vpop.permute.xlu0 %1601 }
  0xc8   :  { %v5737_v40 = vpop.permute.xlu1 %1599 }
  0xc9   :  { %8362 = vst [vmem:[#allocation14_spill] sm:$0xff] %v5737_v40 }
  0xca   :  { %v5755_v54 = vpop.permute.xlu0 %1605 }
  0xcc   :  { %v5747_v51 = vpop.permute.xlu1 %1603 }
  0xcd   :  { %8364 = vst [vmem:[#allocation16_spill] sm:$0xff] %v5747_v51 }
  0xd0   :  { %v5753_v43 = vpop.permute.xlu1 %1607 }
  0xd4   :  { %v5757_v56 = vpop.permute.xlu1 %1611 }
 0x129   :  { %v4207_v58 = vpop.f32.mrb[0].mxu0 }
 0x12a   :  { %v5646_v8 = vadd.f32 %v4207_v58, %v5643_v12  ;;  %v1218_v60 = vpop.f32.mrb[1].mxu0  ;;  %v5759_v58 = vpop.permute.xlu0 %1609 }
 0x12b   :  { %v4208_v63 = vpop.f32.mrb[2].mxu0  ;;  %v5668_v44 = vadd.f32 %v5643_v12, %v1218_v60  ;;  %v5761_v60 = vpop.permute.xlu1 %1647 }
 0x12c   :  { %8350 = vst [vmem:[#allocation2_spill] sm:$0xff] %v5646_v8  ;;  %v5649_v20 = vadd.f32 %v4208_v63, %v5643_v12  ;;  %v1221_v28 = vpop.f32.mrb[3].mxu0  ;;  %v1379_v62 = vsel %vm1372_vm3, %v5646_v8, -inf  ;;  %v2053_v29 = vsel %vm2046_vm4, %v5646_v8, -inf }
 0x12d   :  { %1380 = vmax.xlane.f32.xlu1 %v1379_v62  ;;  %8354 = vst [vmem:[#allocation6_spill] sm:$0xff] %v5668_v44  ;;  %v1373_v14 = vsel %vm1372_vm3, %v5668_v44, -inf  ;;  %v5683_v38 = vadd.f32 %v5643_v12, %v1221_v28  ;;  %v2047_v10 = vsel %vm2046_vm4, %v5668_v44, -inf }
 0x12e   :  { %8351 = vst [vmem:[#allocation3_spill] sm:$0xff] %v5649_v20  ;;  %v1382_v23 = vsel %vm1372_vm3, %v5649_v20, -inf  ;;  %v2056_v48 = vsel %vm2046_vm4, %v5649_v20, -inf  ;;  %v5763_v63 = vpop.permute.xlu0 %1645 }
 0x12f   :  { %8357 = vst [vmem:[#allocation9_spill] sm:$0xff] %v5683_v38  ;;  %v2050_v30 = vsel %vm2046_vm4, %v5683_v38, -inf  ;;  %v1376_v0 = vsel %vm1372_vm3, %v5683_v38, -inf  ;;  %v5765_v28 = vpop.permute.xlu1 %1651 }
 0x131   :  { %1383 = vmax.xlane.f32.xlu1 %v1382_v23 }
 0x132   :  { %v5767_v62 = vpop.permute.xlu0 %1649 }
 0x13e   :  { %v4219_v55 = vpop.f32.mrb[0].mxu1 }
 0x13f   :  { %v5656_v11 = vadd.f32 %v4219_v55, %v5643_v12  ;;  %v1266_v52 = vpop.f32.mrb[1].mxu1 }
 0x140   :  { %v4220_v16 = vpop.f32.mrb[2].mxu1  ;;  %v5678_v2 = vadd.f32 %v5643_v12, %v1266_v52 }
 0x141   :  { %8352 = vst [vmem:[#allocation4_spill] sm:$0xff] %v5656_v11  ;;  %v1415_v27 = vsel %vm1372_vm3, %v5656_v11, -inf  ;;  %v1269_v4 = vpop.f32.mrb[3].mxu1  ;;  %v5661_v5 = vadd.f32 %v4220_v16, %v5643_v12  ;;  %v2089_v49 = vsel %vm2046_vm4, %v5656_v11, -inf  ;;  %v5772_v16 = vpop.permute.xlu1 %1655 }
 0x142   :  { %1416 = vmax.xlane.f32.xlu0 %v1415_v27  ;;  %v5673_v15 = vadd.f32 %v5643_v12, %v1269_v4  ;;  %8356 = vst [vmem:[#allocation8_spill] sm:$0xff] %v5678_v2  ;;  %v1409_v9 = vsel %vm1372_vm3, %v5678_v2, -inf  ;;  %v2083_v24 = vsel %vm2046_vm4, %v5678_v2, -inf }
 0x143   :  { %8353 = vst [vmem:[#allocation5_spill] sm:$0xff] %v5661_v5  ;;  %v1418_v1 = vsel %vm1372_vm3, %v5661_v5, -inf  ;;  %v2092_v18 = vsel %vm2046_vm4, %v5661_v5, -inf }
 0x144   :  { %1419 = vmax.xlane.f32.xlu1 %v1418_v1  ;;  %8355 = vst [vmem:[#allocation7_spill] sm:$0xff] %v5673_v15  ;;  %v1412_v3 = vsel %vm1372_vm3, %v5673_v15, -inf  ;;  %v2086_v47 = vsel %vm2046_vm4, %v5673_v15, -inf }
 0x146   :  { %2054 = vmax.xlane.f32.xlu0 %v2053_v29 }
 0x148   :  { %2093 = vmax.xlane.f32.xlu1 %v2092_v18 }
 0x14a   :  { %2090 = vmax.xlane.f32.xlu0 %v2089_v49  ;;  %v5779_v49 = vpop.permute.xlu0 %1653 }
 0x14c   :  { %1413 = vmax.xlane.f32.xlu1 %v1412_v3 }
 0x14e   :  { %1374 = vmax.xlane.f32.xlu0 %v1373_v14 }
 0x150   :  { %2051 = vmax.xlane.f32.xlu1 %v2050_v30  ;;  %v1712_v30 = vmul.f32 0.2, %v5649_v20 }
 0x152   :  { %1410 = vmax.xlane.f32.xlu0 %v1409_v9  ;;  %v5788_v9 = vpop.permute.xlu1 %1659 }
 0x154   :  { %2087 = vmax.xlane.f32.xlu1 %v2086_v47  ;;  %v1711_v47 = vmul.f32 0.2, %v5646_v8 }
 0x156   :  { %2048 = vmax.xlane.f32.xlu0 %v2047_v10 }
 0x15a   :  { %2084 = vmax.xlane.f32.xlu0 %v2083_v24  ;;  %v5794_v24 = vpop.permute.xlu0 %1657 }
 0x15e   :  { %2057 = vmax.xlane.f32.xlu0 %v2056_v48 }
 0x162   :  { %1377 = vmax.xlane.f32.xlu0 %v1376_v0 }
 0x16a   :  { %v4211_v50 = vpop.f32.mrb[4].mxu0 }
 0x16b   :  { %v5714_v25 = vadd.f32 %v4211_v50, %v5643_v12  ;;  %v1234_v22 = vpop.f32.mrb[5].mxu0  ;;  %v1724_v50 = vmul.f32 0.2, %v5661_v5 }
 0x16c   :  { %v4212_v17 = vpop.f32.mrb[6].mxu0  ;;  %v5728_v41 = vadd.f32 %v5643_v12, %v1234_v22  ;;  %v1731_v22 = vmul.f32 1.442695, %v1712_v30 }
 0x16d   :  { %8358 = vst [vmem:[#allocation10_spill] sm:$0xff] %v5714_v25  ;;  %v5717_v7 = vadd.f32 %v4212_v17, %v5643_v12  ;;  %v1237_v32 = vpop.f32.mrb[7].mxu0  ;;  %v1391_v34 = vsel %vm1372_vm3, %v5714_v25, -inf  ;;  %v2065_v35 = vsel %vm2046_vm4, %v5714_v25, -inf }
 0x16e   :  { %1392 = vmax.xlane.f32.xlu0 %v1391_v34  ;;  %8360 = vst [vmem:[#allocation12_spill] sm:$0xff] %v5728_v41  ;;  %v5733_v42 = vadd.f32 %v5643_v12, %v1237_v32  ;;  %v1385_v45 = vsel %vm1372_vm3, %v5728_v41, -inf  ;;  %v2059_v21 = vsel %vm2046_vm4, %v5728_v41, -inf  ;;  %v5804_v32 = vpop.permute.xlu1 %1663  ;;  %v1729_v34 = vmul.f32 1.442695, %v1711_v47 }
 0x16f   :  { %8359 = vst [vmem:[#allocation11_spill] sm:$0xff] %v5717_v7  ;;  %v1394_v39 = vsel %vm1372_vm3, %v5717_v7, -inf  ;;  %v2068_v53 = vsel %vm2046_vm4, %v5717_v7, -inf  ;;  %4252 = vpow2.f32 %v1731_v22  ;;  %v1716_v30 = vmul.f32 0.2, %v5717_v7 }
 0x170   :  { %1395 = vmax.xlane.f32.xlu1 %v1394_v39  ;;  %8361 = vst [vmem:[#allocation13_spill] sm:$0xff] %v5733_v42  ;;  %v1388_v26 = vsel %vm1372_vm3, %v5733_v42, -inf  ;;  %v2062_v46 = vsel %vm2046_vm4, %v5733_v42, -inf  ;;  %v1723_v39 = vmul.f32 0.2, %v5656_v11  ;;  %4254 = vpow2.f32 %v1729_v34 }
 0x171   :  { %v1714_v34 = vmul.f32 0.2, %v5733_v42 }
 0x172   :  { %2066 = vmax.xlane.f32.xlu0 %v2065_v35  ;;  %v1755_v35 = vmul.f32 1.442695, %v1724_v50  ;;  %v1715_v50 = vmul.f32 0.2, %v5714_v25 }
 0x174   :  { %2069 = vmax.xlane.f32.xlu1 %v2068_v53  ;;  %v1710_v53 = vmul.f32 0.2, %v5683_v38  ;;  %4256 = vpow2.f32 %v1755_v35 }
 0x176   :  { %1386 = vmax.xlane.f32.xlu0 %v1385_v45  ;;  %v5810_v45 = vpop.permute.xlu0 %1661 }
 0x178   :  { %1389 = vmax.xlane.f32.xlu1 %v1388_v26 }
 0x17a   :  { %2060 = vmax.xlane.f32.xlu0 %v2059_v21  ;;  %v1753_v21 = vmul.f32 1.442695, %v1723_v39 }
 0x17c   :  { %2063 = vmax.xlane.f32.xlu1 %v2062_v46  ;;  %v1709_v46 = vmul.f32 0.2, %v5668_v44  ;;  %4258 = vpow2.f32 %v1753_v21  ;;  %v1713_v21 = vmul.f32 0.2, %v5728_v41 }
 0x197   :  { %v4215_v23 = vpop.f32.mrb[8].mxu0 }
 0x198   :  { %v5770_v55 = vadd.f32 %v4215_v23, %v5643_v12  ;;  %v1250_v52 = vpop.f32.mrb[9].mxu0  ;;  %v5815_v23 = vpop.permute.xlu1 %1667 }
 0x199   :  { %v4216_v27 = vpop.f32.mrb[10].mxu0  ;;  %v5784_v14 = vadd.f32 %v5643_v12, %v1250_v52  ;;  %v1722_v52 = vmul.f32 0.2, %v5673_v15 }
 0x19a   :  { %8365 = vst [vmem:[#allocation17_spill] sm:$0xff] %v5770_v55  ;;  %v5775_v4 = vadd.f32 %v4216_v27, %v5643_v12  ;;  %v1253_v29 = vpop.f32.mrb[11].mxu0  ;;  %v1403_v1 = vsel %vm1372_vm3, %v5770_v55, -inf  ;;  %v2077_v3 = vsel %vm2046_vm4, %v5770_v55, -inf  ;;  %v1727_v27 = vmul.f32 1.442695, %v1710_v53 }
 0x19b   :  { %1404 = vmax.xlane.f32.xlu0 %v1403_v1  ;;  %8367 = vst [vmem:[#allocation19_spill] sm:$0xff] %v5784_v14  ;;  %v5797_v48 = vadd.f32 %v5643_v12, %v1253_v29  ;;  %v1397_v0 = vsel %vm1372_vm3, %v5784_v14, -inf  ;;  %v2071_v12 = vsel %vm2046_vm4, %v5784_v14, -inf  ;;  %v5818_v29 = vpop.permute.xlu0 %1665  ;;  %v1721_v1 = vmul.f32 0.2, %v5678_v2 }
 0x19c   :  { %8366 = vst [vmem:[#allocation18_spill] sm:$0xff] %v5775_v4  ;;  %v1406_v18 = vsel %vm1372_vm3, %v5775_v4, -inf  ;;  %v2080_v10 = vsel %vm2046_vm4, %v5775_v4, -inf  ;;  %4260 = vpow2.f32 %v1727_v27  ;;  %v5822_v47 = vpop.permute.xlu1 %1671  ;;  %v1720_v27 = vmul.f32 0.2, %v5775_v4 }
 0x19d   :  { %1407 = vmax.xlane.f32.xlu1 %v1406_v18  ;;  %8368 = vst [vmem:[#allocation20_spill] sm:$0xff] %v5797_v48  ;;  %v1400_v17 = vsel %vm1372_vm3, %v5797_v48, -inf  ;;  %v2074_v26 = vsel %vm2046_vm4, %v5797_v48, -inf  ;;  %v1725_v18 = vmul.f32 1.442695, %v1709_v46 }
 0x19f   :  { %2078 = vmax.xlane.f32.xlu0 %v2077_v3  ;;  %v1751_v3 = vmul.f32 1.442695, %v1722_v52  ;;  %4262 = vpow2.f32 %v1725_v18  ;;  %v5826_v39 = vpop.permute.xlu0 %1669  ;;  %v1735_v52 = vmul.f32 1.442695, %v1714_v34  ;;  %v1718_v34 = vmul.f32 0.2, %v5797_v48 }
 0x1a0   :  { %v5831_v46 = vpop.permute.xlu1 %1675 }
 0x1a1   :  { %2081 = vmax.xlane.f32.xlu1 %v2080_v10  ;;  %v4253_v10 = vpop.eup %4252  ;;  %4264 = vpow2.f32 %v1751_v3 }
 0x1a2   :  { %v4255_v22 = vpop.eup %4254 }
 0x1a3   :  { %1398 = vmax.xlane.f32.xlu0 %v1397_v0  ;;  %v1749_v0 = vmul.f32 1.442695, %v1721_v1  ;;  %v4257_v35 = vpop.eup %4256  ;;  %v1759_v53 = vmul.f32 %v4255_v22, %v5767_v62  ;;  %v5835_v40 = vpop.permute.xlu0 %1673 }
 0x1a4   :  { %v4259_v1 = vpop.eup %4258  ;;  %v1772_v18 = vmul.f32 %v4257_v35, %v5831_v46 }
 0x1a5   :  { %1401 = vmax.xlane.f32.xlu1 %v1400_v17  ;;  %v1739_v17 = vmul.f32 1.442695, %v1716_v30  ;;  %4266 = vpow2.f32 %v1749_v0  ;;  %v1733_v0 = vmul.f32 1.442695, %v1713_v21  ;;  %v1771_v22 = vmul.f32 %v4259_v1, %v5835_v40 }
 0x1a6   :  { %v4261_v30 = vpop.eup %4260  ;;  %v1788_v35 = vmul.f32 0.5, %v1772_v18 }
 0x1a7   :  { %2072 = vmax.xlane.f32.xlu0 %v2071_v12  ;;  %v1760_v12 = vmul.f32 %v4253_v10, %v5765_v28  ;;  %4268 = vpow2.f32 %v1739_v17  ;;  %v1775_v10 = vmul.f32 0.5, %v1759_v53  ;;  %v1747_v17 = vmul.f32 1.442695, %v1720_v27 }
 0x1a8   :  { %v1787_v21 = vmul.f32 0.5, %v1771_v22 }
 0x1a9   :  { %2075 = vmax.xlane.f32.xlu1 %v2074_v26  ;;  %v1737_v26 = vmul.f32 1.442695, %v1715_v50  ;;  %v1776_v3 = vmul.f32 0.5, %v1760_v12  ;;  %v1719_v50 = vmul.f32 0.2, %v5770_v55  ;;  %v4263_v59 = vpop.eup %4262  ;;  %v1758_v12 = vmul.f32 %v4261_v30, %v5761_v60 }
 0x1aa   :  { %v1757_v1 = vmul.f32 %v4263_v59, %v5763_v63 }
 0x1ab   :  { %4270 = vpow2.f32 %v1737_v26  ;;  %v4265_v51 = vpop.eup %4264  ;;  %v1745_v53 = vmul.f32 1.442695, %v1719_v50  ;;  %v1717_v26 = vmul.f32 0.2, %v5784_v14  ;;  %v1774_v18 = vmul.f32 0.5, %v1758_v12 }
 0x1ac   :  { %4272 = vpow2.f32 %v1735_v52  ;;  %v1743_v52 = vmul.f32 1.442695, %v1718_v34 }
 0x1ad   :  { %4274 = vpow2.f32 %v1733_v0  ;;  %v1741_v30 = vmul.f32 1.442695, %v1717_v26  ;;  %v1773_v0 = vmul.f32 0.5, %v1757_v1 }
 0x1ae   :  { %4276 = vpow2.f32 %v1747_v17 }
 0x1af   :  { %v4267_v27 = vpop.eup %4266  ;;  %4278 = vpow2.f32 %v1745_v53 }
 0x1b0   :  { %4280 = vpow2.f32 %v1743_v52 }
 0x1b1   :  { %v4269_v48 = vpop.eup %4268  ;;  %4282 = vpow2.f32 %v1741_v30 }
 0x1b2   :  { %v1764_v59 = vmul.f32 %v4269_v48, %v5788_v9 }
 0x1b4   :  { %v1780_v12 = vmul.f32 0.5, %v1764_v59 }
 0x1b5   :  { %v4271_v50 = vpop.eup %4270 }
 0x1b6   :  { %v4273_v17 = vpop.eup %4272  ;;  %v1763_v34 = vmul.f32 %v4271_v50, %v5794_v24 }
 0x1b7   :  { %v1762_v53 = vmul.f32 %v4273_v17, %v5772_v16 }
 0x1b9   :  { %v1778_v52 = vmul.f32 0.5, %v1762_v53 }
 0x1ba   :  { %1811 = vrot.lane.b32.xlu1 %v1776_v3, %s4619_s5  ;;  %v1770_v3 = vmul.f32 %v4265_v51, %v5822_v47  ;;  %v5875_v53 = vpop.xlane.xlu1 %1380 }
 0x1bc   :  { %v1786_v22 = vmul.f32 0.5, %v1770_v3 }
 0x1bd   :  { %1809 = vrot.lane.b32.xlu0 %v1775_v10, %s4619_s5  ;;  %v1769_v10 = vmul.f32 %v4267_v27, %v5826_v39 }
 0x1be   :  { %1835 = vrot.lane.b32.xlu1 %v1788_v35, %s4619_s5  ;;  %v4275_v35 = vpop.eup %4274 }
 0x1bf   :  { %v1785_v51 = vmul.f32 0.5, %v1769_v10  ;;  %v4277_v26 = vpop.eup %4276  ;;  %v1761_v48 = vmul.f32 %v4275_v35, %v5779_v49 }
 0x1c0   :  { %v4279_v1 = vpop.eup %4278  ;;  %v1768_v27 = vmul.f32 %v4277_v26, %v5815_v23 }
 0x1c1   :  { %1833 = vrot.lane.b32.xlu0 %v1787_v21, %s4619_s5  ;;  %v1779_v21 = vmul.f32 0.5, %v1763_v34  ;;  %v4281_v3 = vpop.eup %4280  ;;  %v1767_v30 = vmul.f32 %v4279_v1, %v5818_v29 }
 0x1c2   :  { %1807 = vrot.lane.b32.xlu1 %v1774_v18, %s4619_s5  ;;  %v1777_v18 = vmul.f32 0.5, %v1761_v48  ;;  %v4283_v10 = vpop.eup %4282  ;;  %v1766_v50 = vmul.f32 %v4281_v3, %v5804_v32 }
 0x1c3   :  { %v1765_v59 = vmul.f32 %v4283_v10, %v5810_v45 }
 0x1c4   :  { %v1782_v17 = vmul.f32 0.5, %v1766_v50 }
 0x1c5   :  { %1805 = vrot.lane.b32.xlu0 %v1773_v0, %s4619_s5  ;;  %v1784_v0 = vmul.f32 0.5, %v1768_v27 }
 0x1c6   :  { %1831 = vrot.lane.b32.xlu1 %v1786_v22, %s4619_s5  ;;  %v1783_v22 = vmul.f32 0.5, %v1767_v30 }
 0x1c9   :  { %1829 = vrot.lane.b32.xlu0 %v1785_v51, %s4619_s5  ;;  %v1781_v51 = vmul.f32 0.5, %v1765_v59 }
 0x1ca   :  { %1819 = vrot.lane.b32.xlu1 %v1780_v12, %s4619_s5 }
 0x1cd   :  { %1817 = vrot.lane.b32.xlu0 %v1779_v21, %s4619_s5  ;;  %v5879_v21 = vpop.xlane.xlu1 %1383 }
 0x1ce   :  { %1815 = vrot.lane.b32.xlu1 %v1778_v52, %s4619_s5  ;;  %8370 = vst [vmem:[#allocation22_spill] sm:$0xff] %v5879_v21 }
 0x1cf   :  { %v5869_v34 = vpop.xlane.xlu0 %1416 }
 0x1d1   :  { %1813 = vrot.lane.b32.xlu0 %v1777_v18, %s4619_s5  ;;  %v5883_v1 = vpop.xlane.xlu1 %1419 }
 0x1d2   :  { %1827 = vrot.lane.b32.xlu1 %v1784_v0, %s4619_s5  ;;  %8372 = vst [vmem:[#allocation24_spill] sm:$0xff] %v5883_v1 }
 0x1d3   :  { %v5871_v35 = vpop.xlane.xlu0 %2054 }
 0x1d5   :  { %1825 = vrot.lane.b32.xlu0 %v1783_v22, %s4619_s5  ;;  %v5887_v27 = vpop.xlane.xlu1 %2093 }
 0x1d6   :  { %1823 = vrot.lane.b32.xlu1 %v1782_v17, %s4619_s5 }
 0x1d7   :  { %v5873_v12 = vpop.xlane.xlu0 %2090 }
 0x1d9   :  { %1821 = vrot.lane.b32.xlu0 %v1781_v51, %s4619_s5  ;;  %v5891_v18 = vpop.xlane.xlu1 %1413 }
 0x1da   :  { %8375 = vst [vmem:[#allocation27_spill] sm:$0xff] %v5891_v18 }
 0x1db   :  { %v5877_v26 = vpop.xlane.xlu0 %1374 }
 0x1dc   :  { %8369 = vst [vmem:[#allocation21_spill] sm:$0xff] %v5877_v26 }
 0x1dd   :  { %v5895_v10 = vpop.xlane.xlu1 %2051 }
 0x1de   :  { %8376 = vst [vmem:[#allocation28_spill] sm:$0xff] %v5895_v10 }
 0x1df   :  { %v5881_v48 = vpop.xlane.xlu0 %1410 }
 0x1e0   :  { %8371 = vst [vmem:[#allocation23_spill] sm:$0xff] %v5881_v48 }
 0x1e1   :  { %v5899_v50 = vpop.xlane.xlu1 %2087 }
 0x1e2   :  { %8378 = vst [vmem:[#allocation30_spill] sm:$0xff] %v5899_v50 }
 0x1e3   :  { %v5885_v52 = vpop.xlane.xlu0 %2048 }
 0x1e4   :  { %8373 = vst [vmem:[#allocation25_spill] sm:$0xff] %v5885_v52 }
 0x1e7   :  { %v5889_v3 = vpop.xlane.xlu0 %2084 }
 0x1e8   :  { %8374 = vst [vmem:[#allocation26_spill] sm:$0xff] %v5889_v3 }
 0x1eb   :  { %v5893_v30 = vpop.xlane.xlu0 %2057 }
 0x1ef   :  { %v5897_v0 = vpop.xlane.xlu0 %1377 }
 0x1f0   :  { %8377 = vst [vmem:[#allocation29_spill] sm:$0xff] %v5897_v0 }
 0x1fb   :  { %v5901_v22 = vpop.xlane.xlu0 %1392 }
 0x1fc   :  { %8379 = vst [vmem:[#allocation31_spill] sm:$0xff] %v5901_v22 }
 0x1fd   :  { %v5903_v59 = vpop.xlane.xlu1 %1395 }
 0x1fe   :  { %8380 = vst [vmem:[#allocation32_spill] sm:$0xff] %v5903_v59  ;;  %v1551_v59 = vmul.f32 0.1, %v5646_v8 }
 0x1ff   :  { %v5905_v17 = vpop.xlane.xlu0 %2066 }
 0x200   :  { %8381 = vst [vmem:[#allocation33_spill] sm:$0xff] %v5905_v17 }
 0x201   :  { %v5907_v51 = vpop.xlane.xlu1 %2069 }
 0x202   :  { %8382 = vst [vmem:[#allocation34_spill] sm:$0xff] %v5907_v51 }
 0x203   :  { %v5909_v48 = vpop.xlane.xlu0 %1386 }
 0x204   :  { %8383 = vst [vmem:[#allocation35_spill] sm:$0xff] %v5909_v48  ;;  %v1552_v48 = vmul.f32 0.1, %v5649_v20 }
 0x205   :  { %v5911_v26 = vpop.xlane.xlu1 %1389 }
 0x206   :  { %8384 = vst [vmem:[#allocation36_spill] sm:$0xff] %v5911_v26  ;;  %v1563_v26 = vmul.f32 0.1, %v5656_v11 }
 0x207   :  { %v5913_v18 = vpop.xlane.xlu0 %2060 }
 0x208   :  { %8385 = vst [vmem:[#allocation37_spill] sm:$0xff] %v5913_v18 }
 0x209   :  { %v5915_v3 = vpop.xlane.xlu1 %2063 }
 0x20a   :  { %8386 = vst [vmem:[#allocation38_spill] sm:$0xff] %v5915_v3  ;;  %v1631_v3 = vmul.f32 %v5699_v36, %v1551_v59 }
 0x228   :  { %v5917_v10 = vpop.xlane.xlu0 %1404 }
 0x229   :  { %8387 = vst [vmem:[#allocation39_spill] sm:$0xff] %v5917_v10  ;;  %v1632_v10 = vmul.f32 %v5705_v31, %v1552_v48 }
 0x22a   :  { %v5919_v0 = vpop.xlane.xlu1 %1407 }
 0x22b   :  { %8388 = vst [vmem:[#allocation40_spill] sm:$0xff] %v5919_v0  ;;  %v1564_v0 = vmul.f32 0.1, %v5661_v5 }
 0x22c   :  { %v5921_v50 = vpop.xlane.xlu0 %2078 }
 0x22d   :  { %8389 = vst [vmem:[#allocation41_spill] sm:$0xff] %v5921_v50  ;;  %v1644_v1 = vmul.f32 %v5757_v56, %v1564_v0 }
 0x22e   :  { %v5923_v22 = vpop.xlane.xlu1 %2081 }
 0x22f   :  { %8390 = vst [vmem:[#allocation42_spill] sm:$0xff] %v5923_v22  ;;  %v1643_v22 = vmul.f32 %v5759_v58, %v1563_v26  ;;  %v1708_v58 = vadd.f32 %v5831_v46, %v1644_v1  ;;  %v1549_v1 = vmul.f32 0.1, %v5668_v44 }
 0x230   :  { %v5926_v17 = vpop.xlane.xlu0 %1398 }
 0x231   :  { %8391 = vst [vmem:[#allocation43_spill] sm:$0xff] %v5926_v17  ;;  %v1695_v17 = vadd.f32 %v5767_v62, %v1631_v3  ;;  %v1707_v59 = vadd.f32 %v5835_v40, %v1643_v22  ;;  %v1561_v3 = vmul.f32 0.1, %v5678_v2  ;;  %v1562_v22 = vmul.f32 0.1, %v5673_v15 }
 0x232   :  { %v5929_v51 = vpop.xlane.xlu1 %1401 }
 0x233   :  { %8392 = vst [vmem:[#allocation44_spill] sm:$0xff] %v5929_v51  ;;  %v1696_v51 = vadd.f32 %v5765_v28, %v1632_v10  ;;  %v1629_v10 = vmul.f32 %v5707_v33, %v1549_v1  ;;  %v1642_v33 = vmul.f32 %v5753_v43, %v1562_v22 }
 0x234   :  { %v5933_v18 = vpop.xlane.xlu0 %2072 }
 0x235   :  { %8393 = vst [vmem:[#allocation45_spill] sm:$0xff] %v5933_v18 }
 0x236   :  { %v5937_v50 = vpop.xlane.xlu1 %2075 }
 0x238   :  { %v1810_v52 = vpop.permute.xlu0 %1809 }
 0x239   :  { %v5943_v21 = vsub.f32 %v1695_v17, %v1810_v52  ;;  %v5961_v40 = vadd.f32 %v1810_v52, %v1695_v17  ;;  %v1550_v52 = vmul.f32 0.1, %v5683_v38 }
 0x23a   :  { %v1812_v36 = vpop.permute.xlu1 %1811 }
 0x23b   :  { %8394 = vst [vmem:[#allocation46_spill] sm:$0xff] %v5943_v21  ;;  %v5946_v18 = vsub.f32 %v1696_v51, %v1812_v36  ;;  %1905 = vrot.lane.b32.xlu0 %v5943_v21, %s4620_s8  ;;  %8398 = vst [vmem:[#allocation50_spill] sm:$0xff] %v5961_v40  ;;  %v5963_v26 = vadd.f32 %v1812_v36, %v1696_v51  ;;  %v1630_v17 = vmul.f32 %v5693_v13, %v1550_v52 }
 0x23c   :  { %v1834_v31 = vpop.permute.xlu0 %1833  ;;  %v1641_v36 = vmul.f32 %v5755_v54, %v1561_v3 }
 0x23d   :  { %8395 = vst [vmem:[#allocation47_spill] sm:$0xff] %v5946_v18  ;;  %1907 = vrot.lane.b32.xlu1 %v5946_v18, %s4620_s8  ;;  %v5953_v56 = vsub.f32 %v1707_v59, %v1834_v31  ;;  %8399 = vst [vmem:[#allocation51_spill] sm:$0xff] %v5963_v26  ;;  %v5969_v46 = vadd.f32 %v1834_v31, %v1707_v59  ;;  %v1693_v59 = vadd.f32 %v5763_v63, %v1629_v10 }
 0x23e   :  { %v1836_v28 = vpop.permute.xlu1 %1835  ;;  %v1694_v31 = vadd.f32 %v5761_v60, %v1630_v17  ;;  %v1706_v63 = vadd.f32 %v5822_v47, %v1642_v33  ;;  %v1555_v10 = vmul.f32 0.1, %v5714_v25 }
 0x23f   :  { %8396 = vst [vmem:[#allocation48_spill] sm:$0xff] %v5953_v56  ;;  %v5955_v62 = vsub.f32 %v1708_v58, %v1836_v28  ;;  %1929 = vrot.lane.b32.xlu0 %v5953_v56, %s4620_s8  ;;  %8400 = vst [vmem:[#allocation52_spill] sm:$0xff] %v5969_v46  ;;  %v5971_v48 = vadd.f32 %v1836_v28, %v1708_v58  ;;  %v1705_v28 = vadd.f32 %v5826_v39, %v1641_v36 }
 0x240   :  { %v1806_v0 = vpop.permute.xlu0 %1805  ;;  %v1635_v22 = vmul.f32 %v5725_v61, %v1555_v10 }
 0x241   :  { %8397 = vst [vmem:[#allocation49_spill] sm:$0xff] %v5955_v62  ;;  %1931 = vrot.lane.b32.xlu1 %v5955_v62, %s4620_s8  ;;  %8401 = vst [vmem:[#allocation53_spill] sm:$0xff] %v5971_v48  ;;  %v6001_v58 = vsub.f32 %v1693_v59, %v1806_v0  ;;  %v6019_v60 = vadd.f32 %v1806_v0, %v1693_v59  ;;  %v1556_v0 = vmul.f32 0.1, %v5717_v7 }
 0x242   :  { %v1808_v51 = vpop.permute.xlu1 %1807  ;;  %v1699_v36 = vadd.f32 %v5794_v24, %v1635_v22 }
 0x243   :  { %1969 = vrot.lane.b32.xlu0 %v5961_v40, %s4621_s12  ;;  %v6006_v1 = vsub.f32 %v1694_v31, %v1808_v51  ;;  %8404 = vst [vmem:[#allocation56_spill] sm:$0xff] %v6019_v60  ;;  %v6023_v39 = vadd.f32 %v1808_v51, %v1694_v31  ;;  %v1636_v17 = vmul.f32 %v5721_v19, %v1556_v0 }
 0x244   :  { %v1830_v13 = vpop.permute.xlu0 %1829 }
 0x245   :  { %1971 = vrot.lane.b32.xlu1 %v5963_v26, %s4621_s12  ;;  %v6011_v52 = vsub.f32 %v1705_v28, %v1830_v13  ;;  %8405 = vst [vmem:[#allocation57_spill] sm:$0xff] %v6023_v39  ;;  %v6027_v47 = vadd.f32 %v1830_v13, %v1705_v28  ;;  %v1700_v33 = vadd.f32 %v5788_v9, %v1636_v17  ;;  %v1553_v13 = vmul.f32 0.1, %v5728_v41 }
 0x246   :  { %v1832_v54 = vpop.permute.xlu1 %1831  ;;  %v1554_v9 = vmul.f32 0.1, %v5733_v42 }
 0x247   :  { %1993 = vrot.lane.b32.xlu0 %v5969_v46, %s4621_s12  ;;  %8402 = vst [vmem:[#allocation54_spill] sm:$0xff] %v6011_v52  ;;  %v6015_v43 = vsub.f32 %v1706_v63, %v1832_v54  ;;  %8406 = vst [vmem:[#allocation58_spill] sm:$0xff] %v6027_v47  ;;  %v6031_v3 = vadd.f32 %v1832_v54, %v1706_v63  ;;  %v1633_v28 = vmul.f32 %v5711_v57, %v1553_v13 }
 0x248   :  { %v1818_v51 = vpop.permute.xlu0 %1817  ;;  %v1634_v54 = vmul.f32 %v5709_v37, %v1554_v9 }
 0x249   :  { %1995 = vrot.lane.b32.xlu1 %v5971_v48, %s4621_s12  ;;  %8403 = vst [vmem:[#allocation55_spill] sm:$0xff] %v6015_v43  ;;  %8407 = vst [vmem:[#allocation59_spill] sm:$0xff] %v6031_v3  ;;  %v6057_v31 = vsub.f32 %v1699_v36, %v1818_v51  ;;  %v6065_v19 = vadd.f32 %v1818_v51, %v1699_v36  ;;  %v1697_v10 = vadd.f32 %v5779_v49, %v1633_v28 }
 0x24a   :  { %v1820_v59 = vpop.permute.xlu1 %1819  ;;  %v1698_v22 = vadd.f32 %v5772_v16, %v1634_v54  ;;  %v1559_v51 = vmul.f32 0.1, %v5770_v55  ;;  %v1560_v16 = vmul.f32 0.1, %v5775_v4 }
 0x24b   :  { %2355 = vrot.lane.b32.xlu0 %v5943_v21, %s4622_s13  ;;  %8408 = vst [vmem:[#allocation60_spill] sm:$0xff] %v6057_v31  ;;  %v6061_v61 = vsub.f32 %v1700_v33, %v1820_v59  ;;  %8410 = vst [vmem:[#allocation62_spill] sm:$0xff] %v6065_v19  ;;  %v6069_v24 = vadd.f32 %v1820_v59, %v1700_v33  ;;  %v8416_v59 = vld [vmem:[#allocation16_spill] sm:$0xff] }
 0x24c   :  { %v1814_v63 = vpop.permute.xlu0 %1813  ;;  %v1639_v36 = vmul.f32 %v5751_v6, %v1559_v51  ;;  %v1640_v33 = vmul.f32 %v8416_v59, %v1560_v16  ;;  %v8422_v51 = vld [vmem:[#allocation15_spill] sm:$0xff] }
 0x24d   :  { %2357 = vrot.lane.b32.xlu1 %v5946_v18, %s4622_s13  ;;  %8409 = vst [vmem:[#allocation61_spill] sm:$0xff] %v6061_v61  ;;  %8411 = vst [vmem:[#allocation63_spill] sm:$0xff] %v6069_v24  ;;  %v6087_v17 = vsub.f32 %v1697_v10, %v1814_v63  ;;  %v6095_v37 = vadd.f32 %v1814_v63, %v1697_v10 }
 0x24e   :  { %v1816_v0 = vpop.permute.xlu1 %1815  ;;  %v1703_v9 = vadd.f32 %v5818_v29, %v1639_v36  ;;  %v1704_v54 = vadd.f32 %v5815_v23, %v1640_v33  ;;  %v8421_v23 = vld [vmem:[#allocation20_spill] sm:$0xff]  ;;  %v8423_v36 = vld [vmem:[#allocation14_spill] sm:$0xff] }
 0x24f   :  { %2379 = vrot.lane.b32.xlu0 %v5953_v56, %s4622_s13  ;;  %8412 = vst [vmem:[#allocation64_spill] sm:$0xff] %v6087_v17  ;;  %v6091_v57 = vsub.f32 %v1698_v22, %v1816_v0  ;;  %8414 = vst [vmem:[#allocation66_spill] sm:$0xff] %v6095_v37  ;;  %v6099_v49 = vadd.f32 %v1816_v0, %v1698_v22  ;;  %v1557_v0 = vmul.f32 0.1, %v5784_v14  ;;  %v1558_v22 = vmul.f32 0.1, %v8421_v23 }
 0x250   :  { %v1826_v13 = vpop.permute.xlu0 %1825 }
 0x251   :  { %2381 = vrot.lane.b32.xlu1 %v5955_v62, %s4622_s13  ;;  %8413 = vst [vmem:[#allocation65_spill] sm:$0xff] %v6091_v57  ;;  %8415 = vst [vmem:[#allocation67_spill] sm:$0xff] %v6099_v49  ;;  %v6117_v63 = vsub.f32 %v1703_v9, %v1826_v13  ;;  %v6125_v10 = vadd.f32 %v1826_v13, %v1703_v9  ;;  %v1637_v16 = vmul.f32 %v8422_v51, %v1557_v0 }
 0x252   :  { %v1828_v28 = vpop.permute.xlu1 %1827  ;;  %v1638_v59 = vmul.f32 %v8423_v36, %v1558_v22  ;;  %v2109_v9 = vsub.f32 %v5656_v11, %v5873_v12  ;;  %v2097_v22 = vsub.f32 %v5646_v8, %v5871_v35  ;;  %v2098_v12 = vsub.f32 %v5649_v20, %v5893_v30 }
 0x253   :  { %2403 = vrot.lane.b32.xlu0 %v5961_v40, %s4623_s14  ;;  %8417 = vst [vmem:[#allocation16_spill] sm:$0xff] %v6117_v63  ;;  %v6121_v6 = vsub.f32 %v1704_v54, %v1828_v28  ;;  %8419 = vst [vmem:[#allocation69_spill] sm:$0xff] %v6125_v10  ;;  %v6129_v29 = vadd.f32 %v1828_v28, %v1704_v54  ;;  %v1701_v13 = vadd.f32 %v5810_v45, %v1637_v16 }
 0x254   :  { %v1822_v33 = vpop.permute.xlu0 %1821  ;;  %v1702_v54 = vadd.f32 %v5804_v32, %v1638_v59  ;;  %v2139_v45 = vmul.f32 1.442695, %v2109_v9  ;;  %v2115_v32 = vmul.f32 1.442695, %v2097_v22  ;;  %v2110_v35 = vsub.f32 %v5661_v5, %v5887_v27 }
 0x255   :  { %2405 = vrot.lane.b32.xlu1 %v5963_v26, %s4623_s14  ;;  %8418 = vst [vmem:[#allocation68_spill] sm:$0xff] %v6121_v6  ;;  %8420 = vst [vmem:[#allocation70_spill] sm:$0xff] %v6129_v29  ;;  %v6149_v0 = vsub.f32 %v1701_v13, %v1822_v33  ;;  %v6159_v16 = vadd.f32 %v1822_v33, %v1701_v13  ;;  %v2117_v59 = vmul.f32 1.442695, %v2098_v12 }
 0x256   :  { %v1824_v28 = vpop.permute.xlu1 %1823  ;;  %4284 = vpow2.f32 %v2139_v45  ;;  %v2141_v30 = vmul.f32 1.442695, %v2110_v35 }
 0x257   :  { %2427 = vrot.lane.b32.xlu0 %v5969_v46, %s4623_s14  ;;  %8424 = vst [vmem:[#allocation15_spill] sm:$0xff] %v6149_v0  ;;  %v6155_v51 = vsub.f32 %v1702_v54, %v1824_v28  ;;  %8426 = vst [vmem:[#allocation71_spill] sm:$0xff] %v6159_v16  ;;  %v6165_v36 = vadd.f32 %v1824_v28, %v1702_v54  ;;  %4286 = vpow2.f32 %v2115_v32  ;;  %v8428_v32 = vld [vmem:[#allocation22_spill] sm:$0xff] }
 0x258   :  { %4288 = vpow2.f32 %v2117_v59  ;;  %v1423_v28 = vsub.f32 %v5646_v8, %v5875_v53  ;;  %v1435_v54 = vsub.f32 %v5656_v11, %v5869_v34  ;;  %v1424_v12 = vsub.f32 %v5649_v20, %v8428_v32 }
 0x259   :  { %2429 = vrot.lane.b32.xlu1 %v5971_v48, %s4623_s14  ;;  %8425 = vst [vmem:[#allocation14_spill] sm:$0xff] %v6155_v51  ;;  %8427 = vst [vmem:[#allocation72_spill] sm:$0xff] %v6165_v36  ;;  %4290 = vpow2.f32 %v2141_v30  ;;  %v8430_v30 = vld [vmem:[#allocation24_spill] sm:$0xff] }
 0x25a   :  { %v1441_v22 = vmul.f32 1.442695, %v1423_v28  ;;  %v1465_v45 = vmul.f32 1.442695, %v1435_v54  ;;  %v1443_v59 = vmul.f32 1.442695, %v1424_v12  ;;  %v1436_v46 = vsub.f32 %v5661_v5, %v8430_v30 }
 0x25b   :  { %1901 = vrot.lane.b32.xlu0 %v6001_v58, %s4620_s8  ;;  %v8432_v54 = vld [vmem:[#allocation25_spill] sm:$0xff]  ;;  %v8434_v12 = vld [vmem:[#allocation26_spill] sm:$0xff] }
 0x25c   :  { %4292 = vpow2.f32 %v1441_v22  ;;  %v1467_v34 = vmul.f32 1.442695, %v1436_v46  ;;  %v2095_v22 = vsub.f32 %v5668_v44, %v8432_v54  ;;  %v2107_v30 = vsub.f32 %v5678_v2, %v8434_v12 }
 0x25d   :  { %1903 = vrot.lane.b32.xlu1 %v6006_v1, %s4620_s8  ;;  %4294 = vpow2.f32 %v1465_v45 }
 0x25e   :  { %4296 = vpow2.f32 %v1443_v59  ;;  %v2111_v32 = vmul.f32 1.442695, %v2095_v22  ;;  %v2135_v46 = vmul.f32 1.442695, %v2107_v30  ;;  %v8436_v59 = vld [vmem:[#allocation28_spill] sm:$0xff]  ;;  %v8437_v22 = vld [vmem:[#allocation30_spill] sm:$0xff] }
 0x25f   :  { %1925 = vrot.lane.b32.xlu0 %v6011_v52, %s4620_s8  ;;  %4298 = vpow2.f32 %v1467_v34  ;;  %v2096_v34 = vsub.f32 %v5683_v38, %v8436_v59  ;;  %v2108_v12 = vsub.f32 %v5673_v15, %v8437_v22  ;;  %v8440_v22 = vld [vmem:[#allocation29_spill] sm:$0xff] }
 0x260   :  { %v6181_v33 = vpop.eup %4284  ;;  %4300 = vpow2.f32 %v2111_v32 }
 0x261   :  { %1927 = vrot.lane.b32.xlu1 %v6015_v43, %s4620_s8  ;;  %v6185_v27 = vpop.eup %4286  ;;  %4302 = vpow2.f32 %v2135_v46  ;;  %v2113_v54 = vmul.f32 1.442695, %v2096_v34  ;;  %v8438_v46 = vld [vmem:[#allocation21_spill] sm:$0xff] }
 0x262   :  { %v6189_v13 = vpop.eup %4288  ;;  %v1421_v59 = vsub.f32 %v5668_v44, %v8438_v46 }
 0x263   :  { %1965 = vrot.lane.b32.xlu0 %v6019_v60, %s4621_s12  ;;  %v6193_v9 = vpop.eup %4290  ;;  %4304 = vpow2.f32 %v2113_v54 }
 0x264   :  { %v1437_v34 = vmul.f32 1.442695, %v1421_v59 }
 0x265   :  { %1967 = vrot.lane.b32.xlu1 %v6023_v39, %s4621_s12 }
 0x266   :  { %v6203_v35 = vpop.eup %4292 }
 0x267   :  { %1989 = vrot.lane.b32.xlu0 %v6027_v47, %s4621_s12  ;;  %8429 = vst [vmem:[#allocation22_spill] sm:$0xff] %v6203_v35  ;;  %v1475_v53 = vsel %vm1372_vm3, %v6203_v35, 0.0  ;;  %v6209_v48 = vpop.eup %4294 }
 0x268   :  { %8431 = vst [vmem:[#allocation24_spill] sm:$0xff] %v6209_v48  ;;  %v1511_v28 = vsel %vm1372_vm3, %v6209_v48, 0.0  ;;  %v6215_v45 = vpop.eup %4296 }
 0x269   :  { %1991 = vrot.lane.b32.xlu1 %v6031_v3, %s4621_s12  ;;  %8433 = vst [vmem:[#allocation25_spill] sm:$0xff] %v6215_v45  ;;  %v1478_v35 = vsel %vm1372_vm3, %v6215_v45, 0.0  ;;  %v2137_v45 = vmul.f32 1.442695, %v2108_v12  ;;  %v1422_v12 = vsub.f32 %v5683_v38, %v8440_v22 }
 0x26b   :  { %2351 = vrot.lane.b32.xlu0 %v6001_v58, %s4622_s13  ;;  %4306 = vpow2.f32 %v2137_v45 }
 0x26c   :  { %4308 = vpow2.f32 %v1437_v34 }
 0x26d   :  { %2353 = vrot.lane.b32.xlu1 %v6006_v1, %s4622_s13 }
 0x26f   :  { %2375 = vrot.lane.b32.xlu0 %v6011_v52, %s4622_s13 }
 0x271   :  { %2377 = vrot.lane.b32.xlu1 %v6015_v43, %s4622_s13 }
 0x273   :  { %2399 = vrot.lane.b32.xlu0 %v6019_v60, %s4623_s14  ;;  %v2522_v60 = vsel %vm2479_vm5, %v5656_v11, -inf }
 0x275   :  { %2401 = vrot.lane.b32.xlu1 %v6023_v39, %s4623_s14 }
 0x277   :  { %2423 = vrot.lane.b32.xlu0 %v6027_v47, %s4623_s14  ;;  %v8442_v47 = vld [vmem:[#allocation27_spill] sm:$0xff] }
 0x279   :  { %2425 = vrot.lane.b32.xlu1 %v6031_v3, %s4623_s14  ;;  %v1434_v3 = vsub.f32 %v5673_v15, %v8442_v47 }
 0x27b   :  { %1913 = vrot.lane.b32.xlu0 %v6057_v31, %s4620_s8  ;;  %v1463_v59 = vmul.f32 1.442695, %v1434_v3  ;;  %v8447_v3 = vld [vmem:[#allocation34_spill] sm:$0xff] }
 0x27d   :  { %1915 = vrot.lane.b32.xlu1 %v6061_v61, %s4620_s8 }
 0x27f   :  { %1977 = vrot.lane.b32.xlu0 %v6065_v19, %s4621_s12 }
 0x281   :  { %1979 = vrot.lane.b32.xlu1 %v6069_v24, %s4621_s12 }
 0x283   :  { %2363 = vrot.lane.b32.xlu0 %v6057_v31, %s4622_s13 }
 0x285   :  { %2365 = vrot.lane.b32.xlu1 %v6061_v61, %s4622_s13 }
 0x287   :  { %2411 = vrot.lane.b32.xlu0 %v6065_v19, %s4623_s14 }
 0x289   :  { %2413 = vrot.lane.b32.xlu1 %v6069_v24, %s4623_s14 }
 0x28b   :  { %1909 = vrot.lane.b32.xlu0 %v6087_v17, %s4620_s8 }
 0x28d   :  { %1911 = vrot.lane.b32.xlu1 %v6091_v57, %s4620_s8 }
 0x28f   :  { %1973 = vrot.lane.b32.xlu0 %v6095_v37, %s4621_s12 }
 0x291   :  { %1975 = vrot.lane.b32.xlu1 %v6099_v49, %s4621_s12 }
 0x293   :  { %2359 = vrot.lane.b32.xlu0 %v6087_v17, %s4622_s13 }
 0x295   :  { %2361 = vrot.lane.b32.xlu1 %v6091_v57, %s4622_s13 }
 0x297   :  { %2407 = vrot.lane.b32.xlu0 %v6095_v37, %s4623_s14 }
 0x299   :  { %2409 = vrot.lane.b32.xlu1 %v6099_v49, %s4623_s14 }
 0x29b   :  { %1921 = vrot.lane.b32.xlu0 %v6117_v63, %s4620_s8 }
 0x29d   :  { %1923 = vrot.lane.b32.xlu1 %v6121_v6, %s4620_s8 }
 0x29f   :  { %1985 = vrot.lane.b32.xlu0 %v6125_v10, %s4621_s12 }
 0x2a1   :  { %1987 = vrot.lane.b32.xlu1 %v6129_v29, %s4621_s12 }
 0x2a3   :  { %2371 = vrot.lane.b32.xlu0 %v6117_v63, %s4622_s13 }
 0x2a5   :  { %2373 = vrot.lane.b32.xlu1 %v6121_v6, %s4622_s13 }
 0x2a7   :  { %2419 = vrot.lane.b32.xlu0 %v6125_v10, %s4623_s14  ;;  %v1439_v10 = vmul.f32 1.442695, %v1422_v12 }
 0x2a9   :  { %2421 = vrot.lane.b32.xlu1 %v6129_v29, %s4623_s14 }
 0x2ab   :  { %1917 = vrot.lane.b32.xlu0 %v6149_v0, %s4620_s8 }
 0x2ad   :  { %1919 = vrot.lane.b32.xlu1 %v6155_v51, %s4620_s8 }
 0x2af   :  { %1981 = vrot.lane.b32.xlu0 %v6159_v16, %s4621_s12 }
 0x2b1   :  { %1983 = vrot.lane.b32.xlu1 %v6165_v36, %s4621_s12 }
 0x2b3   :  { %2367 = vrot.lane.b32.xlu0 %v6149_v0, %s4622_s13 }
 0x2b5   :  { %2369 = vrot.lane.b32.xlu1 %v6155_v51, %s4622_s13 }
 0x2b7   :  { %2415 = vrot.lane.b32.xlu0 %v6159_v16, %s4623_s14 }
 0x2b9   :  { %2417 = vrot.lane.b32.xlu1 %v6165_v36, %s4623_s14 }
 0x2bb   :  { %2187 = vrot.lane.b32.xlu0 %v6181_v33, %s4624_s15 }
 0x2bd   :  { %2163 = vrot.lane.b32.xlu1 %v6185_v27, %s4624_s15 }
 0x2c1   :  { %2165 = vrot.lane.b32.xlu1 %v6189_v13, %s4624_s15 }
 0x2c5   :  { %2189 = vrot.lane.b32.xlu1 %v6193_v9, %s4624_s15 }
 0x2da   :  { %1476 = vadd.xlane.f32.xlu0 %v1475_v53  ;;  %v6221_v53 = vpop.eup %4298 }
 0x2db   :  { %8435 = vst [vmem:[#allocation26_spill] sm:$0xff] %v6221_v53  ;;  %v6229_v48 = vpop.eup %4300 }
 0x2de   :  { %1512 = vadd.xlane.f32.xlu0 %v1511_v28  ;;  %v1514_v28 = vsel %vm1372_vm3, %v6221_v53, 0.0 }
 0x2e9   :  { %1479 = vadd.xlane.f32.xlu1 %v1478_v35  ;;  %v6233_v35 = vpop.eup %4302 }
 0x2ea   :  { %v6237_v32 = vpop.eup %4304 }
 0x2eb   :  { %v6241_v30 = vpop.eup %4306 }
 0x2ec   :  { %v6251_v53 = vpop.eup %4308 }
 0x2ed   :  { %1515 = vadd.xlane.f32.xlu1 %v1514_v28  ;;  %v8439_v28 = vld [vmem:[#allocation23_spill] sm:$0xff]  ;;  %8441 = vst [vmem:[#allocation28_spill] sm:$0xff] %v6251_v53  ;;  %v1469_v46 = vsel %vm1372_vm3, %v6251_v53, 0.0  ;;  %v8459_v53 = vld [vmem:[#allocation32_spill] sm:$0xff] }
 0x2ee   :  { %v1433_v45 = vsub.f32 %v5678_v2, %v8439_v28  ;;  %v8444_v28 = vld [vmem:[#allocation33_spill] sm:$0xff] }
 0x2f0   :  { %v1461_v54 = vmul.f32 1.442695, %v1433_v45  ;;  %v2101_v45 = vsub.f32 %v5714_v25, %v8444_v28 }
 0x2f2   :  { %4310 = vpow2.f32 %v1461_v54  ;;  %v2123_v47 = vmul.f32 1.442695, %v2101_v45 }
 0x2f3   :  { %4312 = vpow2.f32 %v1439_v10  ;;  %v2102_v10 = vsub.f32 %v5717_v7, %v8447_v3 }
 0x2f4   :  { %2159 = vrot.lane.b32.xlu0 %v6229_v48, %s4624_s15  ;;  %4314 = vpow2.f32 %v1463_v59 }
 0x2f5   :  { %4316 = vpow2.f32 %v2123_v47 }
 0x2f8   :  { %2183 = vrot.lane.b32.xlu0 %v6233_v35, %s4624_s15 }
 0x2fc   :  { %v6257_v29 = vpop.eup %4310 }
 0x2fd   :  { %8443 = vst [vmem:[#allocation30_spill] sm:$0xff] %v6257_v29  ;;  %v1505_v34 = vsel %vm1372_vm3, %v6257_v29, 0.0  ;;  %v6263_v54 = vpop.eup %4312  ;;  %v8452_v29 = vld [vmem:[#allocation31_spill] sm:$0xff] }
 0x2fe   :  { %2161 = vrot.lane.b32.xlu1 %v6237_v32, %s4624_s15  ;;  %8445 = vst [vmem:[#allocation21_spill] sm:$0xff] %v6263_v54  ;;  %v1472_v22 = vsel %vm1372_vm3, %v6263_v54, 0.0  ;;  %v6267_v12 = vpop.eup %4314 }
 0x2ff   :  { %8446 = vst [vmem:[#allocation23_spill] sm:$0xff] %v6267_v12  ;;  %v1508_v59 = vsel %vm1372_vm3, %v6267_v12, 0.0  ;;  %v6277_v45 = vpop.eup %4316 }
 0x302   :  { %2185 = vrot.lane.b32.xlu1 %v6241_v30, %s4624_s15 }
 0x317   :  { %1470 = vadd.xlane.f32.xlu0 %v1469_v46  ;;  %v6271_v46 = vpop.permute.xlu1 %1907 }
 0x318   :  { %8448 = vst [vmem:[#allocation29_spill] sm:$0xff] %v6271_v46  ;;  %v1427_v46 = vsub.f32 %v5714_v25, %v8452_v29  ;;  %v1428_v29 = vsub.f32 %v5717_v7, %v8459_v53 }
 0x31b   :  { %1506 = vadd.xlane.f32.xlu0 %v1505_v34  ;;  %v2125_v34 = vmul.f32 1.442695, %v2102_v10  ;;  %v6275_v28 = vpop.permute.xlu1 %1931 }
 0x31c   :  { %8449 = vst [vmem:[#allocation27_spill] sm:$0xff] %v6275_v28 }
 0x31d   :  { %4318 = vpow2.f32 %v2125_v34 }
 0x31f   :  { %v6281_v47 = vpop.permute.xlu1 %1971 }
 0x320   :  { %8450 = vst [vmem:[#allocation33_spill] sm:$0xff] %v6281_v47 }
 0x323   :  { %v6289_v12 = vpop.permute.xlu1 %1995 }
 0x324   :  { %8453 = vst [vmem:[#allocation31_spill] sm:$0xff] %v6289_v12 }
 0x326   :  { %1473 = vadd.xlane.f32.xlu1 %v1472_v22  ;;  %v6283_v22 = vpop.permute.xlu0 %1905 }
 0x327   :  { %8451 = vst [vmem:[#allocation34_spill] sm:$0xff] %v6283_v22  ;;  %v6285_v3 = vpop.eup %4318  ;;  %v6295_v34 = vpop.permute.xlu1 %2357 }
 0x328   :  { %8455 = vst [vmem:[#allocation74_spill] sm:$0xff] %v6295_v34 }
 0x32a   :  { %1509 = vadd.xlane.f32.xlu1 %v1508_v59  ;;  %v6291_v10 = vpop.permute.xlu0 %1929  ;;  %v1449_v59 = vmul.f32 1.442695, %v1427_v46 }
 0x32b   :  { %8454 = vst [vmem:[#allocation73_spill] sm:$0xff] %v6291_v10  ;;  %v6299_v47 = vpop.permute.xlu1 %2381  ;;  %v1451_v10 = vmul.f32 1.442695, %v1428_v29 }
 0x32c   :  { %4320 = vpow2.f32 %v1449_v59  ;;  %8457 = vst [vmem:[#allocation76_spill] sm:$0xff] %v6299_v47 }
 0x32d   :  { %4322 = vpow2.f32 %v1451_v10 }
 0x32e   :  { %v6297_v28 = vpop.permute.xlu0 %1969 }
 0x32f   :  { %8456 = vst [vmem:[#allocation75_spill] sm:$0xff] %v6297_v28  ;;  %v6307_v12 = vpop.permute.xlu1 %2405  ;;  %v8464_v28 = vld [vmem:[#allocation37_spill] sm:$0xff] }
 0x330   :  { %8461 = vst [vmem:[#allocation78_spill] sm:$0xff] %v6307_v12  ;;  %v8469_v12 = vld [vmem:[#allocation38_spill] sm:$0xff] }
 0x331   :  { %2171 = vrot.lane.b32.xlu0 %v6277_v45, %s4624_s15 }
 0x332   :  { %v6301_v22 = vpop.permute.xlu0 %1993 }
 0x333   :  { %8458 = vst [vmem:[#allocation77_spill] sm:$0xff] %v6301_v22  ;;  %v6313_v59 = vpop.permute.xlu1 %2429  ;;  %v2099_v22 = vsub.f32 %v5728_v41, %v8464_v28 }
 0x334   :  { %8463 = vst [vmem:[#allocation80_spill] sm:$0xff] %v6313_v59 }
 0x335   :  { %v2119_v53 = vmul.f32 1.442695, %v2099_v22 }
 0x336   :  { %v6305_v54 = vpop.eup %4320  ;;  %v6309_v16 = vpop.permute.xlu0 %2355 }
 0x337   :  { %8460 = vst [vmem:[#allocation32_spill] sm:$0xff] %v6305_v54  ;;  %8462 = vst [vmem:[#allocation79_spill] sm:$0xff] %v6309_v16  ;;  %v1487_v46 = vsel %vm1372_vm3, %v6305_v54, 0.0  ;;  %v6319_v34 = vpop.permute.xlu1 %1903  ;;  %v6323_v29 = vpop.eup %4322  ;;  %4324 = vpow2.f32 %v2119_v53  ;;  %v2100_v54 = vsub.f32 %v5733_v42, %v8469_v12 }
 0x338   :  { %8466 = vst [vmem:[#allocation81_spill] sm:$0xff] %v6319_v34  ;;  %8468 = vst [vmem:[#allocation83_spill] sm:$0xff] %v6323_v29  ;;  %v1490_v10 = vsel %vm1372_vm3, %v6323_v29, 0.0  ;;  %v8476_v29 = vld [vmem:[#allocation35_spill] sm:$0xff] }
 0x339   :  { %v2121_v28 = vmul.f32 1.442695, %v2100_v54 }
 0x33a   :  { %v6317_v47 = vpop.permute.xlu0 %2379 }
 0x33b   :  { %2173 = vrot.lane.b32.xlu1 %v6285_v3, %s4624_s15  ;;  %8465 = vst [vmem:[#allocation37_spill] sm:$0xff] %v6317_v47  ;;  %4326 = vpow2.f32 %v2121_v28 }
 0x33e   :  { %v6321_v36 = vpop.permute.xlu0 %2403 }
 0x33f   :  { %8467 = vst [vmem:[#allocation82_spill] sm:$0xff] %v6321_v36  ;;  %v8483_v36 = vld [vmem:[#allocation36_spill] sm:$0xff] }
 0x341   :  { %v6335_v34 = vpop.eup %4324 }
 0x342   :  { %v6331_v59 = vpop.permute.xlu0 %2427 }
 0x343   :  { %8471 = vst [vmem:[#allocation84_spill] sm:$0xff] %v6331_v59 }
 0x346   :  { %v6337_v47 = vpop.permute.xlu0 %1901 }
 0x347   :  { %8473 = vst [vmem:[#allocation86_spill] sm:$0xff] %v6337_v47 }
 0x34a   :  { %v6343_v53 = vpop.permute.xlu0 %1925 }
 0x34b   :  { %8475 = vst [vmem:[#allocation88_spill] sm:$0xff] %v6343_v53 }
 0x34e   :  { %v6353_v28 = vpop.permute.xlu0 %1965 }
 0x34f   :  { %8478 = vst [vmem:[#allocation89_spill] sm:$0xff] %v6353_v28 }
 0x350   :  { %1488 = vadd.xlane.f32.xlu0 %v1487_v46  ;;  %v6327_v46 = vpop.permute.xlu1 %1927 }
 0x351   :  { %8470 = vst [vmem:[#allocation38_spill] sm:$0xff] %v6327_v46  ;;  %v6345_v46 = vpop.eup %4326 }
 0x352   :  { %v6357_v59 = vpop.permute.xlu0 %1989 }
 0x353   :  { %8480 = vst [vmem:[#allocation91_spill] sm:$0xff] %v6357_v59 }
 0x354   :  { %v6333_v22 = vpop.permute.xlu1 %1967 }
 0x355   :  { %8472 = vst [vmem:[#allocation85_spill] sm:$0xff] %v6333_v22 }
 0x356   :  { %v6361_v53 = vpop.permute.xlu0 %2351 }
 0x357   :  { %8482 = vst [vmem:[#allocation93_spill] sm:$0xff] %v6361_v53 }
 0x358   :  { %v6341_v12 = vpop.permute.xlu1 %1991 }
 0x359   :  { %8474 = vst [vmem:[#allocation87_spill] sm:$0xff] %v6341_v12 }
 0x35a   :  { %v6369_v24 = vpop.permute.xlu0 %2375 }
 0x35b   :  { %8486 = vst [vmem:[#allocation95_spill] sm:$0xff] %v6369_v24  ;;  %v8493_v24 = vld [vmem:[#allocation42_spill] sm:$0xff] }
 0x35c   :  { %v6349_v54 = vpop.permute.xlu1 %2353 }
 0x35d   :  { %8477 = vst [vmem:[#allocation35_spill] sm:$0xff] %v6349_v54 }
 0x35f   :  { %1491 = vadd.xlane.f32.xlu1 %v1490_v10  ;;  %v1425_v10 = vsub.f32 %v5728_v41, %v8476_v29  ;;  %v1426_v29 = vsub.f32 %v5733_v42, %v8483_v36 }
 0x360   :  { %v6355_v47 = vpop.permute.xlu1 %2377 }
 0x361   :  { %v1445_v22 = vmul.f32 1.442695, %v1425_v10  ;;  %8479 = vst [vmem:[#allocation90_spill] sm:$0xff] %v6355_v47  ;;  %v1447_v54 = vmul.f32 1.442695, %v1426_v29  ;;  %v6377_v47 = vpop.permute.xlu0 %2399 }
 0x362   :  { %8489 = vst [vmem:[#allocation96_spill] sm:$0xff] %v6377_v47 }
 0x363   :  { %4328 = vpow2.f32 %v1445_v22  ;;  %v8487_v22 = vld [vmem:[#allocation41_spill] sm:$0xff] }
 0x364   :  { %v6359_v12 = vpop.permute.xlu1 %2401  ;;  %4330 = vpow2.f32 %v1447_v54  ;;  %v2105_v59 = vsub.f32 %v5770_v55, %v8487_v22 }
 0x365   :  { %8481 = vst [vmem:[#allocation92_spill] sm:$0xff] %v6359_v12  ;;  %v6381_v29 = vpop.permute.xlu0 %2423 }
 0x366   :  { %2167 = vrot.lane.b32.xlu0 %v6335_v34, %s4624_s15  ;;  %v2131_v36 = vmul.f32 1.442695, %v2105_v59  ;;  %8491 = vst [vmem:[#allocation98_spill] sm:$0xff] %v6381_v29 }
 0x368   :  { %v6367_v19 = vpop.permute.xlu1 %2425  ;;  %4332 = vpow2.f32 %v2131_v36 }
 0x369   :  { %8485 = vst [vmem:[#allocation94_spill] sm:$0xff] %v6367_v19  ;;  %v6391_v22 = vpop.permute.xlu0 %1913 }
 0x36a   :  { %8495 = vst [vmem:[#allocation100_spill] sm:$0xff] %v6391_v22 }
 0x36c   :  { %v6375_v28 = vpop.permute.xlu1 %1915 }
 0x36d   :  { %v6365_v16 = vpop.eup %4328  ;;  %8488 = vst [vmem:[#allocation41_spill] sm:$0xff] %v6375_v28  ;;  %v6397_v29 = vpop.permute.xlu0 %1977 }
 0x36e   :  { %8484 = vst [vmem:[#allocation36_spill] sm:$0xff] %v6365_v16  ;;  %v1481_v10 = vsel %vm1372_vm3, %v6365_v16, 0.0  ;;  %v6383_v19 = vpop.eup %4330  ;;  %v2106_v16 = vsub.f32 %v5775_v4, %v8493_v24  ;;  %8497 = vst [vmem:[#allocation102_spill] sm:$0xff] %v6397_v29 }
 0x36f   :  { %8492 = vst [vmem:[#allocation99_spill] sm:$0xff] %v6383_v19  ;;  %v1484_v54 = vsel %vm1372_vm3, %v6383_v19, 0.0 }
 0x370   :  { %2169 = vrot.lane.b32.xlu1 %v6345_v46, %s4624_s15  ;;  %v6379_v12 = vpop.permute.xlu1 %1979  ;;  %v2133_v28 = vmul.f32 1.442695, %v2106_v16 }
 0x371   :  { %8490 = vst [vmem:[#allocation97_spill] sm:$0xff] %v6379_v12  ;;  %v6403_v36 = vpop.permute.xlu0 %2363 }
 0x372   :  { %v6393_v59 = vpop.eup %4332  ;;  %4334 = vpow2.f32 %v2133_v28  ;;  %8499 = vst [vmem:[#allocation104_spill] sm:$0xff] %v6403_v36  ;;  %v8506_v36 = vld [vmem:[#allocation40_spill] sm:$0xff] }
 0x373   :  { %v1432_v47 = vsub.f32 %v5775_v4, %v8506_v36 }
 0x375   :  { %v6413_v28 = vpop.permute.xlu0 %2411  ;;  %v1459_v37 = vmul.f32 1.442695, %v1432_v47 }
 0x376   :  { %8502 = vst [vmem:[#allocation105_spill] sm:$0xff] %v6413_v28 }
 0x37c   :  { %v6405_v19 = vpop.eup %4334 }
 0x385   :  { %1482 = vadd.xlane.f32.xlu0 %v1481_v10  ;;  %v6389_v10 = vpop.permute.xlu1 %2365 }
 0x386   :  { %8494 = vst [vmem:[#allocation42_spill] sm:$0xff] %v6389_v10  ;;  %v6417_v10 = vpop.permute.xlu0 %1909 }
 0x387   :  { %8504 = vst [vmem:[#allocation107_spill] sm:$0xff] %v6417_v10 }
 0x389   :  { %v6395_v12 = vpop.permute.xlu1 %2413 }
 0x38a   :  { %8496 = vst [vmem:[#allocation101_spill] sm:$0xff] %v6395_v12  ;;  %v6423_v53 = vpop.permute.xlu0 %1973 }
 0x38b   :  { %8507 = vst [vmem:[#allocation40_spill] sm:$0xff] %v6423_v53 }
 0x38d   :  { %v6401_v24 = vpop.permute.xlu1 %1911 }
 0x38e   :  { %8498 = vst [vmem:[#allocation103_spill] sm:$0xff] %v6401_v24 }
 0x391   :  { %v6411_v16 = vpop.permute.xlu1 %1975 }
 0x394   :  { %1485 = vadd.xlane.f32.xlu1 %v1484_v54  ;;  %v8500_v54 = vld [vmem:[#allocation39_spill] sm:$0xff] }
 0x395   :  { %v1431_v22 = vsub.f32 %v5770_v55, %v8500_v54  ;;  %8501 = vst [vmem:[#allocation39_spill] sm:$0xff] %v6411_v16  ;;  %v6415_v12 = vpop.permute.xlu1 %2361  ;;  %v6429_v16 = vpop.permute.xlu0 %2359 }
 0x396   :  { %8503 = vst [vmem:[#allocation106_spill] sm:$0xff] %v6415_v12  ;;  %8510 = vst [vmem:[#allocation111_spill] sm:$0xff] %v6429_v16 }
 0x397   :  { %v1457_v29 = vmul.f32 1.442695, %v1431_v22  ;;  %v8511_v22 = vld [vmem:[#allocation45_spill] sm:$0xff] }
 0x398   :  { %v2103_v10 = vsub.f32 %v5784_v14, %v8511_v22 }
 0x399   :  { %4336 = vpow2.f32 %v1457_v29  ;;  %v6419_v24 = vpop.permute.xlu1 %2409  ;;  %v6437_v36 = vpop.permute.xlu0 %2407 }
 0x39a   :  { %8505 = vst [vmem:[#allocation108_spill] sm:$0xff] %v6419_v24  ;;  %4338 = vpow2.f32 %v1459_v37  ;;  %8513 = vst [vmem:[#allocation112_spill] sm:$0xff] %v6437_v36  ;;  %v2127_v53 = vmul.f32 1.442695, %v2103_v10 }
 0x39b   :  { %2179 = vrot.lane.b32.xlu0 %v6393_v59, %s4624_s15 }
 0x39c   :  { %4340 = vpow2.f32 %v2127_v53 }
 0x39d   :  { %v6427_v49 = vpop.permute.xlu1 %1923 }
 0x39e   :  { %8509 = vst [vmem:[#allocation110_spill] sm:$0xff] %v6427_v49  ;;  %v6443_v49 = vpop.permute.xlu0 %1921 }
 0x39f   :  { %8516 = vst [vmem:[#allocation115_spill] sm:$0xff] %v6443_v49 }
 0x3a1   :  { %v6435_v28 = vpop.permute.xlu1 %1987 }
 0x3a2   :  { %8512 = vst [vmem:[#allocation45_spill] sm:$0xff] %v6435_v28  ;;  %v6451_v28 = vpop.permute.xlu0 %1985 }
 0x3a3   :  { %v6425_v54 = vpop.eup %4336  ;;  %8518 = vst [vmem:[#allocation117_spill] sm:$0xff] %v6451_v28 }
 0x3a4   :  { %8508 = vst [vmem:[#allocation109_spill] sm:$0xff] %v6425_v54  ;;  %v1499_v29 = vsel %vm1372_vm3, %v6425_v54, 0.0  ;;  %v6441_v47 = vpop.eup %4338  ;;  %v2104_v54 = vsub.f32 %v8421_v23, %v5937_v50 }
 0x3a5   :  { %2181 = vrot.lane.b32.xlu1 %v6405_v19, %s4624_s15  ;;  %v6439_v24 = vpop.permute.xlu1 %2373  ;;  %8515 = vst [vmem:[#allocation114_spill] sm:$0xff] %v6441_v47  ;;  %v1502_v37 = vsel %vm1372_vm3, %v6441_v47, 0.0  ;;  %v8523_v47 = vld [vmem:[#allocation43_spill] sm:$0xff] }
 0x3a6   :  { %8514 = vst [vmem:[#allocation113_spill] sm:$0xff] %v6439_v24  ;;  %v2129_v22 = vmul.f32 1.442695, %v2104_v54  ;;  %v6453_v10 = vpop.eup %4340  ;;  %v6459_v53 = vpop.permute.xlu0 %2371  ;;  %v1429_v54 = vsub.f32 %v5784_v14, %v8523_v47 }
 0x3a7   :  { %8520 = vst [vmem:[#allocation119_spill] sm:$0xff] %v6459_v53 }
 0x3a8   :  { %4342 = vpow2.f32 %v2129_v22  ;;  %v1453_v28 = vmul.f32 1.442695, %v1429_v54 }
 0x3aa   :  { %v6463_v49 = vpop.permute.xlu0 %2419  ;;  %4344 = vpow2.f32 %v1453_v28  ;;  %v2480_v28 = vsel %vm2479_vm5, %v5668_v44, -inf }
 0x3ab   :  { %8522 = vst [vmem:[#allocation121_spill] sm:$0xff] %v6463_v49 }
 0x3ba   :  { %1500 = vadd.xlane.f32.xlu0 %v1499_v29  ;;  %v6449_v29 = vpop.permute.xlu1 %2421 }
 0x3bb   :  { %8517 = vst [vmem:[#allocation116_spill] sm:$0xff] %v6449_v29 }
 0x3be   :  { %v6455_v24 = vpop.permute.xlu1 %1919 }
 0x3bf   :  { %8519 = vst [vmem:[#allocation118_spill] sm:$0xff] %v6455_v24  ;;  %v6473_v24 = vpop.permute.xlu0 %1917 }
 0x3c0   :  { %8525 = vst [vmem:[#allocation122_spill] sm:$0xff] %v6473_v24 }
 0x3c2   :  { %v6461_v50 = vpop.permute.xlu1 %1983 }
 0x3c3   :  { %8521 = vst [vmem:[#allocation120_spill] sm:$0xff] %v6461_v50  ;;  %v6477_v53 = vpop.permute.xlu0 %1981  ;;  %v8528_v50 = vld [vmem:[#allocation44_spill] sm:$0xff] }
 0x3c4   :  { %8527 = vst [vmem:[#allocation124_spill] sm:$0xff] %v6477_v53  ;;  %v1430_v49 = vsub.f32 %v8421_v23, %v8528_v50 }
 0x3c6   :  { %v6471_v22 = vpop.permute.xlu1 %2369  ;;  %v1455_v12 = vmul.f32 1.442695, %v1430_v49 }
 0x3c7   :  { %8524 = vst [vmem:[#allocation43_spill] sm:$0xff] %v6471_v22  ;;  %v6481_v16 = vpop.permute.xlu0 %2367 }
 0x3c8   :  { %8529 = vst [vmem:[#allocation44_spill] sm:$0xff] %v6481_v16  ;;  %4346 = vpow2.f32 %v1455_v12 }
 0x3c9   :  { %1503 = vadd.xlane.f32.xlu1 %v1502_v37  ;;  %v6465_v37 = vpop.eup %4342 }
 0x3ca   :  { %v6475_v29 = vpop.permute.xlu1 %2417  ;;  %v6483_v47 = vpop.eup %4344 }
 0x3cb   :  { %8526 = vst [vmem:[#allocation123_spill] sm:$0xff] %v6475_v29  ;;  %8530 = vst [vmem:[#allocation125_spill] sm:$0xff] %v6483_v47  ;;  %v1493_v54 = vsel %vm1372_vm3, %v6483_v47, 0.0  ;;  %v6489_v24 = vpop.permute.xlu0 %2415  ;;  %v2486_v29 = vsel %vm2479_vm5, %v5646_v8, -inf }
 0x3cc   :  { %8531 = vst [vmem:[#allocation126_spill] sm:$0xff] %v6489_v24  ;;  %v2492_v24 = vsel %vm2479_vm5, %v5728_v41, -inf }
 0x3ce   :  { %v2164_v36 = vpop.permute.xlu1 %2163 }
 0x3cf   :  { %v2188_v53 = vpop.permute.xlu0 %2187 }
 0x3d0   :  { %2175 = vrot.lane.b32.xlu0 %v6453_v10, %s4624_s15 }
 0x3d2   :  { %v6485_v40 = vpop.permute.xlu1 %2165  ;;  %v6499_v47 = vpop.eup %4346 }
 0x3d3   :  { %v6497_v16 = vpop.xlane.xlu0 %1476  ;;  %8534 = vst [vmem:[#allocation129_spill] sm:$0xff] %v6499_v47  ;;  %v1496_v12 = vsel %vm1372_vm3, %v6499_v47, 0.0  ;;  %v2495_v47 = vsel %vm2479_vm5, %v5733_v42, -inf }
 0x3d4   :  { %8533 = vst [vmem:[#allocation128_spill] sm:$0xff] %v6497_v16  ;;  %v2498_v16 = vsel %vm2479_vm5, %v5714_v25, -inf }
 0x3d6   :  { %v2190_v50 = vpop.permute.xlu1 %2189 }
 0x3da   :  { %2177 = vrot.lane.b32.xlu1 %v6465_v37, %s4624_s15  ;;  %v6495_v49 = vpop.xlane.xlu1 %1479 }
 0x3db   :  { %8532 = vst [vmem:[#allocation127_spill] sm:$0xff] %v6495_v49  ;;  %v2483_v49 = vsel %vm2479_vm5, %v5683_v38, -inf }
 0x3ef   :  { %1494 = vadd.xlane.f32.xlu0 %v1493_v54  ;;  %v2489_v54 = vsel %vm2479_vm5, %v5649_v20, -inf }
 0x3f3   :  { %2481 = vmax.xlane.f32.xlu0 %v2480_v28  ;;  %v6505_v28 = vpop.xlane.xlu1 %1515 }
 0x3f4   :  { %8535 = vst [vmem:[#allocation130_spill] sm:$0xff] %v6505_v28 }
 0x3f7   :  { %2487 = vmax.xlane.f32.xlu0 %v2486_v29  ;;  %v6509_v29 = vpop.xlane.xlu0 %1512 }
 0x3f8   :  { %8536 = vst [vmem:[#allocation131_spill] sm:$0xff] %v6509_v29 }
 0x3fb   :  { %2490 = vmax.xlane.f32.xlu0 %v2489_v54  ;;  %v2162_v54 = vpop.permute.xlu1 %2161  ;;  %v2160_v22 = vpop.permute.xlu0 %2159 }
 0x3fe   :  { %1497 = vadd.xlane.f32.xlu1 %v1496_v12  ;;  %v2504_v12 = vsel %vm2479_vm5, %v5784_v14, -inf }
 0x3ff   :  { %2493 = vmax.xlane.f32.xlu0 %v2492_v24  ;;  %v2501_v24 = vsel %vm2479_vm5, %v5717_v7, -inf  ;;  %v2186_v28 = vpop.permute.xlu1 %2185  ;;  %v2184_v29 = vpop.permute.xlu0 %2183 }
 0x402   :  { %2484 = vmax.xlane.f32.xlu1 %v2483_v49  ;;  %v2510_v49 = vsel %vm2479_vm5, %v5770_v55, -inf }
 0x403   :  { %2499 = vmax.xlane.f32.xlu0 %v2498_v16  ;;  %v2507_v16 = vsel %vm2479_vm5, %v8421_v23, -inf  ;;  %v6525_v26 = vpop.xlane.xlu1 %1473 }
 0x404   :  { %8537 = vst [vmem:[#allocation132_spill] sm:$0xff] %v6525_v26  ;;  %v2213_v26 = vsel %vm1372_vm3, %v2164_v36, 0.0  ;;  %v2243_v36 = vsel %vm1372_vm3, %v2184_v29, 0.0 }
 0x406   :  { %2496 = vmax.xlane.f32.xlu1 %v2495_v47  ;;  %v2516_v47 = vsel %vm2479_vm5, %v5678_v2, -inf }
 0x407   :  { %2505 = vmax.xlane.f32.xlu0 %v2504_v12  ;;  %v6529_v12 = vpop.xlane.xlu0 %1470 }
 0x408   :  { %8538 = vst [vmem:[#allocation133_spill] sm:$0xff] %v6529_v12 }
 0x40a   :  { %2502 = vmax.xlane.f32.xlu1 %v2501_v24  ;;  %v2513_v24 = vsel %vm2479_vm5, %v5775_v4, -inf }
 0x40b   :  { %2511 = vmax.xlane.f32.xlu0 %v2510_v49  ;;  %v6535_v49 = vpop.xlane.xlu1 %1509  ;;  %v6537_v39 = vpop.xlane.xlu0 %1506 }
 0x40c   :  { %8539 = vst [vmem:[#allocation134_spill] sm:$0xff] %v6535_v49  ;;  %8540 = vst [vmem:[#allocation135_spill] sm:$0xff] %v6537_v39  ;;  %v2207_v39 = vsel %vm1372_vm3, %v2160_v22, 0.0 }
 0x40e   :  { %2508 = vmax.xlane.f32.xlu1 %v2507_v16  ;;  %v2519_v16 = vsel %vm2479_vm5, %v5673_v15, -inf }
 0x40f   :  { %2517 = vmax.xlane.f32.xlu0 %v2516_v47  ;;  %v2525_v47 = vsel %vm2479_vm5, %v5661_v5, -inf  ;;  %v2174_v12 = vpop.permute.xlu1 %2173  ;;  %v2172_v56 = vpop.permute.xlu0 %2171 }
 0x412   :  { %2514 = vmax.xlane.f32.xlu1 %v2513_v24  ;;  %v2249_v24 = vsel %vm1372_vm3, %v2188_v53, 0.0 }
 0x413   :  { %2523 = vmax.xlane.f32.xlu0 %v2522_v60  ;;  %v2252_v60 = vsel %vm1372_vm3, %v2190_v50, 0.0  ;;  %v6546_v49 = vpop.xlane.xlu1 %1491  ;;  %v2216_v50 = vsel %vm1372_vm3, %v6485_v40, 0.0 }
 0x414   :  { %8541 = vst [vmem:[#allocation136_spill] sm:$0xff] %v6546_v49 }
 0x416   :  { %2520 = vmax.xlane.f32.xlu1 %v2519_v16  ;;  %v6549_v16 = vpop.xlane.xlu0 %1488 }
 0x417   :  { %2214 = vadd.xlane.f32.xlu0 %v2213_v26  ;;  %8542 = vst [vmem:[#allocation137_spill] sm:$0xff] %v6549_v16  ;;  %v2210_v26 = vsel %vm1372_vm3, %v2162_v54, 0.0  ;;  %v2225_v54 = vsel %vm1372_vm3, %v2172_v56, 0.0 }
 0x41a   :  { %2526 = vmax.xlane.f32.xlu1 %v2525_v47  ;;  %v2170_v47 = vpop.permute.xlu1 %2169  ;;  %v2168_v53 = vpop.permute.xlu0 %2167 }
 0x41b   :  { %2250 = vadd.xlane.f32.xlu0 %v2249_v24  ;;  %v2246_v24 = vsel %vm1372_vm3, %v2186_v28, 0.0  ;;  %v2222_v29 = vsel %vm1372_vm3, %v2170_v47, 0.0  ;;  %v2219_v28 = vsel %vm1372_vm3, %v2168_v53, 0.0 }
 0x41e   :  { %2253 = vadd.xlane.f32.xlu1 %v2252_v60  ;;  %v6558_v22 = vpop.xlane.xlu0 %1482 }
 0x41f   :  { %2208 = vadd.xlane.f32.xlu0 %v2207_v39  ;;  %8544 = vst [vmem:[#allocation139_spill] sm:$0xff] %v6558_v22  ;;  %v2228_v39 = vsel %vm1372_vm3, %v2174_v12, 0.0 }
 0x421   :  { %v6556_v60 = vpop.xlane.xlu1 %1485 }
 0x422   :  { %2211 = vadd.xlane.f32.xlu1 %v2210_v26  ;;  %8543 = vst [vmem:[#allocation138_spill] sm:$0xff] %v6556_v60 }
 0x423   :  { %2244 = vadd.xlane.f32.xlu0 %v2243_v36  ;;  %v2180_v36 = vpop.permute.xlu0 %2179 }
 0x425   :  { %v2182_v26 = vpop.permute.xlu1 %2181 }
 0x426   :  { %2247 = vadd.xlane.f32.xlu1 %v2246_v24  ;;  %v2240_v40 = vsel %vm1372_vm3, %v2182_v26, 0.0  ;;  %v2237_v24 = vsel %vm1372_vm3, %v2180_v36, 0.0 }
 0x427   :  { %2217 = vadd.xlane.f32.xlu0 %v2216_v50 }
 0x42a   :  { %2229 = vadd.xlane.f32.xlu1 %v2228_v39 }
 0x42b   :  { %2226 = vadd.xlane.f32.xlu0 %v2225_v54 }
 0x42e   :  { %2223 = vadd.xlane.f32.xlu1 %v2222_v29 }
 0x42f   :  { %2220 = vadd.xlane.f32.xlu0 %v2219_v28 }
 0x432   :  { %2241 = vadd.xlane.f32.xlu1 %v2240_v40 }
 0x433   :  { %2238 = vadd.xlane.f32.xlu0 %v2237_v24 }
 0x447   :  { %v6566_v50 = vpop.xlane.xlu0 %1500 }
 0x448   :  { %8545 = vst [vmem:[#allocation140_spill] sm:$0xff] %v6566_v50 }
 0x44b   :  { %v2176_v12 = vpop.permute.xlu0 %2175 }
 0x44c   :  { %v2231_v56 = vsel %vm1372_vm3, %v2176_v12, 0.0 }
 0x44d   :  { %2232 = vadd.xlane.f32.xlu0 %v2231_v56 }
 0x456   :  { %v6569_v39 = vpop.xlane.xlu1 %1503 }
 0x457   :  { %8546 = vst [vmem:[#allocation141_spill] sm:$0xff] %v6569_v39 }
 0x45a   :  { %v2178_v47 = vpop.permute.xlu1 %2177 }
 0x45b   :  { %v2234_v54 = vsel %vm1372_vm3, %v2178_v47, 0.0 }
 0x45c   :  { %2235 = vadd.xlane.f32.xlu1 %v2234_v54 }
 0x47c   :  { %v6572_v53 = vpop.xlane.xlu0 %1494 }
 0x47d   :  { %8547 = vst [vmem:[#allocation142_spill] sm:$0xff] %v6572_v53 }
 0x480   :  { %v2482_v29 = vpop.xlane.xlu0 %2481 }
 0x481   :  { %v2528_v26 = vsub.f32 %v5668_v44, %v2482_v29 }
 0x483   :  { %v2544_v28 = vmul.f32 1.442695, %v2528_v26 }
 0x484   :  { %v2488_v36 = vpop.xlane.xlu0 %2487 }
 0x485   :  { %4348 = vpow2.f32 %v2544_v28  ;;  %v2530_v47 = vsub.f32 %v5646_v8, %v2488_v36 }
 0x488   :  { %v2491_v40 = vpop.xlane.xlu0 %2490 }
 0x489   :  { %v2531_v49 = vsub.f32 %v5649_v20, %v2491_v40 }
 0x48b   :  { %v6575_v24 = vpop.xlane.xlu1 %1497  ;;  %v2550_v60 = vmul.f32 1.442695, %v2531_v49 }
 0x48c   :  { %8548 = vst [vmem:[#allocation143_spill] sm:$0xff] %v6575_v24  ;;  %v2494_v50 = vpop.xlane.xlu0 %2493 }
 0x48d   :  { %v2532_v12 = vsub.f32 %v5728_v41, %v2494_v50  ;;  %v2548_v50 = vmul.f32 1.442695, %v2530_v47 }
 0x48f   :  { %v6578_v56 = vpop.eup %4348  ;;  %v2485_v39 = vpop.xlane.xlu1 %2484  ;;  %v2552_v16 = vmul.f32 1.442695, %v2532_v12 }
 0x490   :  { %v2529_v54 = vsub.f32 %v5683_v38, %v2485_v39  ;;  %2592 = vrot.lane.b32.xlu0 %v6578_v56, %s4625_s3  ;;  %v2500_v29 = vpop.xlane.xlu0 %2499 }
 0x491   :  { %4350 = vpow2.f32 %v2552_v16  ;;  %v2534_v26 = vsub.f32 %v5714_v25, %v2500_v29 }
 0x492   :  { %v2546_v28 = vmul.f32 1.442695, %v2529_v54 }
 0x493   :  { %v2497_v53 = vpop.xlane.xlu1 %2496  ;;  %v2556_v24 = vmul.f32 1.442695, %v2534_v26 }
 0x494   :  { %4352 = vpow2.f32 %v2546_v28  ;;  %v2506_v12 = vpop.xlane.xlu0 %2505  ;;  %v2533_v41 = vsub.f32 %v5733_v42, %v2497_v53 }
 0x495   :  { %4354 = vpow2.f32 %v2556_v24  ;;  %v2536_v36 = vsub.f32 %v5784_v14, %v2506_v12 }
 0x496   :  { %4356 = vpow2.f32 %v2548_v50  ;;  %v2554_v40 = vmul.f32 1.442695, %v2533_v41 }
 0x497   :  { %v2503_v39 = vpop.xlane.xlu1 %2502  ;;  %v2560_v22 = vmul.f32 1.442695, %v2536_v36 }
 0x498   :  { %v2512_v16 = vpop.xlane.xlu0 %2511  ;;  %v2535_v24 = vsub.f32 %v5717_v7, %v2503_v39 }
 0x499   :  { %4358 = vpow2.f32 %v2560_v22  ;;  %v2538_v54 = vsub.f32 %v5770_v55, %v2512_v16 }
 0x49a   :  { %4360 = vpow2.f32 %v2550_v60  ;;  %v2558_v41 = vmul.f32 1.442695, %v2535_v24 }
 0x49b   :  { %v6589_v29 = vpop.eup %4350  ;;  %v2509_v47 = vpop.xlane.xlu1 %2508  ;;  %v2564_v26 = vmul.f32 1.442695, %v2538_v54 }
 0x49c   :  { %2600 = vrot.lane.b32.xlu0 %v6589_v29, %s4625_s3  ;;  %v2518_v28 = vpop.xlane.xlu0 %2517  ;;  %v2537_v60 = vsub.f32 %v8421_v23, %v2509_v47 }
 0x49d   :  { %4362 = vpow2.f32 %v2564_v26  ;;  %v2540_v49 = vsub.f32 %v5678_v2, %v2518_v28 }
 0x49e   :  { %v6595_v53 = vpop.eup %4352  ;;  %4364 = vpow2.f32 %v2554_v40  ;;  %v2562_v40 = vmul.f32 1.442695, %v2537_v60 }
 0x49f   :  { %v6597_v22 = vpop.eup %4354  ;;  %2594 = vrot.lane.b32.xlu1 %v6595_v53, %s4625_s3  ;;  %v2515_v50 = vpop.xlane.xlu1 %2514  ;;  %v2568_v12 = vmul.f32 1.442695, %v2540_v49 }
 0x4a0   :  { %2604 = vrot.lane.b32.xlu0 %v6597_v22, %s4625_s3  ;;  %v2524_v36 = vpop.xlane.xlu0 %2523  ;;  %v6605_v16 = vpop.eup %4356  ;;  %v2539_v47 = vsub.f32 %v5775_v4, %v2515_v50 }
 0x4a1   :  { %4366 = vpow2.f32 %v2568_v12  ;;  %v2542_v39 = vsub.f32 %v5656_v11, %v2524_v36 }
 0x4a2   :  { %4368 = vpow2.f32 %v2558_v41  ;;  %v2566_v12 = vmul.f32 1.442695, %v2539_v47 }
 0x4a3   :  { %v6607_v54 = vpop.eup %4358  ;;  %v2521_v26 = vpop.xlane.xlu1 %2520  ;;  %2596 = vrot.lane.b32.xlu1 %v6605_v16, %s4625_s3  ;;  %v2572_v28 = vmul.f32 1.442695, %v2542_v39 }
 0x4a4   :  { %2608 = vrot.lane.b32.xlu0 %v6607_v54, %s4625_s3  ;;  %v6614_v24 = vpop.eup %4360  ;;  %v2541_v36 = vsub.f32 %v5673_v15, %v2521_v26 }
 0x4a5   :  { %4370 = vpow2.f32 %v2572_v28 }
 0x4a6   :  { %4372 = vpow2.f32 %v2562_v40  ;;  %v2570_v39 = vmul.f32 1.442695, %v2541_v36 }
 0x4a7   :  { %v6616_v49 = vpop.eup %4362  ;;  %2598 = vrot.lane.b32.xlu1 %v6614_v24, %s4625_s3  ;;  %v2527_v41 = vpop.xlane.xlu1 %2526  ;;  %4374 = vpow2.f32 %v2566_v12 }
 0x4a8   :  { %2612 = vrot.lane.b32.xlu0 %v6616_v49, %s4625_s3  ;;  %v6623_v50 = vpop.eup %4364  ;;  %v2543_v28 = vsub.f32 %v5661_v5, %v2527_v41  ;;  %4376 = vpow2.f32 %v2570_v39  ;;  %v6656_v39 = vpop.xlane.xlu0 %2214 }
 0x4aa   :  { %v2574_v47 = vmul.f32 1.442695, %v2543_v28 }
 0x4ab   :  { %v6625_v60 = vpop.eup %4366  ;;  %2602 = vrot.lane.b32.xlu1 %v6623_v50, %s4625_s3  ;;  %v2254_v15 = vpop.xlane.xlu1 %2253 }
 0x4ac   :  { %2616 = vrot.lane.b32.xlu0 %v6625_v60, %s4625_s3  ;;  %v6632_v40 = vpop.eup %4368  ;;  %4378 = vpow2.f32 %v2574_v47  ;;  %v6658_v28 = vpop.xlane.xlu0 %2250 }
 0x4ad   :  { %4380 = vrcp.f32 %v6656_v39 }
 0x4af   :  { %v6634_v26 = vpop.eup %4370  ;;  %2606 = vrot.lane.b32.xlu1 %v6632_v40, %s4625_s3  ;;  %v2212_v4 = vpop.xlane.xlu1 %2211 }
 0x4b0   :  { %2620 = vrot.lane.b32.xlu0 %v6634_v26, %s4625_s3  ;;  %v6640_v11 = vpop.eup %4372  ;;  %v6660_v47 = vpop.xlane.xlu0 %2208 }
 0x4b1   :  { %v6644_v12 = vpop.eup %4374 }
 0x4b2   :  { %v6648_v36 = vpop.eup %4376 }
 0x4b3   :  { %2610 = vrot.lane.b32.xlu1 %v6640_v11, %s4625_s3  ;;  %v6668_v23 = vpop.xlane.xlu1 %2247 }
 0x4b4   :  { %v6662_v5 = vpop.xlane.xlu0 %2244 }
 0x4b6   :  { %v6652_v41 = vpop.eup %4378 }
 0x4b7   :  { %2614 = vrot.lane.b32.xlu1 %v6644_v12, %s4625_s3  ;;  %v6672_v7 = vpop.xlane.xlu1 %2229 }
 0x4b8   :  { %v2218_v2 = vpop.xlane.xlu0 %2217 }
 0x4b9   :  { %4382 = vrcp.f32 %v2218_v2 }
 0x4ba   :  { %4384 = vrcp.f32 %v6658_v28 }
 0x4bb   :  { %2618 = vrot.lane.b32.xlu1 %v6648_v36, %s4625_s3  ;;  %v6676_v38 = vpop.xlane.xlu1 %2223  ;;  %4386 = vrcp.f32 %v2254_v15 }
 0x4bc   :  { %v6664_v55 = vpop.xlane.xlu0 %2226  ;;  %4388 = vrcp.f32 %v6660_v47 }
 0x4bd   :  { %4390 = vrcp.f32 %v2212_v4 }
 0x4be   :  { %4392 = vrcp.f32 %v6662_v5 }
 0x4bf   :  { %2622 = vrot.lane.b32.xlu1 %v6652_v41, %s4625_s3  ;;  %v6679_v44 = vpop.xlane.xlu1 %2241  ;;  %4394 = vrcp.f32 %v6668_v23 }
 0x4c0   :  { %v6666_v14 = vpop.xlane.xlu0 %2220  ;;  %4396 = vrcp.f32 %v6664_v55 }
 0x4c1   :  { %4398 = vrcp.f32 %v6672_v7 }
 0x4c2   :  { %4400 = vrcp.f32 %v6666_v14 }
 0x4c3   :  { %4402 = vrcp.f32 %v6676_v38 }
 0x4c4   :  { %v6670_v25 = vpop.xlane.xlu0 %2238 }
 0x4c5   :  { %4404 = vrcp.f32 %v6670_v25 }
 0x4c6   :  { %4406 = vrcp.f32 %v6679_v44 }
 0x4da   :  { %v6674_v42 = vpop.xlane.xlu0 %2232 }
 0x4db   :  { %4408 = vrcp.f32 %v6674_v42 }
 0x4e9   :  { %v6681_v62 = vpop.xlane.xlu1 %2235 }
 0x4ea   :  { %4410 = vrcp.f32 %v6681_v62 }
 0x502   :  { %v2593_v20 = vpop.permute.xlu0 %2592 }
 0x503   :  { %v2640_v8 = vsel %vm1372_vm3, %v2593_v20, 0.0 }
 0x504   :  { %2641 = vadd.xlane.f32.xlu0 %v2640_v8 }
 0x50e   :  { %v2601_v43 = vpop.permute.xlu0 %2600 }
 0x50f   :  { %v2652_v57 = vsel %vm1372_vm3, %v2601_v43, 0.0 }
 0x511   :  { %v2595_v52 = vpop.permute.xlu1 %2594 }
 0x512   :  { %v2643_v63 = vsel %vm1372_vm3, %v2595_v52, 0.0  ;;  %v2605_v51 = vpop.permute.xlu0 %2604 }
 0x513   :  { %2644 = vadd.xlane.f32.xlu1 %v2643_v63  ;;  %v2658_v63 = vsel %vm1372_vm3, %v2605_v51, 0.0 }
 0x515   :  { %v2597_v6 = vpop.permute.xlu1 %2596 }
 0x516   :  { %v2646_v0 = vsel %vm1372_vm3, %v2597_v6, 0.0  ;;  %v2609_v8 = vpop.permute.xlu0 %2608 }
 0x517   :  { %2647 = vadd.xlane.f32.xlu0 %v2646_v0 }
 0x519   :  { %v2599_v31 = vpop.permute.xlu1 %2598 }
 0x51a   :  { %v2649_v61 = vsel %vm1372_vm3, %v2599_v31, 0.0  ;;  %v2613_v6 = vpop.permute.xlu0 %2612 }
 0x51b   :  { %2650 = vadd.xlane.f32.xlu0 %v2649_v61  ;;  %v2664_v61 = vsel %vm1372_vm3, %v2609_v8, 0.0 }
 0x51d   :  { %v2603_v20 = vpop.permute.xlu1 %2602 }
 0x51e   :  { %v2655_v17 = vsel %vm1372_vm3, %v2603_v20, 0.0  ;;  %v2617_v20 = vpop.permute.xlu0 %2616 }
 0x51f   :  { %2656 = vadd.xlane.f32.xlu1 %v2655_v17  ;;  %2653 = vadd.xlane.f32.xlu0 %v2652_v57  ;;  %v2670_v17 = vsel %vm1372_vm3, %v2613_v6, 0.0  ;;  %v2676_v51 = vsel %vm1372_vm3, %v2617_v20, 0.0 }
 0x521   :  { %v2607_v21 = vpop.permute.xlu1 %2606 }
 0x522   :  { %v2661_v52 = vsel %vm1372_vm3, %v2607_v21, 0.0 }
 0x523   :  { %2662 = vadd.xlane.f32.xlu1 %v2661_v52  ;;  %2659 = vadd.xlane.f32.xlu0 %v2658_v63  ;;  %v2621_v52 = vpop.permute.xlu0 %2620 }
 0x525   :  { %v2611_v0 = vpop.permute.xlu1 %2610 }
 0x526   :  { %v2667_v31 = vsel %vm1372_vm3, %v2611_v0, 0.0  ;;  %v2682_v0 = vsel %vm1372_vm3, %v2621_v52, 0.0 }
 0x527   :  { %2668 = vadd.xlane.f32.xlu1 %v2667_v31  ;;  %2665 = vadd.xlane.f32.xlu0 %v2664_v61 }
 0x529   :  { %v2615_v18 = vpop.permute.xlu1 %2614 }
 0x52a   :  { %v2673_v43 = vsel %vm1372_vm3, %v2615_v18, 0.0  ;;  %v4381_v18 = vpop.eup %4380 }
 0x52b   :  { %2674 = vadd.xlane.f32.xlu1 %v2673_v43  ;;  %2671 = vadd.xlane.f32.xlu0 %v2670_v17  ;;  %v2260_v6 = vmul.f32 %v4381_v18, %v6185_v27  ;;  %v4383_v31 = vpop.eup %4382 }
 0x52c   :  { %v4385_v61 = vpop.eup %4384  ;;  %v2262_v2 = vmul.f32 %v4383_v31, %v6189_v13 }
 0x52d   :  { %v2619_v21 = vpop.permute.xlu1 %2618  ;;  %v4387_v39 = vpop.eup %4386  ;;  %v2284_v15 = vmul.f32 %v4385_v61, %v6181_v33 }
 0x52e   :  { %v2679_v57 = vsel %vm1372_vm3, %v2619_v21, 0.0  ;;  %v4389_v28 = vpop.eup %4388  ;;  %v2286_v5 = vmul.f32 %v4387_v39, %v6193_v9 }
 0x52f   :  { %2680 = vadd.xlane.f32.xlu1 %v2679_v57  ;;  %2677 = vadd.xlane.f32.xlu0 %v2676_v51  ;;  %v4391_v4 = vpop.eup %4390  ;;  %v2256_v23 = vmul.f32 %v4389_v28, %v6229_v48 }
 0x530   :  { %v4393_v55 = vpop.eup %4392  ;;  %v2258_v7 = vmul.f32 %v4391_v4, %v6237_v32 }
 0x531   :  { %v2623_v63 = vpop.permute.xlu1 %2622  ;;  %v4395_v33 = vpop.eup %4394  ;;  %v2280_v27 = vmul.f32 %v4393_v55, %v6233_v35 }
 0x532   :  { %v2685_v8 = vsel %vm1372_vm3, %v2623_v63, 0.0  ;;  %v4397_v14 = vpop.eup %4396  ;;  %v2282_v38 = vmul.f32 %v4395_v33, %v6241_v30 }
 0x533   :  { %2686 = vadd.xlane.f32.xlu1 %v2685_v8  ;;  %2683 = vadd.xlane.f32.xlu0 %v2682_v0  ;;  %v4399_v48 = vpop.eup %4398  ;;  %v2268_v13 = vmul.f32 %v4397_v14, %v6277_v45 }
 0x534   :  { %v4401_v25 = vpop.eup %4400  ;;  %v2270_v9 = vmul.f32 %v4399_v48, %v6285_v3 }
 0x535   :  { %v4403_v35 = vpop.eup %4402  ;;  %v2264_v44 = vmul.f32 %v4401_v25, %v6335_v34 }
 0x536   :  { %v4405_v32 = vpop.eup %4404  ;;  %v2266_v42 = vmul.f32 %v4403_v35, %v6345_v46 }
 0x537   :  { %v4407_v30 = vpop.eup %4406  ;;  %v2276_v45 = vmul.f32 %v4405_v32, %v6393_v59  ;;  %v8554_v32 = vld [vmem:[#allocation60_spill] sm:$0xff] }
 0x538   :  { %v4409_v47 = vpop.eup %4408  ;;  %v2278_v62 = vmul.f32 %v4407_v30, %v6405_v19  ;;  %v8556_v30 = vld [vmem:[#allocation15_spill] sm:$0xff] }
 0x539   :  { %v4411_v3 = vpop.eup %4410  ;;  %v2272_v34 = vmul.f32 %v4409_v47, %v6453_v10  ;;  %v8558_v47 = vld [vmem:[#allocation16_spill] sm:$0xff] }
 0x53a   :  { %v2274_v20 = vmul.f32 %v4411_v3, %v6465_v37  ;;  %v8560_v3 = vld [vmem:[#allocation54_spill] sm:$0xff] }
 0x544   :  { %2307 = vrot.lane.b32.xlu1 %v2260_v6, %s4624_s15 }
 0x548   :  { %2309 = vrot.lane.b32.xlu1 %v2262_v2, %s4624_s15 }
 0x549   :  { %2331 = vrot.lane.b32.xlu0 %v2284_v15, %s4624_s15 }
 0x54c   :  { %2333 = vrot.lane.b32.xlu1 %v2286_v5, %s4624_s15 }
 0x54d   :  { %2303 = vrot.lane.b32.xlu0 %v2256_v23, %s4624_s15 }
 0x550   :  { %2305 = vrot.lane.b32.xlu1 %v2258_v7, %s4624_s15 }
 0x551   :  { %2327 = vrot.lane.b32.xlu0 %v2280_v27, %s4624_s15 }
 0x554   :  { %2329 = vrot.lane.b32.xlu1 %v2282_v38, %s4624_s15 }
 0x555   :  { %2315 = vrot.lane.b32.xlu0 %v2268_v13, %s4624_s15 }
 0x558   :  { %2317 = vrot.lane.b32.xlu1 %v2270_v9, %s4624_s15 }
 0x559   :  { %2311 = vrot.lane.b32.xlu0 %v2264_v44, %s4624_s15  ;;  %v8553_v44 = vld [vmem:[#allocation61_spill] sm:$0xff] }
 0x55c   :  { %2313 = vrot.lane.b32.xlu1 %v2266_v42, %s4624_s15  ;;  %v8555_v42 = vld [vmem:[#allocation14_spill] sm:$0xff] }
 0x55d   :  { %2323 = vrot.lane.b32.xlu0 %v2276_v45, %s4624_s15  ;;  %v8557_v45 = vld [vmem:[#allocation68_spill] sm:$0xff] }
 0x560   :  { %2325 = vrot.lane.b32.xlu1 %v2278_v62, %s4624_s15  ;;  %v8559_v62 = vld [vmem:[#allocation55_spill] sm:$0xff] }
 0x561   :  { %2319 = vrot.lane.b32.xlu0 %v2272_v34, %s4624_s15  ;;  %v8561_v34 = vld [vmem:[#allocation49_spill] sm:$0xff] }
 0x564   :  { %2321 = vrot.lane.b32.xlu1 %v2274_v20, %s4624_s15  ;;  %v8562_v20 = vld [vmem:[#allocation48_spill] sm:$0xff] }
 0x591   :  { %v2642_v46 = vpop.xlane.xlu0 %2641 }
 0x592   :  { %4412 = vrcp.f32 %v2642_v46  ;;  %v8563_v46 = vld [vmem:[#allocation57_spill] sm:$0xff] }
 0x59c   :  { %v4413_v59 = vpop.eup %4412 }
 0x59d   :  { %v2689_v43 = vmul.f32 %v4413_v59, %v6578_v56  ;;  %v8564_v59 = vld [vmem:[#allocation56_spill] sm:$0xff] }
 0x59f   :  { %2736 = vrot.lane.b32.xlu0 %v2689_v43, %s4625_s3  ;;  %v8565_v43 = vld [vmem:[#allocation51_spill] sm:$0xff] }
 0x5a0   :  { %v2645_v17 = vpop.xlane.xlu1 %2644 }
 0x5a1   :  { %4414 = vrcp.f32 %v2645_v17 }
 0x5a4   :  { %v2648_v19 = vpop.xlane.xlu0 %2647 }
 0x5a5   :  { %4416 = vrcp.f32 %v2648_v19  ;;  %v8567_v19 = vld [vmem:[#allocation50_spill] sm:$0xff] }
 0x5a8   :  { %v2651_v10 = vpop.xlane.xlu0 %2650 }
 0x5a9   :  { %4418 = vrcp.f32 %v2651_v10  ;;  %v8568_v10 = vld [vmem:[#allocation67_spill] sm:$0xff] }
 0x5ab   :  { %v4415_v21 = vpop.eup %4414 }
 0x5ac   :  { %v2657_v57 = vpop.xlane.xlu1 %2656  ;;  %v2654_v51 = vpop.xlane.xlu0 %2653  ;;  %v2691_v37 = vmul.f32 %v4415_v21, %v6595_v53  ;;  %v8569_v21 = vld [vmem:[#allocation66_spill] sm:$0xff] }
 0x5ad   :  { %4420 = vrcp.f32 %v2657_v57 }
 0x5ae   :  { %4422 = vrcp.f32 %v2654_v51  ;;  %2738 = vrot.lane.b32.xlu1 %v2691_v37, %s4625_s3  ;;  %v8571_v51 = vld [vmem:[#allocation63_spill] sm:$0xff]  ;;  %v8572_v37 = vld [vmem:[#allocation62_spill] sm:$0xff] }
 0x5af   :  { %v4417_v52 = vpop.eup %4416 }
 0x5b0   :  { %v2663_v63 = vpop.xlane.xlu1 %2662  ;;  %v2660_v56 = vpop.xlane.xlu0 %2659  ;;  %v2693_v8 = vmul.f32 %v4417_v52, %v6605_v16  ;;  %v8573_v52 = vld [vmem:[#allocation72_spill] sm:$0xff] }
 0x5b1   :  { %4424 = vrcp.f32 %v2663_v63 }
 0x5b2   :  { %4426 = vrcp.f32 %v2660_v56  ;;  %2740 = vrot.lane.b32.xlu1 %v2693_v8, %s4625_s3  ;;  %v8575_v56 = vld [vmem:[#allocation71_spill] sm:$0xff]  ;;  %v8576_v8 = vld [vmem:[#allocation70_spill] sm:$0xff] }
 0x5b3   :  { %v4419_v0 = vpop.eup %4418 }
 0x5b4   :  { %v2669_v18 = vpop.xlane.xlu1 %2668  ;;  %v2666_v6 = vpop.xlane.xlu0 %2665  ;;  %v2695_v31 = vmul.f32 %v4419_v0, %v6614_v24  ;;  %v8577_v0 = vld [vmem:[#allocation69_spill] sm:$0xff] }
 0x5b5   :  { %4428 = vrcp.f32 %v2669_v18 }
 0x5b6   :  { %4430 = vrcp.f32 %v2666_v6  ;;  %2742 = vrot.lane.b32.xlu1 %v2695_v31, %s4625_s3  ;;  %v8578_v6 = vld [vmem:[#allocation59_spill] sm:$0xff]  ;;  %v8579_v31 = vld [vmem:[#allocation58_spill] sm:$0xff] }
 0x5b7   :  { %v4421_v53 = vpop.eup %4420 }
 0x5b8   :  { %v4423_v61 = vpop.eup %4422  ;;  %v2675_v2 = vpop.xlane.xlu1 %2674  ;;  %v2699_v15 = vmul.f32 %v4421_v53, %v6623_v50 }
 0x5b9   :  { %v2672_v39 = vpop.xlane.xlu0 %2671  ;;  %4432 = vrcp.f32 %v2675_v2  ;;  %v2697_v16 = vmul.f32 %v4423_v61, %v6589_v29  ;;  %v8581_v61 = vld [vmem:[#allocation53_spill] sm:$0xff] }
 0x5ba   :  { %4434 = vrcp.f32 %v2672_v39  ;;  %2746 = vrot.lane.b32.xlu1 %v2699_v15, %s4625_s3  ;;  %v8583_v39 = vld [vmem:[#allocation52_spill] sm:$0xff] }
 0x5bb   :  { %v4425_v28 = vpop.eup %4424  ;;  %2744 = vrot.lane.b32.xlu0 %v2697_v16, %s4625_s3 }
 0x5bc   :  { %v4427_v24 = vpop.eup %4426  ;;  %v2681_v5 = vpop.xlane.xlu1 %2680  ;;  %v2703_v23 = vmul.f32 %v4425_v28, %v6632_v40 }
 0x5bd   :  { %v2678_v4 = vpop.xlane.xlu0 %2677  ;;  %4436 = vrcp.f32 %v2681_v5  ;;  %v2701_v55 = vmul.f32 %v4427_v24, %v6597_v22 }
 0x5be   :  { %4438 = vrcp.f32 %v2678_v4  ;;  %2750 = vrot.lane.b32.xlu1 %v2703_v23, %s4625_s3 }
 0x5bf   :  { %v4429_v50 = vpop.eup %4428  ;;  %2748 = vrot.lane.b32.xlu0 %v2701_v55, %s4625_s3 }
 0x5c0   :  { %v4431_v29 = vpop.eup %4430  ;;  %v2687_v7 = vpop.xlane.xlu1 %2686  ;;  %v2707_v27 = vmul.f32 %v4429_v50, %v6640_v11 }
 0x5c1   :  { %v2684_v33 = vpop.xlane.xlu0 %2683  ;;  %4440 = vrcp.f32 %v2687_v7  ;;  %v2705_v14 = vmul.f32 %v4431_v29, %v6607_v54  ;;  %v8593_v7 = vld [vmem:[#allocation6_spill] sm:$0xff] }
 0x5c2   :  { %4442 = vrcp.f32 %v2684_v33  ;;  %2754 = vrot.lane.b32.xlu1 %v2707_v27, %s4625_s3  ;;  %v2913_v33 = vsel %vm2912_vm6, %v8593_v7, -inf }
 0x5c3   :  { %v4433_v40 = vpop.eup %4432  ;;  %2752 = vrot.lane.b32.xlu0 %v2705_v14, %s4625_s3 }
 0x5c4   :  { %v4435_v22 = vpop.eup %4434  ;;  %v2711_v38 = vmul.f32 %v4433_v40, %v6644_v12  ;;  %v6813_v17 = vpop.permute.xlu1 %2307  ;;  %v8596_v40 = vld [vmem:[#allocation2_spill] sm:$0xff] }
 0x5c5   :  { %v2709_v48 = vmul.f32 %v4435_v22, %v6616_v49  ;;  %v6843_v53 = vpop.permute.xlu0 %2331  ;;  %v2919_v22 = vsel %vm2912_vm6, %v8596_v40, -inf }
 0x5c6   :  { %2758 = vrot.lane.b32.xlu1 %v2711_v38, %s4625_s3  ;;  %v8597_v38 = vld [vmem:[#allocation9_spill] sm:$0xff] }
 0x5c7   :  { %v4437_v13 = vpop.eup %4436  ;;  %2756 = vrot.lane.b32.xlu0 %v2709_v48, %s4625_s3  ;;  %v2916_v48 = vsel %vm2912_vm6, %v8597_v38, -inf }
 0x5c8   :  { %v4439_v11 = vpop.eup %4438  ;;  %v2715_v25 = vmul.f32 %v4437_v13, %v6648_v36  ;;  %v8550_v36 = vld [vmem:[#allocation46_spill] sm:$0xff]  ;;  %v6821_v57 = vpop.permute.xlu1 %2309 }
 0x5c9   :  { %v2713_v54 = vmul.f32 %v4439_v11, %v6625_v60  ;;  %v8549_v60 = vld [vmem:[#allocation47_spill] sm:$0xff]  ;;  %8570 = vst [vmem:[#allocation46_spill] sm:$0xff] %v6821_v57  ;;  %v6851_v15 = vpop.permute.xlu0 %2303 }
 0x5ca   :  { %2762 = vrot.lane.b32.xlu1 %v2715_v25, %s4625_s3  ;;  %8566 = vst [vmem:[#allocation47_spill] sm:$0xff] %v6813_v17  ;;  %v8599_v11 = vld [vmem:[#allocation3_spill] sm:$0xff] }
 0x5cb   :  { %v4441_v9 = vpop.eup %4440  ;;  %2760 = vrot.lane.b32.xlu0 %v2713_v54, %s4625_s3  ;;  %v2922_v25 = vsel %vm2912_vm6, %v8599_v11, -inf  ;;  %v8600_v54 = vld [vmem:[#allocation13_spill] sm:$0xff] }
 0x5cc   :  { %v4443_v35 = vpop.eup %4442  ;;  %v2719_v12 = vmul.f32 %v4441_v9, %v6652_v41  ;;  %v8551_v41 = vld [vmem:[#allocation65_spill] sm:$0xff]  ;;  %v6829_v63 = vpop.permute.xlu1 %2333  ;;  %v2928_v9 = vsel %vm2912_vm6, %v8600_v54, -inf }
 0x5cd   :  { %v2717_v49 = vmul.f32 %v4443_v35, %v6634_v26  ;;  %v8552_v26 = vld [vmem:[#allocation64_spill] sm:$0xff]  ;;  %8574 = vst [vmem:[#allocation65_spill] sm:$0xff] %v6829_v63  ;;  %v6855_v28 = vpop.permute.xlu0 %2327  ;;  %v8610_v63 = vld [vmem:[#allocation18_spill] sm:$0xff] }
 0x5ce   :  { %2766 = vrot.lane.b32.xlu1 %v2719_v12, %s4625_s3  ;;  %8580 = vst [vmem:[#allocation64_spill] sm:$0xff] %v6843_v53  ;;  %8585 = vst [vmem:[#allocation14_spill] sm:$0xff] %v6855_v28  ;;  %v8607_v53 = vld [vmem:[#allocation20_spill] sm:$0xff]  ;;  %v2946_v28 = vsel %vm2912_vm6, %v8610_v63, -inf }
 0x5cf   :  { %2764 = vrot.lane.b32.xlu0 %v2717_v49, %s4625_s3  ;;  %v8603_v49 = vld [vmem:[#allocation12_spill] sm:$0xff] }
 0x5d0   :  { %v6837_v18 = vpop.permute.xlu1 %2305 }
 0x5d1   :  { %v6859_v5 = vpop.permute.xlu0 %2315 }
 0x5d2   :  { %2786 = vrot.lane.b32.xlu1 %v6006_v1, %s4626_s16  ;;  %8587 = vst [vmem:[#allocation68_spill] sm:$0xff] %v6859_v5 }
 0x5d3   :  { %2784 = vrot.lane.b32.xlu0 %v6001_v58, %s4626_s16 }
 0x5d4   :  { %v6847_v2 = vpop.permute.xlu1 %2329 }
 0x5d5   :  { %8582 = vst [vmem:[#allocation61_spill] sm:$0xff] %v6847_v2  ;;  %v6863_v23 = vpop.permute.xlu0 %2311 }
 0x5d6   :  { %2790 = vrot.lane.b32.xlu1 %v8549_v60, %s4626_s16  ;;  %8589 = vst [vmem:[#allocation55_spill] sm:$0xff] %v6863_v23 }
 0x5d7   :  { %2788 = vrot.lane.b32.xlu0 %v8550_v36, %s4626_s16 }
 0x5d8   :  { %v6853_v16 = vpop.permute.xlu1 %2317 }
 0x5d9   :  { %8584 = vst [vmem:[#allocation60_spill] sm:$0xff] %v6853_v16  ;;  %v6867_v50 = vpop.permute.xlu0 %2323 }
 0x5da   :  { %2794 = vrot.lane.b32.xlu1 %v8551_v41, %s4626_s16  ;;  %8591 = vst [vmem:[#allocation49_spill] sm:$0xff] %v6867_v50  ;;  %v8614_v50 = vld [vmem:[#allocation7_spill] sm:$0xff] }
 0x5db   :  { %2792 = vrot.lane.b32.xlu0 %v8552_v26, %s4626_s16 }
 0x5dc   :  { %v6857_v24 = vpop.permute.xlu1 %2313 }
 0x5dd   :  { %8586 = vst [vmem:[#allocation15_spill] sm:$0xff] %v6857_v24  ;;  %v6873_v27 = vpop.permute.xlu0 %2319 }
 0x5de   :  { %2798 = vrot.lane.b32.xlu1 %v8553_v44, %s4626_s16  ;;  %8594 = vst [vmem:[#allocation57_spill] sm:$0xff] %v6873_v27  ;;  %v8617_v27 = vld [vmem:[#allocation5_spill] sm:$0xff] }
 0x5df   :  { %2796 = vrot.lane.b32.xlu0 %v8554_v32, %s4626_s16 }
 0x5e0   :  { %v6861_v4 = vpop.permute.xlu1 %2325 }
 0x5e1   :  { %8588 = vst [vmem:[#allocation16_spill] sm:$0xff] %v6861_v4 }
 0x5e2   :  { %2802 = vrot.lane.b32.xlu1 %v8555_v42, %s4626_s16 }
 0x5e3   :  { %2800 = vrot.lane.b32.xlu0 %v8556_v30, %s4626_s16 }
 0x5e4   :  { %v6865_v55 = vpop.permute.xlu1 %2321 }
 0x5e5   :  { %8590 = vst [vmem:[#allocation54_spill] sm:$0xff] %v6865_v55 }
 0x5e6   :  { %2806 = vrot.lane.b32.xlu1 %v8557_v45, %s4626_s16 }
 0x5e7   :  { %2804 = vrot.lane.b32.xlu0 %v8558_v47, %s4626_s16 }
 0x5ea   :  { %2810 = vrot.lane.b32.xlu1 %v8559_v62, %s4626_s16 }
 0x5eb   :  { %2808 = vrot.lane.b32.xlu0 %v8560_v3, %s4626_s16 }
 0x5ee   :  { %2814 = vrot.lane.b32.xlu1 %v8561_v34, %s4626_s16 }
 0x5ef   :  { %2812 = vrot.lane.b32.xlu0 %v8562_v20, %s4626_s16 }
 0x5f2   :  { %2834 = vrot.lane.b32.xlu1 %v8563_v46, %s4627_s17 }
 0x5f3   :  { %2832 = vrot.lane.b32.xlu0 %v8564_v59, %s4627_s17 }
 0x5f6   :  { %2838 = vrot.lane.b32.xlu1 %v8565_v43, %s4627_s17 }
 0x5f7   :  { %2836 = vrot.lane.b32.xlu0 %v8567_v19, %s4627_s17 }
 0x5fa   :  { %2842 = vrot.lane.b32.xlu1 %v8568_v10, %s4627_s17 }
 0x5fb   :  { %2840 = vrot.lane.b32.xlu0 %v8569_v21, %s4627_s17 }
 0x5fe   :  { %2846 = vrot.lane.b32.xlu1 %v8571_v51, %s4627_s17 }
 0x5ff   :  { %2844 = vrot.lane.b32.xlu0 %v8572_v37, %s4627_s17 }
 0x602   :  { %2850 = vrot.lane.b32.xlu1 %v8573_v52, %s4627_s17 }
 0x603   :  { %2848 = vrot.lane.b32.xlu0 %v8575_v56, %s4627_s17 }
 0x606   :  { %2854 = vrot.lane.b32.xlu1 %v8576_v8, %s4627_s17 }
 0x607   :  { %2852 = vrot.lane.b32.xlu0 %v8577_v0, %s4627_s17 }
 0x60a   :  { %2858 = vrot.lane.b32.xlu1 %v8578_v6, %s4627_s17 }
 0x60b   :  { %2856 = vrot.lane.b32.xlu0 %v8579_v31, %s4627_s17 }
 0x60e   :  { %2862 = vrot.lane.b32.xlu1 %v8581_v61, %s4627_s17 }
 0x60f   :  { %2860 = vrot.lane.b32.xlu0 %v8583_v39, %s4627_s17 }
 0x611   :  { %v6881_v13 = vpop.permute.xlu0 %2736 }
 0x612   :  { %8598 = vst [vmem:[#allocation51_spill] sm:$0xff] %v6881_v13  ;;  %v8606_v13 = vld [vmem:[#allocation10_spill] sm:$0xff] }
 0x620   :  { %v6869_v29 = vpop.permute.xlu1 %2738 }
 0x621   :  { %8592 = vst [vmem:[#allocation48_spill] sm:$0xff] %v6869_v29  ;;  %v2931_v29 = vsel %vm2912_vm6, %v8606_v13, -inf }
 0x624   :  { %v6875_v14 = vpop.permute.xlu1 %2740 }
 0x625   :  { %8595 = vst [vmem:[#allocation56_spill] sm:$0xff] %v6875_v14  ;;  %v8604_v14 = vld [vmem:[#allocation11_spill] sm:$0xff] }
 0x628   :  { %v6887_v35 = vpop.permute.xlu1 %2742 }
 0x629   :  { %8601 = vst [vmem:[#allocation50_spill] sm:$0xff] %v6887_v35 }
 0x62d   :  { %v6889_v12 = vpop.permute.xlu0 %2744 }
 0x62e   :  { %2914 = vmax.xlane.f32.xlu0 %v2913_v33  ;;  %8602 = vst [vmem:[#allocation67_spill] sm:$0xff] %v6889_v12  ;;  %v2925_v33 = vsel %vm2912_vm6, %v8603_v49, -inf  ;;  %v8609_v12 = vld [vmem:[#allocation19_spill] sm:$0xff] }
 0x62f   :  { %v2937_v35 = vsel %vm2912_vm6, %v8609_v12, -inf }
 0x632   :  { %2920 = vmax.xlane.f32.xlu0 %v2919_v22  ;;  %2917 = vmax.xlane.f32.xlu1 %v2916_v48  ;;  %v2934_v22 = vsel %vm2912_vm6, %v8604_v14, -inf  ;;  %v6895_v48 = vpop.permute.xlu1 %2746 }
 0x633   :  { %8605 = vst [vmem:[#allocation66_spill] sm:$0xff] %v6895_v48  ;;  %v8613_v48 = vld [vmem:[#allocation17_spill] sm:$0xff] }
 0x634   :  { %v2943_v2 = vsel %vm2912_vm6, %v8613_v48, -inf }
 0x636   :  { %2923 = vmax.xlane.f32.xlu0 %v2922_v25  ;;  %2929 = vmax.xlane.f32.xlu1 %v2928_v9  ;;  %v2940_v25 = vsel %vm2912_vm6, %v8607_v53, -inf  ;;  %v6901_v9 = vpop.permute.xlu0 %2748 }
 0x637   :  { %8608 = vst [vmem:[#allocation63_spill] sm:$0xff] %v6901_v9  ;;  %v8616_v9 = vld [vmem:[#allocation8_spill] sm:$0xff] }
 0x638   :  { %v2949_v4 = vsel %vm2912_vm6, %v8616_v9, -inf }
 0x63a   :  { %2926 = vmax.xlane.f32.xlu0 %v2925_v33  ;;  %2935 = vmax.xlane.f32.xlu1 %v2934_v22  ;;  %v6907_v33 = vpop.permute.xlu1 %2750  ;;  %v6909_v22 = vpop.permute.xlu0 %2752 }
 0x63b   :  { %8611 = vst [vmem:[#allocation62_spill] sm:$0xff] %v6907_v33  ;;  %8612 = vst [vmem:[#allocation72_spill] sm:$0xff] %v6909_v22  ;;  %v8619_v22 = vld [vmem:[#allocation4_spill] sm:$0xff] }
 0x63c   :  { %v2955_v33 = vsel %vm2912_vm6, %v8619_v22, -inf }
 0x63e   :  { %2932 = vmax.xlane.f32.xlu0 %v2931_v29  ;;  %2941 = vmax.xlane.f32.xlu1 %v2940_v25  ;;  %v2952_v29 = vsel %vm2912_vm6, %v8614_v50, -inf  ;;  %v6915_v25 = vpop.permute.xlu1 %2754 }
 0x63f   :  { %8615 = vst [vmem:[#allocation71_spill] sm:$0xff] %v6915_v25 }
 0x642   :  { %2938 = vmax.xlane.f32.xlu0 %v2937_v35  ;;  %2947 = vmax.xlane.f32.xlu1 %v2946_v28  ;;  %v2958_v28 = vsel %vm2912_vm6, %v8617_v27, -inf  ;;  %v6921_v35 = vpop.permute.xlu0 %2756  ;;  %v6925_v55 = vpop.permute.xlu1 %2758 }
 0x643   :  { %8618 = vst [vmem:[#allocation70_spill] sm:$0xff] %v6921_v35  ;;  %8620 = vst [vmem:[#allocation69_spill] sm:$0xff] %v6925_v55 }
 0x646   :  { %2944 = vmax.xlane.f32.xlu0 %v2943_v2  ;;  %2953 = vmax.xlane.f32.xlu1 %v2952_v29  ;;  %v6927_v2 = vpop.permute.xlu0 %2760  ;;  %v6929_v29 = vpop.permute.xlu1 %2762 }
 0x647   :  { %8621 = vst [vmem:[#allocation59_spill] sm:$0xff] %v6927_v2  ;;  %8622 = vst [vmem:[#allocation58_spill] sm:$0xff] %v6929_v29 }
 0x64a   :  { %2950 = vmax.xlane.f32.xlu0 %v2949_v4  ;;  %2959 = vmax.xlane.f32.xlu1 %v2958_v28  ;;  %v6931_v25 = vpop.permute.xlu0 %2764  ;;  %v6933_v5 = vpop.permute.xlu1 %2766 }
 0x64b   :  { %8623 = vst [vmem:[#allocation53_spill] sm:$0xff] %v6931_v25  ;;  %8624 = vst [vmem:[#allocation6_spill] sm:$0xff] %v6933_v5 }
 0x64e   :  { %2956 = vmax.xlane.f32.xlu0 %v2955_v33  ;;  %v6935_v16 = vpop.permute.xlu0 %2784  ;;  %v6937_v4 = vpop.permute.xlu1 %2786 }
 0x64f   :  { %8625 = vst [vmem:[#allocation2_spill] sm:$0xff] %v6935_v16  ;;  %8626 = vst [vmem:[#allocation9_spill] sm:$0xff] %v6937_v4 }
 0x652   :  { %v6939_v28 = vpop.permute.xlu0 %2788  ;;  %v6941_v35 = vpop.permute.xlu1 %2790 }
 0x653   :  { %8627 = vst [vmem:[#allocation3_spill] sm:$0xff] %v6939_v28  ;;  %8628 = vst [vmem:[#allocation13_spill] sm:$0xff] %v6941_v35 }
 0x656   :  { %v6943_v23 = vpop.permute.xlu0 %2792  ;;  %v6945_v33 = vpop.permute.xlu1 %2794 }
 0x657   :  { %8629 = vst [vmem:[#allocation12_spill] sm:$0xff] %v6943_v23  ;;  %8630 = vst [vmem:[#allocation11_spill] sm:$0xff] %v6945_v33 }
 0x65a   :  { %v6947_v55 = vpop.permute.xlu0 %2796  ;;  %v6949_v2 = vpop.permute.xlu1 %2798 }
 0x65b   :  { %8631 = vst [vmem:[#allocation10_spill] sm:$0xff] %v6947_v55  ;;  %8632 = vst [vmem:[#allocation20_spill] sm:$0xff] %v6949_v2 }
 0x65e   :  { %v6951_v29 = vpop.permute.xlu0 %2800  ;;  %v6953_v25 = vpop.permute.xlu1 %2802 }
 0x65f   :  { %8633 = vst [vmem:[#allocation19_spill] sm:$0xff] %v6951_v29  ;;  %8634 = vst [vmem:[#allocation18_spill] sm:$0xff] %v6953_v25 }
 0x662   :  { %v6955_v5 = vpop.permute.xlu0 %2804  ;;  %v6957_v16 = vpop.permute.xlu1 %2806 }
 0x663   :  { %8635 = vst [vmem:[#allocation17_spill] sm:$0xff] %v6955_v5  ;;  %8636 = vst [vmem:[#allocation7_spill] sm:$0xff] %v6957_v16 }
 0x666   :  { %v6959_v4 = vpop.permute.xlu0 %2808  ;;  %v6961_v28 = vpop.permute.xlu1 %2810 }
 0x667   :  { %8637 = vst [vmem:[#allocation8_spill] sm:$0xff] %v6959_v4  ;;  %8638 = vst [vmem:[#allocation5_spill] sm:$0xff] %v6961_v28 }
 0x66a   :  { %v6963_v35 = vpop.permute.xlu0 %2812  ;;  %v6965_v23 = vpop.permute.xlu1 %2814 }
 0x66b   :  { %8639 = vst [vmem:[#allocation4_spill] sm:$0xff] %v6963_v35  ;;  %8640 = vst [vmem:[#allocation144_spill] sm:$0xff] %v6965_v23 }
 0x66e   :  { %v6967_v33 = vpop.permute.xlu0 %2832  ;;  %v6969_v55 = vpop.permute.xlu1 %2834 }
 0x66f   :  { %8641 = vst [vmem:[#allocation145_spill] sm:$0xff] %v6967_v33  ;;  %8642 = vst [vmem:[#allocation146_spill] sm:$0xff] %v6969_v55 }
 0x672   :  { %v6971_v2 = vpop.permute.xlu0 %2836  ;;  %v6973_v29 = vpop.permute.xlu1 %2838 }
 0x673   :  { %8643 = vst [vmem:[#allocation147_spill] sm:$0xff] %v6971_v2  ;;  %8644 = vst [vmem:[#allocation148_spill] sm:$0xff] %v6973_v29 }
 0x676   :  { %v6975_v25 = vpop.permute.xlu0 %2840  ;;  %v6977_v5 = vpop.permute.xlu1 %2842 }
 0x677   :  { %8645 = vst [vmem:[#allocation149_spill] sm:$0xff] %v6975_v25  ;;  %8646 = vst [vmem:[#allocation150_spill] sm:$0xff] %v6977_v5 }
 0x67a   :  { %v6979_v16 = vpop.permute.xlu0 %2844  ;;  %v6981_v4 = vpop.permute.xlu1 %2846 }
 0x67b   :  { %8647 = vst [vmem:[#allocation151_spill] sm:$0xff] %v6979_v16  ;;  %8648 = vst [vmem:[#allocation152_spill] sm:$0xff] %v6981_v4 }
 0x67e   :  { %v6983_v28 = vpop.permute.xlu0 %2848  ;;  %v6985_v35 = vpop.permute.xlu1 %2850 }
 0x67f   :  { %8649 = vst [vmem:[#allocation153_spill] sm:$0xff] %v6983_v28  ;;  %8650 = vst [vmem:[#allocation154_spill] sm:$0xff] %v6985_v35 }
 0x682   :  { %v6987_v23 = vpop.permute.xlu0 %2852  ;;  %v6989_v33 = vpop.permute.xlu1 %2854 }
 0x683   :  { %8651 = vst [vmem:[#allocation155_spill] sm:$0xff] %v6987_v23  ;;  %8652 = vst [vmem:[#allocation156_spill] sm:$0xff] %v6989_v33 }
 0x686   :  { %v6991_v55 = vpop.permute.xlu0 %2856  ;;  %v6993_v2 = vpop.permute.xlu1 %2858 }
 0x687   :  { %8653 = vst [vmem:[#allocation157_spill] sm:$0xff] %v6991_v55  ;;  %8654 = vst [vmem:[#allocation158_spill] sm:$0xff] %v6993_v2 }
 0x68a   :  { %v6995_v29 = vpop.permute.xlu0 %2860  ;;  %v6997_v25 = vpop.permute.xlu1 %2862 }
 0x68b   :  { %8655 = vst [vmem:[#allocation159_spill] sm:$0xff] %v6995_v29  ;;  %8656 = vst [vmem:[#allocation160_spill] sm:$0xff] %v6997_v25 }
 0x6bb   :  { %v2915_v5 = vpop.xlane.xlu0 %2914 }
 0x6bc   :  { %v2961_v16 = vsub.f32 %v8593_v7, %v2915_v5 }
 0x6be   :  { %v2977_v4 = vmul.f32 1.442695, %v2961_v16 }
 0x6bf   :  { %v2921_v24 = vpop.xlane.xlu0 %2920  ;;  %v2918_v28 = vpop.xlane.xlu1 %2917 }
 0x6c0   :  { %4444 = vpow2.f32 %v2977_v4  ;;  %v2962_v35 = vsub.f32 %v8597_v38, %v2918_v28  ;;  %v2963_v23 = vsub.f32 %v8596_v40, %v2921_v24 }
 0x6c2   :  { %v2979_v33 = vmul.f32 1.442695, %v2962_v35  ;;  %v2981_v57 = vmul.f32 1.442695, %v2963_v23 }
 0x6c3   :  { %v2924_v17 = vpop.xlane.xlu0 %2923  ;;  %v2930_v55 = vpop.xlane.xlu1 %2929 }
 0x6c4   :  { %4446 = vpow2.f32 %v2979_v33  ;;  %v2964_v29 = vsub.f32 %v8599_v11, %v2924_v17  ;;  %v2966_v5 = vsub.f32 %v8600_v54, %v2930_v55 }
 0x6c5   :  { %4448 = vpow2.f32 %v2981_v57 }
 0x6c6   :  { %v2983_v16 = vmul.f32 1.442695, %v2964_v29  ;;  %v2987_v17 = vmul.f32 1.442695, %v2966_v5 }
 0x6c7   :  { %v2927_v2 = vpop.xlane.xlu0 %2926  ;;  %v2936_v25 = vpop.xlane.xlu1 %2935 }
 0x6c8   :  { %v2965_v39 = vsub.f32 %v8603_v49, %v2927_v2  ;;  %v2968_v11 = vsub.f32 %v8604_v14, %v2936_v25 }
 0x6ca   :  { %v7005_v7 = vpop.eup %4444  ;;  %v2985_v38 = vmul.f32 1.442695, %v2965_v39  ;;  %v2991_v54 = vmul.f32 1.442695, %v2968_v11 }
 0x6cb   :  { %3025 = vrot.lane.b32.xlu0 %v7005_v7, %s4620_s8  ;;  %v2933_v24 = vpop.xlane.xlu0 %2932  ;;  %v2942_v40 = vpop.xlane.xlu1 %2941 }
 0x6cc   :  { %4450 = vpow2.f32 %v2985_v38  ;;  %v2967_v23 = vsub.f32 %v8606_v13, %v2933_v24  ;;  %v2970_v2 = vsub.f32 %v8607_v53, %v2942_v40 }
 0x6cd   :  { %4452 = vpow2.f32 %v2983_v16 }
 0x6ce   :  { %v2989_v49 = vmul.f32 1.442695, %v2967_v23  ;;  %v7011_v57 = vpop.eup %4446 }
 0x6cf   :  { %v2939_v35 = vpop.xlane.xlu0 %2938  ;;  %v2948_v55 = vpop.xlane.xlu1 %2947  ;;  %3027 = vrot.lane.b32.xlu1 %v7011_v57, %s4620_s8 }
 0x6d0   :  { %4454 = vpow2.f32 %v2989_v49  ;;  %v2969_v39 = vsub.f32 %v8609_v12, %v2939_v35  ;;  %v7017_v29 = vpop.eup %4448  ;;  %v2995_v12 = vmul.f32 1.442695, %v2970_v2  ;;  %v2972_v28 = vsub.f32 %v8610_v63, %v2948_v55 }
 0x6d1   :  { %4456 = vpow2.f32 %v2987_v17 }
 0x6d2   :  { %v2993_v13 = vmul.f32 1.442695, %v2969_v39  ;;  %v2999_v38 = vmul.f32 1.442695, %v2972_v28 }
 0x6d3   :  { %v2945_v4 = vpop.xlane.xlu0 %2944  ;;  %v2954_v25 = vpop.xlane.xlu1 %2953  ;;  %3029 = vrot.lane.b32.xlu1 %v7017_v29, %s4620_s8 }
 0x6d4   :  { %4458 = vpow2.f32 %v2993_v13  ;;  %v2971_v14 = vsub.f32 %v8613_v48, %v2945_v4  ;;  %v2974_v24 = vsub.f32 %v8614_v50, %v2954_v25 }
 0x6d5   :  { %4460 = vpow2.f32 %v2991_v54 }
 0x6d6   :  { %v7023_v33 = vpop.eup %4450  ;;  %v2997_v16 = vmul.f32 1.442695, %v2971_v14  ;;  %v3003_v49 = vmul.f32 1.442695, %v2974_v24 }
 0x6d7   :  { %v7025_v5 = vpop.eup %4452  ;;  %3033 = vrot.lane.b32.xlu0 %v7023_v33, %s4620_s8  ;;  %v2951_v53 = vpop.xlane.xlu0 %2950 }
 0x6d8   :  { %4462 = vpow2.f32 %v2997_v16  ;;  %v2973_v48 = vsub.f32 %v8616_v9, %v2951_v53  ;;  %3031 = vrot.lane.b32.xlu1 %v7025_v5, %s4620_s8  ;;  %v2960_v23 = vpop.xlane.xlu1 %2959 }
 0x6d9   :  { %4464 = vpow2.f32 %v2995_v12  ;;  %v2976_v50 = vsub.f32 %v8617_v27, %v2960_v23 }
 0x6da   :  { %v7033_v63 = vpop.eup %4454  ;;  %v3001_v40 = vmul.f32 1.442695, %v2973_v48 }
 0x6db   :  { %v7035_v17 = vpop.eup %4456  ;;  %3037 = vrot.lane.b32.xlu0 %v7033_v63, %s4620_s8  ;;  %v2957_v11 = vpop.xlane.xlu0 %2956 }
 0x6dc   :  { %4466 = vpow2.f32 %v3001_v40  ;;  %v2975_v9 = vsub.f32 %v8619_v22, %v2957_v11  ;;  %3035 = vrot.lane.b32.xlu1 %v7035_v17, %s4620_s8  ;;  %v3007_v22 = vmul.f32 1.442695, %v2976_v50 }
 0x6dd   :  { %4468 = vpow2.f32 %v2999_v38 }
 0x6de   :  { %v7043_v35 = vpop.eup %4458  ;;  %v3005_v55 = vmul.f32 1.442695, %v2975_v9 }
 0x6df   :  { %v7045_v39 = vpop.eup %4460  ;;  %3041 = vrot.lane.b32.xlu0 %v7043_v35, %s4620_s8 }
 0x6e0   :  { %4470 = vpow2.f32 %v3005_v55  ;;  %3039 = vrot.lane.b32.xlu1 %v7045_v39, %s4620_s8 }
 0x6e1   :  { %4472 = vpow2.f32 %v3003_v49 }
 0x6e2   :  { %v7051_v54 = vpop.eup %4462  ;;  %4474 = vpow2.f32 %v3007_v22 }
 0x6e3   :  { %v7053_v2 = vpop.eup %4464  ;;  %3045 = vrot.lane.b32.xlu0 %v7051_v54, %s4620_s8 }
 0x6e4   :  { %3043 = vrot.lane.b32.xlu1 %v7053_v2, %s4620_s8 }
 0x6e6   :  { %v7059_v27 = vpop.eup %4466 }
 0x6e7   :  { %v7061_v13 = vpop.eup %4468  ;;  %3049 = vrot.lane.b32.xlu0 %v7059_v27, %s4620_s8 }
 0x6e8   :  { %3047 = vrot.lane.b32.xlu1 %v7061_v13, %s4620_s8 }
 0x6ea   :  { %v7067_v4 = vpop.eup %4470 }
 0x6eb   :  { %v7069_v14 = vpop.eup %4472  ;;  %3053 = vrot.lane.b32.xlu0 %v7067_v4, %s4620_s8 }
 0x6ec   :  { %3051 = vrot.lane.b32.xlu1 %v7069_v14, %s4620_s8  ;;  %v7075_v25 = vpop.eup %4474 }
 0x6f0   :  { %3055 = vrot.lane.b32.xlu1 %v7075_v25, %s4620_s8 }
 0x73d   :  { %v3026_v12 = vpop.permute.xlu0 %3025 }
 0x73e   :  { %v3073_v28 = vsel %vm1372_vm3, %v3026_v12, 0.0 }
 0x73f   :  { %3074 = vadd.xlane.f32.xlu0 %v3073_v28 }
 0x741   :  { %v3028_v16 = vpop.permute.xlu1 %3027 }
 0x742   :  { %v3076_v53 = vsel %vm1372_vm3, %v3028_v16, 0.0 }
 0x743   :  { %3077 = vadd.xlane.f32.xlu1 %v3076_v53 }
 0x745   :  { %v3030_v48 = vpop.permute.xlu1 %3029 }
 0x746   :  { %v3079_v38 = vsel %vm1372_vm3, %v3030_v48, 0.0 }
 0x747   :  { %3080 = vadd.xlane.f32.xlu0 %v3079_v38 }
 0x749   :  { %v3034_v24 = vpop.permute.xlu0 %3033 }
 0x74a   :  { %v3032_v40 = vpop.permute.xlu1 %3031  ;;  %v3085_v50 = vsel %vm1372_vm3, %v3034_v24, 0.0 }
 0x74b   :  { %v3082_v23 = vsel %vm1372_vm3, %v3032_v40, 0.0 }
 0x74c   :  { %3083 = vadd.xlane.f32.xlu0 %v3082_v23 }
 0x74d   :  { %v3038_v11 = vpop.permute.xlu0 %3037 }
 0x74e   :  { %v3036_v9 = vpop.permute.xlu1 %3035  ;;  %v3091_v28 = vsel %vm1372_vm3, %v3038_v11, 0.0 }
 0x74f   :  { %v3088_v49 = vsel %vm1372_vm3, %v3036_v9, 0.0 }
 0x750   :  { %3089 = vadd.xlane.f32.xlu1 %v3088_v49  ;;  %3086 = vadd.xlane.f32.xlu0 %v3085_v50 }
 0x751   :  { %v3042_v55 = vpop.permute.xlu0 %3041 }
 0x752   :  { %v3040_v22 = vpop.permute.xlu1 %3039  ;;  %v3097_v38 = vsel %vm1372_vm3, %v3042_v55, 0.0 }
 0x753   :  { %v3094_v12 = vsel %vm1372_vm3, %v3040_v22, 0.0 }
 0x754   :  { %3095 = vadd.xlane.f32.xlu1 %v3094_v12  ;;  %3092 = vadd.xlane.f32.xlu0 %v3091_v28 }
 0x755   :  { %v3046_v16 = vpop.permute.xlu0 %3045 }
 0x756   :  { %v3044_v53 = vpop.permute.xlu1 %3043  ;;  %v3103_v9 = vsel %vm1372_vm3, %v3046_v16, 0.0  ;;  %v1287_v16 = vld [vmem:[%s8236_s6] sm:$0xff] }
 0x757   :  { %v3100_v48 = vsel %vm1372_vm3, %v3044_v53, 0.0  ;;  %v1288_v53 = vld [vmem:[%s8236_s6 + $0x8] sm:$0xff] }
 0x758   :  { %3101 = vadd.xlane.f32.xlu1 %v3100_v48  ;;  %3098 = vadd.xlane.f32.xlu0 %v3097_v38  ;;  %v1291_v48 = vpack.c.bf16 %v1288_v53, %v1287_v16  ;;  %v1289_v38 = vld [vmem:[%s8236_s6 + $0x10] sm:$0xff] }
 0x759   :  { %v3050_v40 = vpop.permute.xlu0 %3049 }
 0x75a   :  { %v3048_v24 = vpop.permute.xlu1 %3047  ;;  %v3109_v50 = vsel %vm1372_vm3, %v3050_v40, 0.0  ;;  %4221 = vmatprep.subr.bf16.mxu1 %v1291_v48  ;;  %v1290_v40 = vld [vmem:[%s8236_s6 + $0x18] sm:$0xff] }
 0x75b   :  { %v3106_v23 = vsel %vm1372_vm3, %v3048_v24, 0.0  ;;  %4222 = vmatpush3.bf16.msra.mxu1 %v1291_v48  ;;  %v1292_v24 = vpack.c.bf16 %v1290_v40, %v1289_v38 }
 0x75c   :  { %3107 = vadd.xlane.f32.xlu1 %v3106_v23  ;;  %3104 = vadd.xlane.f32.xlu0 %v3103_v9  ;;  %v1281_v23 = vld [vmem:[%s8237_s1] sm:$0xff]  ;;  %v1282_v9 = vld [vmem:[%s8237_s1 + $0x8] sm:$0xff] }
 0x75d   :  { %v3054_v22 = vpop.permute.xlu0 %3053  ;;  %4223 = vmatprep.subr.bf16.mxu1 %v1292_v24 }
 0x75e   :  { %v3052_v49 = vpop.permute.xlu1 %3051  ;;  %v3115_v28 = vsel %vm1372_vm3, %v3054_v22, 0.0 }
 0x75f   :  { %v3112_v11 = vsel %vm1372_vm3, %v3052_v49, 0.0  ;;  %v1285_v49 = vpack.c.bf16 %v1282_v9, %v1281_v23  ;;  %4224 = vmatpush3.bf16.msra.mxu1 %v1292_v24 }
 0x760   :  { %3113 = vadd.xlane.f32.xlu1 %v3112_v11  ;;  %3110 = vadd.xlane.f32.xlu0 %v3109_v50  ;;  %v1283_v11 = vld [vmem:[%s8237_s1 + $0x10] sm:$0xff]  ;;  %v1284_v50 = vld [vmem:[%s8237_s1 + $0x18] sm:$0xff]  ;;  %s4628_s1 = smov 104  }
 0x761   :  { %4225 = vmatprep.mubr.msk.bf16.mxu1 %vm1300_vm7, %v1285_v49  ;;  %v1286_v22 = vpack.c.bf16 %v1284_v50, %v1283_v11 }
 0x762   :  { %v3056_v12 = vpop.permute.xlu1 %3055 }
 0x763   :  { %v3118_v55 = vsel %vm1372_vm3, %v3056_v12, 0.0  ;;  %4226 = vmatmul.mubr.msk.bf16.vlgmr.msra.gmra.mrb[4].mxu1 %vm1300_vm7, %v1286_v22 }
 0x764   :  { %3119 = vadd.xlane.f32.xlu1 %v3118_v55  ;;  %3116 = vadd.xlane.f32.xlu0 %v3115_v28 }
 0x7cc   :  { %v3075_v12 = vpop.xlane.xlu0 %3074 }
 0x7cd   :  { %4476 = vrcp.f32 %v3075_v12 }
 0x7d0   :  { %v3078_v55 = vpop.xlane.xlu1 %3077 }
 0x7d1   :  { %4478 = vrcp.f32 %v3078_v55 }
 0x7d4   :  { %v3081_v28 = vpop.xlane.xlu0 %3080 }
 0x7d5   :  { %4480 = vrcp.f32 %v3081_v28 }
 0x7d7   :  { %v4477_v16 = vpop.eup %4476 }
 0x7d8   :  { %v3122_v53 = vmul.f32 %v4477_v16, %v7005_v7 }
 0x7d9   :  { %v3084_v48 = vpop.xlane.xlu0 %3083 }
 0x7da   :  { %4482 = vrcp.f32 %v3084_v48  ;;  %3169 = vrot.lane.b32.xlu0 %v3122_v53, %s4620_s8 }
 0x7db   :  { %v4479_v38 = vpop.eup %4478 }
 0x7dc   :  { %v3124_v24 = vmul.f32 %v4479_v38, %v7011_v57 }
 0x7dd   :  { %v3090_v40 = vpop.xlane.xlu1 %3089  ;;  %v3087_v23 = vpop.xlane.xlu0 %3086 }
 0x7de   :  { %4484 = vrcp.f32 %v3090_v40  ;;  %3171 = vrot.lane.b32.xlu1 %v3124_v24, %s4620_s8 }
 0x7df   :  { %4486 = vrcp.f32 %v3087_v23  ;;  %v4481_v9 = vpop.eup %4480 }
 0x7e0   :  { %v3126_v50 = vmul.f32 %v4481_v9, %v7017_v29 }
 0x7e1   :  { %v3096_v49 = vpop.xlane.xlu1 %3095  ;;  %v3093_v11 = vpop.xlane.xlu0 %3092 }
 0x7e2   :  { %4488 = vrcp.f32 %v3096_v49  ;;  %3173 = vrot.lane.b32.xlu1 %v3126_v50, %s4620_s8 }
 0x7e3   :  { %4490 = vrcp.f32 %v3093_v11 }
 0x7e4   :  { %v4483_v7 = vpop.eup %4482 }
 0x7e5   :  { %v3102_v22 = vpop.xlane.xlu1 %3101  ;;  %v3099_v12 = vpop.xlane.xlu0 %3098  ;;  %v3128_v55 = vmul.f32 %v4483_v7, %v7025_v5 }
 0x7e6   :  { %4492 = vrcp.f32 %v3102_v22 }
 0x7e7   :  { %4494 = vrcp.f32 %v3099_v12  ;;  %3175 = vrot.lane.b32.xlu1 %v3128_v55, %s4620_s8 }
 0x7e8   :  { %v4485_v57 = vpop.eup %4484 }
 0x7e9   :  { %v4487_v28 = vpop.eup %4486  ;;  %v3108_v16 = vpop.xlane.xlu1 %3107  ;;  %v3132_v48 = vmul.f32 %v4485_v57, %v7035_v17 }
 0x7ea   :  { %v3105_v53 = vpop.xlane.xlu0 %3104  ;;  %4496 = vrcp.f32 %v3108_v16  ;;  %v3130_v29 = vmul.f32 %v4487_v28, %v7023_v33 }
 0x7eb   :  { %4498 = vrcp.f32 %v3105_v53  ;;  %3179 = vrot.lane.b32.xlu1 %v3132_v48, %s4620_s8  ;;  %v8679_v53 = vld [vmem:[#allocation43_spill] sm:$0xff]  ;;  %v8680_v48 = vld [vmem:[#allocation54_spill] sm:$0xff] }
 0x7ec   :  { %v4489_v38 = vpop.eup %4488  ;;  %3177 = vrot.lane.b32.xlu0 %v3130_v29, %s4620_s8  ;;  %v2456_v29 = vsel %vm1372_vm3, %v8680_v48, %v8679_v53  ;;  %v8710_v53 = vld [vmem:[#allocation13_spill] sm:$0xff]  ;;  %v8711_v48 = vld [vmem:[#allocation50_spill] sm:$0xff] }
 0x7ed   :  { %v4491_v5 = vpop.eup %4490  ;;  %v3114_v40 = vpop.xlane.xlu1 %3113  ;;  %v3136_v24 = vmul.f32 %v4489_v38, %v7045_v39  ;;  %v8681_v38 = vld [vmem:[#allocation105_spill] sm:$0xff] }
 0x7ee   :  { %v3111_v23 = vpop.xlane.xlu0 %3110  ;;  %4500 = vrcp.f32 %v3114_v40  ;;  %v3134_v9 = vmul.f32 %v4491_v5, %v7033_v63 }
 0x7ef   :  { %4502 = vrcp.f32 %v3111_v23  ;;  %3183 = vrot.lane.b32.xlu1 %v3136_v24, %s4620_s8  ;;  %v8682_v23 = vld [vmem:[#allocation44_spill] sm:$0xff]  ;;  %v8683_v24 = vld [vmem:[#allocation57_spill] sm:$0xff] }
 0x7f0   :  { %v4493_v17 = vpop.eup %4492  ;;  %3181 = vrot.lane.b32.xlu0 %v3134_v9, %s4620_s8  ;;  %v2455_v9 = vsel %vm1372_vm3, %v8683_v24, %v8682_v23  ;;  %v8713_v23 = vld [vmem:[#allocation56_spill] sm:$0xff] }
 0x7f1   :  { %v4495_v33 = vpop.eup %4494  ;;  %v3120_v49 = vpop.xlane.xlu1 %3119  ;;  %v3140_v50 = vmul.f32 %v4493_v17, %v7053_v2 }
 0x7f2   :  { %v3117_v11 = vpop.xlane.xlu0 %3116  ;;  %4504 = vrcp.f32 %v3120_v49  ;;  %v3138_v7 = vmul.f32 %v4495_v33, %v7043_v35 }
 0x7f3   :  { %4506 = vrcp.f32 %v3117_v11  ;;  %3187 = vrot.lane.b32.xlu1 %v3140_v50, %s4620_s8  ;;  %v8684_v11 = vld [vmem:[#allocation123_spill] sm:$0xff] }
 0x7f4   :  { %v4497_v39 = vpop.eup %4496  ;;  %3185 = vrot.lane.b32.xlu0 %v3138_v7, %s4620_s8  ;;  %v2472_v50 = vsel %vm2029_vm8, %v2456_v29, %v8684_v11  ;;  %v2883_v29 = vsel %vm1372_vm3, %v8711_v48, %v8710_v53  ;;  %v8736_v53 = vld [vmem:[#allocation17_spill] sm:$0xff]  ;;  %v8737_v48 = vld [vmem:[#allocation70_spill] sm:$0xff] }
 0x7f5   :  { %v4499_v63 = vpop.eup %4498  ;;  %v3144_v22 = vmul.f32 %v4497_v39, %v7061_v13  ;;  %v8685_v39 = vld [vmem:[#allocation113_spill] sm:$0xff] }
 0x7f6   :  { %v3142_v12 = vmul.f32 %v4499_v63, %v7051_v54  ;;  %v8686_v63 = vld [vmem:[#allocation16_spill] sm:$0xff] }
 0x7f7   :  { %3191 = vrot.lane.b32.xlu1 %v3144_v22, %s4620_s8  ;;  %v2458_v22 = vsel %vm1372_vm3, %v8686_v63, %v8685_v39  ;;  %v8715_v39 = vld [vmem:[#allocation147_spill] sm:$0xff] }
 0x7f8   :  { %v4501_v55 = vpop.eup %4500  ;;  %3189 = vrot.lane.b32.xlu0 %v3142_v12, %s4620_s8  ;;  %v8687_v12 = vld [vmem:[#allocation126_spill] sm:$0xff] }
 0x7f9   :  { %v4503_v2 = vpop.eup %4502  ;;  %v3148_v57 = vmul.f32 %v4501_v55, %v7069_v14  ;;  %v8678_v14 = vld [vmem:[#allocation101_spill] sm:$0xff]  ;;  %v2471_v55 = vsel %vm2029_vm8, %v2455_v9, %v8687_v12  ;;  %v8714_v9 = vld [vmem:[#allocation148_spill] sm:$0xff]  ;;  %v8717_v12 = vld [vmem:[#allocation66_spill] sm:$0xff] }
 0x7fa   :  { %v3146_v35 = vmul.f32 %v4503_v2, %v7059_v27  ;;  %v8677_v27 = vld [vmem:[#allocation68_spill] sm:$0xff]  ;;  %v8688_v2 = vld [vmem:[#allocation119_spill] sm:$0xff]  ;;  %v2899_v11 = vsel %vm2029_vm8, %v2883_v29, %v8714_v9  ;;  %v2890_v29 = vsel %vm1372_vm3, %v8737_v48, %v8736_v53 }
 0x7fb   :  { %3195 = vrot.lane.b32.xlu1 %v3148_v57, %s4620_s8  ;;  %v8689_v57 = vld [vmem:[#allocation49_spill] sm:$0xff]  ;;  %v8739_v9 = vld [vmem:[#allocation155_spill] sm:$0xff] }
 0x7fc   :  { %v4505_v28 = vpop.eup %4504  ;;  %3193 = vrot.lane.b32.xlu0 %v3146_v35, %s4620_s8  ;;  %v2457_v35 = vsel %vm1372_vm3, %v8689_v57, %v8688_v2  ;;  %v8718_v57 = vld [vmem:[#allocation12_spill] sm:$0xff] }
 0x7fd   :  { %v4507_v16 = vpop.eup %4506  ;;  %v3152_v13 = vmul.f32 %v4505_v28, %v7075_v25 }
 0x7fe   :  { %v3150_v54 = vmul.f32 %v4507_v16, %v7067_v4  ;;  %v8690_v16 = vld [vmem:[#allocation116_spill] sm:$0xff] }
 0x7ff   :  { %3199 = vrot.lane.b32.xlu1 %v3152_v13, %s4620_s8  ;;  %v2474_v13 = vsel %vm2029_vm8, %v2458_v22, %v8690_v16  ;;  %v8716_v22 = vld [vmem:[#allocation11_spill] sm:$0xff] }
 0x800   :  { %3197 = vrot.lane.b32.xlu0 %v3150_v54, %s4620_s8  ;;  %v8691_v54 = vld [vmem:[#allocation90_spill] sm:$0xff] }
 0x803   :  { %3219 = vrot.lane.b32.xlu1 %v6006_v1, %s4628_s1 }
 0x804   :  { %3217 = vrot.lane.b32.xlu0 %v6001_v58, %s4628_s1  ;;  %v8657_v58 = vld [vmem:[#allocation35_spill] sm:$0xff] }
 0x805   :  { %v2448_v1 = vsel %vm1372_vm3, %v6837_v18, %v8657_v58  ;;  %v8674_v18 = vld [vmem:[#allocation60_spill] sm:$0xff]  ;;  %v8692_v58 = vld [vmem:[#allocation61_spill] sm:$0xff] }
 0x807   :  { %3223 = vrot.lane.b32.xlu1 %v8549_v60, %s4628_s1  ;;  %v8658_v60 = vld [vmem:[#allocation93_spill] sm:$0xff] }
 0x808   :  { %3221 = vrot.lane.b32.xlu0 %v8550_v36, %s4628_s1  ;;  %v2447_v36 = vsel %vm1372_vm3, %v6851_v15, %v8658_v60  ;;  %v8676_v15 = vld [vmem:[#allocation104_spill] sm:$0xff]  ;;  %v8693_v60 = vld [vmem:[#allocation121_spill] sm:$0xff] }
 0x809   :  { %v2453_v4 = vsel %vm1372_vm3, %v8677_v27, %v8676_v15  ;;  %v8708_v15 = vld [vmem:[#allocation146_spill] sm:$0xff] }
 0x80a   :  { %v2469_v5 = vsel %vm2029_vm8, %v2453_v4, %v8681_v38 }
 0x80b   :  { %3227 = vrot.lane.b32.xlu1 %v8551_v41, %s4628_s1  ;;  %v8659_v41 = vld [vmem:[#allocation52_spill] sm:$0xff] }
 0x80c   :  { %3225 = vrot.lane.b32.xlu0 %v8552_v26, %s4628_s1  ;;  %v8660_v26 = vld [vmem:[#allocation92_spill] sm:$0xff] }
 0x80f   :  { %3231 = vrot.lane.b32.xlu1 %v8553_v44, %s4628_s1  ;;  %v2464_v44 = vsel %vm2029_vm8, %v2448_v1, %v8660_v26  ;;  %v2460_v1 = vsel %vm1372_vm3, %v8692_v58, %v8691_v54  ;;  %v8695_v26 = vld [vmem:[#allocation14_spill] sm:$0xff] }
 0x810   :  { %3229 = vrot.lane.b32.xlu0 %v8554_v32, %s4628_s1  ;;  %v8661_v32 = vld [vmem:[#allocation74_spill] sm:$0xff] }
 0x813   :  { %3235 = vrot.lane.b32.xlu1 %v8555_v42, %s4628_s1  ;;  %v8662_v42 = vld [vmem:[#allocation46_spill] sm:$0xff] }
 0x814   :  { %3233 = vrot.lane.b32.xlu0 %v8556_v30, %s4628_s1  ;;  %v2450_v30 = vsel %vm1372_vm3, %v8662_v42, %v8661_v32 }
 0x817   :  { %3239 = vrot.lane.b32.xlu1 %v8557_v45, %s4628_s1  ;;  %v8663_v45 = vld [vmem:[#allocation96_spill] sm:$0xff] }
 0x818   :  { %3237 = vrot.lane.b32.xlu0 %v8558_v47, %s4628_s1  ;;  %v2463_v47 = vsel %vm2029_vm8, %v2447_v36, %v8663_v45  ;;  %v2473_v36 = vsel %vm2029_vm8, %v2457_v35, %v8693_v60  ;;  %v8719_v35 = vld [vmem:[#allocation67_spill] sm:$0xff] }
 0x819   :  { %v2884_v16 = vsel %vm1372_vm3, %v8719_v35, %v8718_v57  ;;  %v8743_v57 = vld [vmem:[#allocation59_spill] sm:$0xff] }
 0x81b   :  { %3243 = vrot.lane.b32.xlu1 %v8559_v62, %s4628_s1  ;;  %v8664_v62 = vld [vmem:[#allocation79_spill] sm:$0xff] }
 0x81c   :  { %3241 = vrot.lane.b32.xlu0 %v8560_v3, %s4628_s1  ;;  %v8665_v3 = vld [vmem:[#allocation47_spill] sm:$0xff] }
 0x81f   :  { %3247 = vrot.lane.b32.xlu1 %v8561_v34, %s4628_s1  ;;  %v2449_v34 = vsel %vm1372_vm3, %v8665_v3, %v8664_v62  ;;  %v8698_v62 = vld [vmem:[#allocation65_spill] sm:$0xff] }
 0x820   :  { %3245 = vrot.lane.b32.xlu0 %v8562_v20, %s4628_s1  ;;  %v8666_v20 = vld [vmem:[#allocation78_spill] sm:$0xff] }
 0x823   :  { %3267 = vrot.lane.b32.xlu1 %v8563_v46, %s4629_s18  ;;  %v2466_v46 = vsel %vm2029_vm8, %v2450_v30, %v8666_v20  ;;  %v8696_v30 = vld [vmem:[#allocation94_spill] sm:$0xff] }
 0x824   :  { %3265 = vrot.lane.b32.xlu0 %v8564_v59, %s4629_s18  ;;  %v8667_v59 = vld [vmem:[#allocation106_spill] sm:$0xff]  ;;  %v2476_v45 = vsel %vm2029_vm8, %v2460_v1, %v8696_v30  ;;  %v8721_v1 = vld [vmem:[#allocation149_spill] sm:$0xff] }
 0x825   :  { %v2900_v60 = vsel %vm2029_vm8, %v2884_v16, %v8721_v1  ;;  %v8724_v30 = vld [vmem:[#allocation10_spill] sm:$0xff]  ;;  %v8745_v1 = vld [vmem:[#allocation157_spill] sm:$0xff] }
 0x826   :  { %v8744_v16 = vld [vmem:[#allocation158_spill] sm:$0xff] }
 0x827   :  { %3271 = vrot.lane.b32.xlu1 %v8565_v43, %s4629_s18  ;;  %v8668_v43 = vld [vmem:[#allocation15_spill] sm:$0xff] }
 0x828   :  { %3269 = vrot.lane.b32.xlu0 %v8567_v19, %s4629_s18  ;;  %v2452_v19 = vsel %vm1372_vm3, %v8668_v43, %v8667_v59  ;;  %v8701_v59 = vld [vmem:[#allocation64_spill] sm:$0xff] }
 0x82b   :  { %3275 = vrot.lane.b32.xlu1 %v8568_v10, %s4629_s18  ;;  %v8669_v10 = vld [vmem:[#allocation82_spill] sm:$0xff] }
 0x82c   :  { %3273 = vrot.lane.b32.xlu0 %v8569_v21, %s4629_s18  ;;  %v2465_v21 = vsel %vm2029_vm8, %v2449_v34, %v8669_v10  ;;  %v8699_v34 = vld [vmem:[#allocation98_spill] sm:$0xff] }
 0x82f   :  { %3279 = vrot.lane.b32.xlu1 %v8571_v51, %s4629_s18  ;;  %v8670_v51 = vld [vmem:[#allocation111_spill] sm:$0xff] }
 0x830   :  { %3277 = vrot.lane.b32.xlu0 %v8572_v37, %s4629_s18  ;;  %v8671_v37 = vld [vmem:[#allocation55_spill] sm:$0xff] }
 0x833   :  { %3283 = vrot.lane.b32.xlu1 %v8573_v52, %s4629_s18  ;;  %v2451_v52 = vsel %vm1372_vm3, %v8671_v37, %v8670_v51  ;;  %v8703_v37 = vld [vmem:[#allocation84_spill] sm:$0xff] }
 0x834   :  { %3281 = vrot.lane.b32.xlu0 %v8575_v56, %s4629_s18  ;;  %v8672_v56 = vld [vmem:[#allocation108_spill] sm:$0xff] }
 0x836   :  { %v7267_v40 = vpop.f32.mrb[4].mxu1 }
 0x837   :  { %3287 = vrot.lane.b32.xlu1 %v8576_v8, %s4629_s18  ;;  %v2468_v8 = vsel %vm2029_vm8, %v2452_v19, %v8672_v56  ;;  %v7273_v17 = vpop.f32.mrb[5].mxu1  ;;  %v8704_v56 = vld [vmem:[#allocation9_spill] sm:$0xff] }
 0x838   :  { %3285 = vrot.lane.b32.xlu0 %v8577_v0, %s4629_s18  ;;  %v8673_v0 = vld [vmem:[#allocation42_spill] sm:$0xff]  ;;  %v7277_v49 = vpop.f32.mrb[6].mxu1 }
 0x839   :  { %v7281_v7 = vpop.f32.mrb[7].mxu1 }
 0x83b   :  { %3291 = vrot.lane.b32.xlu1 %v8578_v6, %s4629_s18  ;;  %v2454_v6 = vsel %vm1372_vm3, %v8674_v18, %v8673_v0 }
 0x83c   :  { %3289 = vrot.lane.b32.xlu0 %v8579_v31, %s4629_s18  ;;  %v8675_v31 = vld [vmem:[#allocation112_spill] sm:$0xff]  ;;  %v2470_v25 = vsel %vm2029_vm8, %v2454_v6, %v8678_v14  ;;  %v8706_v6 = vld [vmem:[#allocation2_spill] sm:$0xff]  ;;  %v8709_v14 = vld [vmem:[#allocation145_spill] sm:$0xff] }
 0x83f   :  { %3295 = vrot.lane.b32.xlu1 %v8581_v61, %s4629_s18  ;;  %v2467_v61 = vsel %vm2029_vm8, %v2451_v52, %v8675_v31  ;;  %v8707_v31 = vld [vmem:[#allocation51_spill] sm:$0xff] }
 0x840   :  { %3293 = vrot.lane.b32.xlu0 %v8659_v41, %s4629_s18  ;;  %v8694_v41 = vld [vmem:[#allocation95_spill] sm:$0xff] }
 0x843   :  { %3363 = vrot.lane.b32.xlu1 %v2464_v44, %s4630_s19  ;;  %v2459_v44 = vsel %vm1372_vm3, %v8695_v26, %v8694_v41  ;;  %v8723_v41 = vld [vmem:[#allocation62_spill] sm:$0xff] }
 0x844   :  { %3361 = vrot.lane.b32.xlu0 %v2463_v47, %s4630_s19  ;;  %v8697_v47 = vld [vmem:[#allocation76_spill] sm:$0xff]  ;;  %v2475_v20 = vsel %vm2029_vm8, %v2459_v44, %v8699_v34 }
 0x845   :  { %v2462_v3 = vsel %vm1372_vm3, %v8698_v62, %v8697_v47  ;;  %v8726_v62 = vld [vmem:[#allocation152_spill] sm:$0xff] }
 0x847   :  { %3367 = vrot.lane.b32.xlu1 %v2466_v46, %s4630_s19  ;;  %v8700_v46 = vld [vmem:[#allocation37_spill] sm:$0xff] }
 0x848   :  { %3365 = vrot.lane.b32.xlu0 %v2465_v21, %s4630_s19  ;;  %v2461_v43 = vsel %vm1372_vm3, %v8701_v59, %v8700_v46  ;;  %v8702_v21 = vld [vmem:[#allocation80_spill] sm:$0xff]  ;;  %v8728_v59 = vld [vmem:[#allocation18_spill] sm:$0xff] }
 0x849   :  { %v2478_v51 = vsel %vm2029_vm8, %v2462_v3, %v8702_v21  ;;  %v2477_v52 = vsel %vm2029_vm8, %v2461_v43, %v8703_v37  ;;  %v8729_v43 = vld [vmem:[#allocation71_spill] sm:$0xff] }
 0x84a   :  { %v2889_v21 = vsel %vm1372_vm3, %v8729_v43, %v8728_v59  ;;  %v8730_v37 = vld [vmem:[#allocation19_spill] sm:$0xff] }
 0x84b   :  { %3371 = vrot.lane.b32.xlu1 %v2468_v8, %s4630_s19  ;;  %v8705_v8 = vld [vmem:[#allocation48_spill] sm:$0xff]  ;;  %v8751_v59 = vld [vmem:[#allocation159_spill] sm:$0xff] }
 0x84c   :  { %3369 = vrot.lane.b32.xlu0 %v2467_v61, %s4630_s19  ;;  %v7309_v42 = vpop.permute.xlu0 %3169  ;;  %v2881_v0 = vsel %vm1372_vm3, %v8705_v8, %v8704_v56  ;;  %v2880_v61 = vsel %vm1372_vm3, %v8707_v31, %v8706_v6  ;;  %v8732_v8 = vld [vmem:[#allocation154_spill] sm:$0xff]  ;;  %v8733_v31 = vld [vmem:[#allocation153_spill] sm:$0xff] }
 0x84d   :  { %v2897_v27 = vsel %vm2029_vm8, %v2881_v0, %v8708_v15  ;;  %v2905_v0 = vsel %vm2029_vm8, %v2889_v21, %v8732_v8  ;;  %v8734_v15 = vld [vmem:[#allocation7_spill] sm:$0xff] }
 0x84f   :  { %3375 = vrot.lane.b32.xlu1 %v2470_v25, %s4630_s19  ;;  %v2896_v25 = vsel %vm2029_vm8, %v2880_v61, %v8709_v14 }
 0x850   :  { %3373 = vrot.lane.b32.xlu0 %v2469_v5, %s4630_s19  ;;  %v7275_v33 = vpop.permute.xlu1 %3171  ;;  %v8712_v5 = vld [vmem:[#allocation3_spill] sm:$0xff] }
 0x851   :  { %v2882_v24 = vsel %vm1372_vm3, %v8713_v23, %v8712_v5  ;;  %v8738_v5 = vld [vmem:[#allocation156_spill] sm:$0xff] }
 0x852   :  { %v2898_v63 = vsel %vm2029_vm8, %v2882_v24, %v8715_v39  ;;  %v8740_v39 = vld [vmem:[#allocation5_spill] sm:$0xff] }
 0x853   :  { %3379 = vrot.lane.b32.xlu1 %v2472_v50, %s4630_s19 }
 0x854   :  { %3377 = vrot.lane.b32.xlu0 %v2471_v55, %s4630_s19  ;;  %v7293_v28 = vpop.permute.xlu1 %3173  ;;  %v2885_v55 = vsel %vm1372_vm3, %v8717_v12, %v8716_v22 }
 0x857   :  { %3383 = vrot.lane.b32.xlu1 %v2474_v13, %s4630_s19  ;;  %v8720_v13 = vld [vmem:[#allocation150_spill] sm:$0xff] }
 0x858   :  { %3381 = vrot.lane.b32.xlu0 %v2473_v36, %s4630_s19  ;;  %v2901_v54 = vsel %vm2029_vm8, %v2885_v55, %v8720_v13  ;;  %v8722_v36 = vld [vmem:[#allocation20_spill] sm:$0xff] }
 0x859   :  { %v7307_v32 = vpop.permute.xlu1 %3175  ;;  %v2887_v26 = vsel %vm1372_vm3, %v8723_v41, %v8722_v36  ;;  %v8742_v55 = vld [vmem:[#allocation8_spill] sm:$0xff]  ;;  %v8747_v41 = vld [vmem:[#allocation6_spill] sm:$0xff] }
 0x85a   :  { %v2903_v3 = vsel %vm2029_vm8, %v2887_v26, %v8726_v62  ;;  %v2892_v35 = vsel %vm1372_vm3, %v8743_v57, %v8742_v55  ;;  %v8746_v36 = vld [vmem:[#allocation144_spill] sm:$0xff] }
 0x85b   :  { %3387 = vrot.lane.b32.xlu1 %v2476_v45, %s4630_s19  ;;  %v8725_v45 = vld [vmem:[#allocation63_spill] sm:$0xff]  ;;  %v2895_v26 = vsel %vm1372_vm3, %v8747_v41, %v8746_v36 }
 0x85c   :  { %3385 = vrot.lane.b32.xlu0 %v2475_v20, %s4630_s19  ;;  %v2886_v47 = vsel %vm1372_vm3, %v8725_v45, %v8724_v30  ;;  %v8727_v20 = vld [vmem:[#allocation151_spill] sm:$0xff]  ;;  %v8748_v45 = vld [vmem:[#allocation4_spill] sm:$0xff] }
 0x85d   :  { %v7323_v19 = vpop.permute.xlu1 %3179  ;;  %v2902_v46 = vsel %vm2029_vm8, %v2886_v47, %v8727_v20  ;;  %v8749_v47 = vld [vmem:[#allocation53_spill] sm:$0xff] }
 0x85e   :  { %v7325_v10 = vpop.permute.xlu0 %3177  ;;  %v2894_v62 = vsel %vm1372_vm3, %v8749_v47, %v8748_v45 }
 0x85f   :  { %3391 = vrot.lane.b32.xlu1 %v2478_v51, %s4630_s19  ;;  %v2910_v43 = vsel %vm2029_vm8, %v2894_v62, %v8751_v59 }
 0x860   :  { %3389 = vrot.lane.b32.xlu0 %v2477_v52, %s4630_s19  ;;  %v8731_v52 = vld [vmem:[#allocation72_spill] sm:$0xff] }
 0x861   :  { %v7336_v18 = vpop.permute.xlu1 %3183  ;;  %v2888_v56 = vsel %vm1372_vm3, %v8731_v52, %v8730_v37 }
 0x862   :  { %v7343_v4 = vpop.permute.xlu0 %3181  ;;  %v2904_v61 = vsel %vm2029_vm8, %v2888_v56, %v8733_v31 }
 0x863   :  { %3427 = vrot.lane.b32.xlu1 %v2897_v27, %s4618_s11  ;;  %v8735_v27 = vld [vmem:[#allocation69_spill] sm:$0xff] }
 0x864   :  { %3425 = vrot.lane.b32.xlu0 %v2896_v25, %s4618_s11  ;;  %v2891_v14 = vsel %vm1372_vm3, %v8735_v27, %v8734_v15 }
 0x865   :  { %v7352_v38 = vpop.permute.xlu1 %3187  ;;  %v2907_v23 = vsel %vm2029_vm8, %v2891_v14, %v8738_v5 }
 0x866   :  { %v7359_v50 = vpop.permute.xlu0 %3185 }
 0x867   :  { %3431 = vrot.lane.b32.xlu1 %v2899_v11, %s4618_s11  ;;  %v2906_v11 = vsel %vm2029_vm8, %v2890_v29, %v8739_v9 }
 0x868   :  { %3429 = vrot.lane.b32.xlu0 %v2898_v63, %s4618_s11  ;;  %v8741_v63 = vld [vmem:[#allocation58_spill] sm:$0xff] }
 0x869   :  { %v7368_v2 = vpop.permute.xlu1 %3191  ;;  %v2893_v22 = vsel %vm1372_vm3, %v8741_v63, %v8740_v39 }
 0x86a   :  { %v7375_v58 = vpop.permute.xlu0 %3189  ;;  %v2909_v13 = vsel %vm2029_vm8, %v2893_v22, %v8744_v16 }
 0x86b   :  { %3435 = vrot.lane.b32.xlu1 %v2901_v54, %s4618_s11 }
 0x86c   :  { %3433 = vrot.lane.b32.xlu0 %v2900_v60, %s4618_s11  ;;  %v2908_v60 = vsel %vm2029_vm8, %v2892_v35, %v8745_v1 }
 0x86d   :  { %v7384_v44 = vpop.permute.xlu1 %3195 }
 0x86e   :  { %v7391_v34 = vpop.permute.xlu0 %3193 }
 0x86f   :  { %3439 = vrot.lane.b32.xlu1 %v2903_v3, %s4618_s11  ;;  %v8750_v3 = vld [vmem:[#allocation160_spill] sm:$0xff] }
 0x870   :  { %3437 = vrot.lane.b32.xlu0 %v2902_v46, %s4618_s11  ;;  %v2911_v20 = vsel %vm2029_vm8, %v2895_v26, %v8750_v3 }
 0x871   :  { %v7400_v51 = vpop.permute.xlu1 %3199 }
 0x872   :  { %v7407_v6 = vpop.permute.xlu0 %3197 }
 0x873   :  { %3443 = vrot.lane.b32.xlu1 %v2905_v0, %s4618_s11 }
 0x874   :  { %3441 = vrot.lane.b32.xlu0 %v2904_v61, %s4618_s11 }
 0x875   :  { %v3220_v25 = vpop.permute.xlu1 %3219 }
 0x876   :  { %v3218_v24 = vpop.permute.xlu0 %3217  ;;  %v3314_v14 = vsel %vm1372_vm3, %v7275_v33, %v3220_v25 }
 0x877   :  { %3447 = vrot.lane.b32.xlu1 %v2907_v23, %s4618_s11  ;;  %v3313_v48 = vsel %vm1372_vm3, %v7309_v42, %v3218_v24 }
 0x878   :  { %3445 = vrot.lane.b32.xlu0 %v2906_v11, %s4618_s11 }
 0x879   :  { %v3224_v12 = vpop.permute.xlu1 %3223 }
 0x87a   :  { %v3222_v54 = vpop.permute.xlu0 %3221  ;;  %v3316_v9 = vsel %vm1372_vm3, %v7307_v32, %v3224_v12 }
 0x87b   :  { %3451 = vrot.lane.b32.xlu1 %v2909_v13, %s4618_s11  ;;  %v3315_v33 = vsel %vm1372_vm3, %v7293_v28, %v3222_v54 }
 0x87c   :  { %3449 = vrot.lane.b32.xlu0 %v2908_v60, %s4618_s11 }
 0x87d   :  { %v3228_v30 = vpop.permute.xlu1 %3227 }
 0x87e   :  { %v3226_v46 = vpop.permute.xlu0 %3225  ;;  %v3318_v39 = vsel %vm1372_vm3, %v7323_v19, %v3228_v30 }
 0x87f   :  { %3455 = vrot.lane.b32.xlu1 %v2911_v20, %s4618_s11  ;;  %v3317_v32 = vsel %vm1372_vm3, %v7325_v10, %v3226_v46 }
 0x880   :  { %3453 = vrot.lane.b32.xlu0 %v2910_v43, %s4618_s11 }
 0x881   :  { %v3232_v21 = vpop.permute.xlu1 %3231 }
 0x882   :  { %v3230_v37 = vpop.permute.xlu0 %3229  ;;  %v3320_v55 = vsel %vm1372_vm3, %v7336_v18, %v3232_v21 }
 0x883   :  { %v3319_v19 = vsel %vm1372_vm3, %v7343_v4, %v3230_v37 }
 0x885   :  { %v3236_v52 = vpop.permute.xlu1 %3235 }
 0x886   :  { %v3234_v56 = vpop.permute.xlu0 %3233  ;;  %v3322_v13 = vsel %vm1372_vm3, %v7352_v38, %v3236_v52 }
 0x887   :  { %v3321_v18 = vsel %vm1372_vm3, %v7359_v50, %v3234_v56 }
 0x889   :  { %v3240_v8 = vpop.permute.xlu1 %3239 }
 0x88a   :  { %v3238_v0 = vpop.permute.xlu0 %3237  ;;  %v3324_v36 = vsel %vm1372_vm3, %v7368_v2, %v3240_v8 }
 0x88b   :  { %v3323_v38 = vsel %vm1372_vm3, %v7375_v58, %v3238_v0 }
 0x88d   :  { %v3244_v31 = vpop.permute.xlu1 %3243 }
 0x88e   :  { %v3242_v61 = vpop.permute.xlu0 %3241  ;;  %v3326_v45 = vsel %vm1372_vm3, %v7384_v44, %v3244_v31 }
 0x88f   :  { %v3325_v2 = vsel %vm1372_vm3, %v7391_v34, %v3242_v61 }
 0x891   :  { %v3248_v15 = vpop.permute.xlu1 %3247 }
 0x892   :  { %v3246_v27 = vpop.permute.xlu0 %3245  ;;  %v3328_v20 = vsel %vm1372_vm3, %v7400_v51, %v3248_v15 }
 0x893   :  { %v3327_v44 = vsel %vm1372_vm3, %v7407_v6, %v3246_v27  ;;  %v4178_v27 = vld [vmem:[%s8238_s7] ss:$0 sm:$0xff] }
 0x895   :  { %v3268_v53 = vpop.permute.xlu1 %3267 }
 0x896   :  { %v3330_v29 = vsel %vm2029_vm8, %v3314_v14, %v3268_v53  ;;  %v3266_v5 = vpop.permute.xlu0 %3265  ;;  %v7541_v53 = vadd.f32 %v4178_v27, %v7273_v17 }
 0x897   :  { %v3329_v23 = vsel %vm2029_vm8, %v3313_v48, %v3266_v5  ;;  %3491 = vrot.lane.b32.xlu1 %v3330_v29, %s4631_s20 }
 0x898   :  { %3489 = vrot.lane.b32.xlu0 %v3329_v23, %s4631_s20  ;;  %v3592_v5 = vsel %vm1372_vm3, %v7541_v53, -inf  ;;  %v7550_v23 = vadd.f32 %v7267_v40, %v4178_v27 }
 0x899   :  { %v3272_v11 = vpop.permute.xlu1 %3271 }
 0x89a   :  { %v3332_v25 = vsel %vm2029_vm8, %v3316_v9, %v3272_v11  ;;  %v3270_v42 = vpop.permute.xlu0 %3269  ;;  %v7553_v9 = vadd.f32 %v4178_v27, %v7281_v7 }
 0x89b   :  { %v3331_v24 = vsel %vm2029_vm8, %v3315_v33, %v3270_v42  ;;  %3495 = vrot.lane.b32.xlu1 %v3332_v25, %s4631_s20  ;;  %v7558_v33 = vadd.f32 %v7277_v49, %v4178_v27  ;;  %v3598_v25 = vsel %vm1372_vm3, %v7550_v23, -inf  ;;  %v8767_v27 = vld [vmem:[#allocation86_spill] sm:$0xff] }
 0x89c   :  { %3493 = vrot.lane.b32.xlu0 %v3331_v24, %s4631_s20  ;;  %v3595_v42 = vsel %vm1372_vm3, %v7553_v9, -inf }
 0x89d   :  { %v3276_v63 = vpop.permute.xlu1 %3275  ;;  %v3601_v40 = vsel %vm1372_vm3, %v7558_v33, -inf }
 0x89e   :  { %v3334_v22 = vsel %vm2029_vm8, %v3318_v39, %v3276_v63  ;;  %v3274_v12 = vpop.permute.xlu0 %3273 }
 0x89f   :  { %v3333_v28 = vsel %vm2029_vm8, %v3317_v32, %v3274_v12  ;;  %3499 = vrot.lane.b32.xlu1 %v3334_v22, %s4631_s20 }
 0x8a0   :  { %3497 = vrot.lane.b32.xlu0 %v3333_v28, %s4631_s20  ;;  %v8752_v28 = vld [vmem:[#allocation132_spill] sm:$0xff] }
 0x8a1   :  { %v3280_v57 = vpop.permute.xlu1 %3279  ;;  %4508 = vrcp.f32 %v8752_v28 }
 0x8a2   :  { %v3336_v35 = vsel %vm2029_vm8, %v3320_v55, %v3280_v57  ;;  %v3278_v16 = vpop.permute.xlu0 %3277  ;;  %v8753_v57 = vld [vmem:[#allocation133_spill] sm:$0xff] }
 0x8a3   :  { %v3335_v10 = vsel %vm2029_vm8, %v3319_v19, %v3278_v16  ;;  %3503 = vrot.lane.b32.xlu1 %v3336_v35, %s4631_s20  ;;  %4510 = vrcp.f32 %v8753_v57  ;;  %v8754_v35 = vld [vmem:[#allocation128_spill] sm:$0xff]  ;;  %v8755_v16 = vld [vmem:[#allocation127_spill] sm:$0xff] }
 0x8a4   :  { %3501 = vrot.lane.b32.xlu0 %v3335_v10, %s4631_s20  ;;  %4512 = vrcp.f32 %v8754_v35  ;;  %v8769_v35 = vld [vmem:[#allocation141_spill] sm:$0xff] }
 0x8a5   :  { %v3284_v54 = vpop.permute.xlu1 %3283  ;;  %4514 = vrcp.f32 %v8755_v16  ;;  %v8770_v16 = vld [vmem:[#allocation85_spill] sm:$0xff] }
 0x8a6   :  { %v3338_v1 = vsel %vm2029_vm8, %v3322_v13, %v3284_v54  ;;  %v3282_v60 = vpop.permute.xlu0 %3281  ;;  %v8756_v54 = vld [vmem:[#allocation138_spill] sm:$0xff] }
 0x8a7   :  { %v3337_v4 = vsel %vm2029_vm8, %v3321_v18, %v3282_v60  ;;  %3507 = vrot.lane.b32.xlu1 %v3338_v1, %s4631_s20  ;;  %4516 = vrcp.f32 %v8756_v54  ;;  %v8757_v18 = vld [vmem:[#allocation139_spill] sm:$0xff] }
 0x8a8   :  { %3505 = vrot.lane.b32.xlu0 %v3337_v4, %s4631_s20  ;;  %4518 = vrcp.f32 %v8757_v18  ;;  %v8771_v18 = vld [vmem:[#allocation29_spill] sm:$0xff] }
 0x8a9   :  { %v3288_v41 = vpop.permute.xlu1 %3287 }
 0x8aa   :  { %v3340_v26 = vsel %vm2029_vm8, %v3324_v36, %v3288_v41  ;;  %v3286_v30 = vpop.permute.xlu0 %3285  ;;  %v8758_v36 = vld [vmem:[#allocation136_spill] sm:$0xff] }
 0x8ab   :  { %v3339_v50 = vsel %vm2029_vm8, %v3323_v38, %v3286_v30  ;;  %3511 = vrot.lane.b32.xlu1 %v3340_v26, %s4631_s20  ;;  %v4509_v1 = vpop.eup %4508  ;;  %4520 = vrcp.f32 %v8758_v36  ;;  %v8759_v26 = vld [vmem:[#allocation137_spill] sm:$0xff] }
 0x8ac   :  { %3509 = vrot.lane.b32.xlu0 %v3339_v50, %s4631_s20  ;;  %4522 = vrcp.f32 %v8759_v26  ;;  %v8760_v30 = vld [vmem:[#allocation21_spill] sm:$0xff]  ;;  %v8774_v26 = vld [vmem:[#allocation99_spill] sm:$0xff] }
 0x8ad   :  { %v3292_v47 = vpop.permute.xlu1 %3291  ;;  %v4511_v60 = vpop.eup %4510  ;;  %v1520_v50 = vmul.f32 %v4509_v1, %v8760_v30  ;;  %v8773_v36 = vld [vmem:[#allocation89_spill] sm:$0xff] }
 0x8ae   :  { %v3342_v62 = vsel %vm2029_vm8, %v3326_v45, %v3292_v47  ;;  %v3290_v3 = vpop.permute.xlu0 %3289  ;;  %v4513_v4 = vpop.eup %4512  ;;  %v8761_v47 = vld [vmem:[#allocation28_spill] sm:$0xff] }
 0x8af   :  { %v3341_v58 = vsel %vm2029_vm8, %v3325_v2, %v3290_v3  ;;  %3515 = vrot.lane.b32.xlu1 %v3342_v62, %s4631_s20  ;;  %v4515_v38 = vpop.eup %4514  ;;  %v1518_v2 = vmul.f32 %v4511_v60, %v8761_v47  ;;  %v8762_v62 = vld [vmem:[#allocation22_spill] sm:$0xff]  ;;  %v8772_v60 = vld [vmem:[#allocation140_spill] sm:$0xff] }
 0x8b0   :  { %3513 = vrot.lane.b32.xlu0 %v3341_v58, %s4631_s20  ;;  %v1522_v3 = vmul.f32 %v4513_v4, %v8762_v62  ;;  %v8763_v58 = vld [vmem:[#allocation143_spill] sm:$0xff] }
 0x8b1   :  { %v3296_v46 = vpop.permute.xlu1 %3295  ;;  %4524 = vrcp.f32 %v8763_v58 }
 0x8b2   :  { %v3344_v59 = vsel %vm2029_vm8, %v3328_v20, %v3296_v46  ;;  %v3294_v43 = vpop.permute.xlu0 %3293  ;;  %v8764_v20 = vld [vmem:[#allocation25_spill] sm:$0xff] }
 0x8b3   :  { %v3343_v34 = vsel %vm2029_vm8, %v3327_v44, %v3294_v43  ;;  %3519 = vrot.lane.b32.xlu1 %v3344_v59, %s4631_s20  ;;  %v1524_v46 = vmul.f32 %v4515_v38, %v8764_v20  ;;  %v8765_v44 = vld [vmem:[#allocation142_spill] sm:$0xff]  ;;  %v8766_v59 = vld [vmem:[#allocation81_spill] sm:$0xff] }
 0x8b4   :  { %3517 = vrot.lane.b32.xlu0 %v3343_v34, %s4631_s20  ;;  %4526 = vrcp.f32 %v8765_v44  ;;  %v2014_v43 = vsel %vm1372_vm3, %v1520_v50, %v8766_v59  ;;  %v4517_v34 = vpop.eup %4516  ;;  %v8776_v59 = vld [vmem:[#allocation134_spill] sm:$0xff] }
 0x8b5   :  { %v7513_v21 = vpop.permute.xlu1 %3363  ;;  %4528 = vrcp.f32 %v8769_v35  ;;  %v2031_v54 = vsel %vm2029_vm8, %v2014_v43, %v8770_v16  ;;  %v2016_v1 = vsel %vm1372_vm3, %v1524_v46, %v8771_v18  ;;  %v1528_v30 = vmul.f32 %v4517_v34, %v8774_v26  ;;  %v8777_v43 = vld [vmem:[#allocation33_spill] sm:$0xff]  ;;  %v8781_v35 = vld [vmem:[#allocation83_spill] sm:$0xff] }
 0x8b6   :  { %v7515_v37 = vpop.permute.xlu0 %3361  ;;  %4530 = vrcp.f32 %v8772_v60  ;;  %v3539_v4 = vsel %vm3537_vm9, %v2031_v54, %v7513_v21  ;;  %v2033_v34 = vsel %vm2029_vm8, %v2016_v1, %v8777_v43  ;;  %v8782_v18 = vld [vmem:[#allocation107_spill] sm:$0xff]  ;;  %v8783_v60 = vld [vmem:[#allocation32_spill] sm:$0xff] }
 0x8b7   :  { %4532 = vrcp.f32 %v8776_v59  ;;  %v8784_v26 = vld [vmem:[#allocation131_spill] sm:$0xff] }
 0x8b9   :  { %v7517_v52 = vpop.permute.xlu1 %3367 }
 0x8ba   :  { %v7519_v51 = vpop.permute.xlu0 %3365 }
 0x8bd   :  { %v7521_v56 = vpop.permute.xlu1 %3371 }
 0x8be   :  { %v7523_v6 = vpop.permute.xlu0 %3369 }
 0x8c1   :  { %v7525_v8 = vpop.permute.xlu1 %3375 }
 0x8c2   :  { %v7527_v0 = vpop.permute.xlu0 %3373 }
 0x8c5   :  { %v7529_v31 = vpop.permute.xlu1 %3379 }
 0x8c6   :  { %v7531_v61 = vpop.permute.xlu0 %3377 }
 0x8c9   :  { %v7533_v15 = vpop.permute.xlu1 %3383 }
 0x8ca   :  { %v7538_v14 = vpop.permute.xlu0 %3381 }
 0x8cd   :  { %v7543_v48 = vpop.permute.xlu1 %3387 }
 0x8ce   :  { %v7545_v29 = vpop.permute.xlu0 %3385 }
 0x8d1   :  { %v7555_v11 = vpop.permute.xlu1 %3391 }
 0x8d2   :  { %v7560_v17 = vpop.permute.xlu0 %3389 }
 0x8d3   :  { %3593 = vmax.xlane.f32.xlu0 %v3592_v5  ;;  %v2013_v5 = vsel %vm1372_vm3, %v1518_v2, %v8767_v27  ;;  %v8775_v2 = vld [vmem:[#allocation36_spill] sm:$0xff]  ;;  %v8778_v27 = vld [vmem:[#allocation75_spill] sm:$0xff] }
 0x8d4   :  { %v2030_v38 = vsel %vm2029_vm8, %v2013_v5, %v8773_v36 }
 0x8d5   :  { %v3428_v7 = vpop.permute.xlu1 %3427  ;;  %v3538_v47 = vsel %vm3537_vm9, %v2030_v38, %v7515_v37 }
 0x8d6   :  { %v3426_v24 = vpop.permute.xlu0 %3425 }
 0x8d7   :  { %3599 = vmax.xlane.f32.xlu0 %v3598_v25  ;;  %3596 = vmax.xlane.f32.xlu1 %v3595_v42  ;;  %v4519_v42 = vpop.eup %4518  ;;  %v3555_v46 = vsel %vm3554_vm10, %v3538_v47, %v3426_v24  ;;  %v3541_v24 = vsel %vm3537_vm9, %v2033_v34, %v7517_v52  ;;  %v8790_v34 = vld [vmem:[#allocation100_spill] sm:$0xff] }
 0x8d8   :  { %v4521_v50 = vpop.eup %4520  ;;  %v1526_v62 = vmul.f32 %v4519_v42, %v8775_v2  ;;  %v8780_v42 = vld [vmem:[#allocation103_spill] sm:$0xff]  ;;  %v8785_v2 = vld [vmem:[#allocation130_spill] sm:$0xff] }
 0x8d9   :  { %v7568_v39 = vpop.permute.xlu1 %3431  ;;  %v4523_v20 = vpop.eup %4522  ;;  %v1532_v16 = vmul.f32 %v4521_v50, %v8781_v35 }
 0x8da   :  { %v7570_v49 = vpop.permute.xlu0 %3429  ;;  %v2017_v1 = vsel %vm1372_vm3, %v1526_v62, %v8782_v18  ;;  %v3558_v52 = vsel %vm3554_vm10, %v3541_v24, %v7568_v39 }
 0x8db   :  { %3602 = vmax.xlane.f32.xlu0 %v3601_v40  ;;  %v8768_v40 = vld [vmem:[#allocation34_spill] sm:$0xff] }
 0x8dc   :  { %v2015_v28 = vsel %vm1372_vm3, %v1522_v3, %v8768_v40  ;;  %v3556_v3 = vsel %vm3554_vm10, %v3539_v4, %v3428_v7  ;;  %v8779_v7 = vld [vmem:[#allocation135_spill] sm:$0xff]  ;;  %v2018_v40 = vsel %vm1372_vm3, %v1528_v30, %v8780_v42  ;;  %v1530_v4 = vmul.f32 %v4523_v20, %v8783_v60  ;;  %v8788_v20 = vld [vmem:[#allocation41_spill] sm:$0xff]  ;;  %v8795_v60 = vld [vmem:[#allocation114_spill] sm:$0xff] }
 0x8dd   :  { %v7572_v63 = vpop.permute.xlu1 %3435  ;;  %v2032_v5 = vsel %vm2029_vm8, %v2015_v28, %v8778_v27  ;;  %4534 = vrcp.f32 %v8779_v7  ;;  %v4525_v28 = vpop.eup %4524  ;;  %v8791_v27 = vld [vmem:[#allocation125_spill] sm:$0xff] }
 0x8de   :  { %v7574_v32 = vpop.permute.xlu0 %3433  ;;  %v3540_v54 = vsel %vm3537_vm9, %v2032_v5, %v7519_v51  ;;  %v4527_v38 = vpop.eup %4526  ;;  %4536 = vrcp.f32 %v8784_v26  ;;  %v8786_v51 = vld [vmem:[#allocation39_spill] sm:$0xff]  ;;  %v8797_v26 = vld [vmem:[#allocation109_spill] sm:$0xff] }
 0x8df   :  { %v3557_v30 = vsel %vm3554_vm10, %v3540_v54, %v7570_v49  ;;  %4538 = vrcp.f32 %v8785_v2  ;;  %v2035_v62 = vsel %vm2029_vm8, %v2018_v40, %v8786_v51  ;;  %v4529_v59 = vpop.eup %4528  ;;  %v1534_v5 = vmul.f32 %v4527_v38, %v8791_v27  ;;  %v8793_v54 = vld [vmem:[#allocation102_spill] sm:$0xff] }
 0x8e0   :  { %v4531_v24 = vpop.eup %4530  ;;  %v8796_v38 = vld [vmem:[#allocation122_spill] sm:$0xff] }
 0x8e1   :  { %v7576_v22 = vpop.permute.xlu1 %3439  ;;  %v8803_v27 = vld [vmem:[#allocation30_spill] sm:$0xff] }
 0x8e2   :  { %v7578_v12 = vpop.permute.xlu0 %3437 }
 0x8e5   :  { %v7581_v55 = vpop.permute.xlu1 %3443 }
 0x8e6   :  { %v7584_v19 = vpop.permute.xlu0 %3441 }
 0x8e9   :  { %v7588_v10 = vpop.permute.xlu1 %3447 }
 0x8ea   :  { %v7590_v13 = vpop.permute.xlu0 %3445 }
 0x8ed   :  { %v7595_v41 = vpop.permute.xlu1 %3451 }
 0x8ee   :  { %v7599_v45 = vpop.permute.xlu0 %3449 }
 0x8f1   :  { %v7610_v25 = vpop.permute.xlu1 %3455 }
 0x8f2   :  { %v7614_v57 = vpop.permute.xlu0 %3453 }
 0x909   :  { %v3492_v58 = vpop.permute.xlu1 %3491 }
 0x90a   :  { %v3573_v44 = vsel %vm3571_vm11, %v3556_v3, %v3492_v58  ;;  %v3490_v21 = vpop.permute.xlu0 %3489  ;;  %v3543_v3 = vsel %vm3537_vm9, %v2035_v62, %v7521_v56  ;;  %v8787_v58 = vld [vmem:[#allocation40_spill] sm:$0xff]  ;;  %v2019_v56 = vsel %vm1372_vm3, %v1530_v4, %v8790_v34  ;;  %v1540_v4 = vmul.f32 %v4529_v59, %v8795_v60 }
 0x90b   :  { %4145 = vst.msk [vmem:[%s8239_s10 + $0x8] sm:$0xff] %vm1300_vm7, %v3573_v44  ;;  %v3572_v37 = vsel %vm3571_vm11, %v3555_v46, %v3490_v21  ;;  %v2034_v49 = vsel %vm2029_vm8, %v2017_v1, %v8787_v58  ;;  %v2020_v46 = vsel %vm1372_vm3, %v1532_v16, %v8788_v20  ;;  %v8789_v44 = vld [vmem:[#allocation129_spill] sm:$0xff]  ;;  %v2036_v18 = vsel %vm2029_vm8, %v2019_v56, %v8793_v54  ;;  %v8799_v20 = vld [vmem:[#allocation124_spill] sm:$0xff]  ;;  %v8802_v56 = vld [vmem:[#allocation115_spill] sm:$0xff] }
 0x90c   :  { %4144 = vst.msk [vmem:[%s8239_s10] sm:$0xff] %vm1300_vm7, %v3572_v37  ;;  %v1536_v21 = vmul.f32 %v4525_v28, %v8789_v44  ;;  %v3542_v43 = vsel %vm3537_vm9, %v2034_v49, %v7523_v6  ;;  %v3560_v37 = vsel %vm3554_vm10, %v3543_v3, %v7572_v63  ;;  %v8792_v16 = vld [vmem:[#allocation97_spill] sm:$0xff]  ;;  %v8798_v3 = vld [vmem:[#allocation120_spill] sm:$0xff]  ;;  %v8807_v54 = vld [vmem:[#allocation26_spill] sm:$0xff] }
 0x90d   :  { %v3496_v36 = vpop.permute.xlu1 %3495  ;;  %v3559_v42 = vsel %vm3554_vm10, %v3542_v43, %v7574_v32  ;;  %v2037_v28 = vsel %vm2029_vm8, %v2020_v46, %v8792_v16  ;;  %v8794_v32 = vld [vmem:[#allocation118_spill] sm:$0xff] }
 0x90e   :  { %v3575_v50 = vsel %vm3571_vm11, %v3558_v52, %v3496_v36  ;;  %v3494_v47 = vpop.permute.xlu0 %3493  ;;  %v3545_v63 = vsel %vm3537_vm9, %v2037_v28, %v7525_v8  ;;  %v2022_v1 = vsel %vm1372_vm3, %v1536_v21, %v8794_v32  ;;  %v4533_v52 = vpop.eup %4532  ;;  %v3544_v36 = vsel %vm3537_vm9, %v2036_v18, %v7527_v0  ;;  %v8800_v46 = vld [vmem:[#allocation110_spill] sm:$0xff]  ;;  %v8801_v21 = vld [vmem:[#allocation23_spill] sm:$0xff]  ;;  %v8805_v28 = vld [vmem:[#allocation117_spill] sm:$0xff] }
 0x90f   :  { %4147 = vst.msk [vmem:[%s8239_s10 + $0x18] sm:$0xff] %vm1300_vm7, %v3575_v50  ;;  %v3574_v39 = vsel %vm3571_vm11, %v3557_v30, %v3494_v47  ;;  %v2021_v8 = vsel %vm1372_vm3, %v1534_v5, %v8796_v38  ;;  %v1538_v30 = vmul.f32 %v4531_v24, %v8797_v26  ;;  %v3562_v50 = vsel %vm3554_vm10, %v3545_v63, %v7576_v22  ;;  %v4535_v2 = vpop.eup %4534 }
 0x910   :  { %4146 = vst.msk [vmem:[%s8239_s10 + $0x10] sm:$0xff] %vm1300_vm7, %v3574_v39  ;;  %v3561_v51 = vsel %vm3554_vm10, %v3544_v36, %v7578_v12  ;;  %v2039_v58 = vsel %vm2029_vm8, %v2022_v1, %v8798_v3  ;;  %v4537_v49 = vpop.eup %4536  ;;  %v2038_v12 = vsel %vm2029_vm8, %v2021_v8, %v8799_v20  ;;  %v2024_v44 = vsel %vm1372_vm3, %v1540_v4, %v8800_v46  ;;  %v8808_v1 = vld [vmem:[#allocation88_spill] sm:$0xff]  ;;  %v8814_v20 = vld [vmem:[#allocation31_spill] sm:$0xff]  ;;  %v8815_v46 = vld [vmem:[#allocation77_spill] sm:$0xff] }
 0x911   :  { %v3500_v7 = vpop.permute.xlu1 %3499  ;;  %v3547_v22 = vsel %vm3537_vm9, %v2039_v58, %v7529_v31  ;;  %v1544_v59 = vmul.f32 %v4533_v52, %v8801_v21  ;;  %v4539_v43 = vpop.eup %4538  ;;  %v3546_v34 = vsel %vm3537_vm9, %v2038_v12, %v7531_v61  ;;  %v2023_v31 = vsel %vm1372_vm3, %v1538_v30, %v8802_v56  ;;  %v8810_v30 = vld [vmem:[#allocation87_spill] sm:$0xff] }
 0x912   :  { %v3577_v40 = vsel %vm3571_vm11, %v3560_v37, %v3500_v7  ;;  %v3498_v35 = vpop.permute.xlu0 %3497  ;;  %v1542_v5 = vmul.f32 %v4535_v2, %v8803_v27  ;;  %v3564_v37 = vsel %vm3554_vm10, %v3547_v22, %v7581_v55  ;;  %v3563_v24 = vsel %vm3554_vm10, %v3546_v34, %v7584_v19  ;;  %v8806_v19 = vld [vmem:[#allocation38_spill] sm:$0xff] }
 0x913   :  { %4149 = vst.msk [vmem:[%s8239_s10 + $0x28] sm:$0xff] %vm1300_vm7, %v3577_v40  ;;  %v3576_v6 = vsel %vm3571_vm11, %v3559_v42, %v3498_v35  ;;  %v8804_v35 = vld [vmem:[#allocation45_spill] sm:$0xff]  ;;  %v2026_v63 = vsel %vm1372_vm3, %v1544_v59, %v8806_v19  ;;  %v1548_v18 = vmul.f32 %v4539_v43, %v8807_v54 }
 0x914   :  { %4148 = vst.msk [vmem:[%s8239_s10 + $0x20] sm:$0xff] %vm1300_vm7, %v3576_v6  ;;  %v2041_v16 = vsel %vm2029_vm8, %v2024_v44, %v8804_v35  ;;  %v2040_v6 = vsel %vm2029_vm8, %v2023_v31, %v8805_v28  ;;  %v2025_v60 = vsel %vm1372_vm3, %v1542_v5, %v8808_v1  ;;  %v3766_v1 = vsel %vm2046_vm4, %v7550_v23, -inf }
 0x915   :  { %v3504_v47 = vpop.permute.xlu1 %3503  ;;  %v3549_v55 = vsel %vm3537_vm9, %v2041_v16, %v7533_v15  ;;  %v3548_v32 = vsel %vm3537_vm9, %v2040_v6, %v7538_v14  ;;  %v8809_v15 = vld [vmem:[#allocation24_spill] sm:$0xff] }
 0x916   :  { %v3579_v62 = vsel %vm3571_vm11, %v3562_v50, %v3504_v47  ;;  %v3502_v39 = vpop.permute.xlu0 %3501  ;;  %v1546_v4 = vmul.f32 %v4537_v49, %v8809_v15  ;;  %v3566_v52 = vsel %vm3554_vm10, %v3549_v55, %v7588_v10  ;;  %v3565_v38 = vsel %vm3554_vm10, %v3548_v32, %v7590_v13  ;;  %v8811_v47 = vld [vmem:[#allocation91_spill] sm:$0xff] }
 0x917   :  { %4151 = vst.msk [vmem:[%s8239_s10 + $0x38] sm:$0xff] %vm1300_vm7, %v3579_v62  ;;  %v3578_v0 = vsel %vm3571_vm11, %v3561_v51, %v3502_v39  ;;  %v2043_v50 = vsel %vm2029_vm8, %v2026_v63, %v8810_v30  ;;  %v2042_v2 = vsel %vm2029_vm8, %v2025_v60, %v8811_v47  ;;  %v8812_v13 = vld [vmem:[#allocation27_spill] sm:$0xff]  ;;  %v8813_v39 = vld [vmem:[#allocation73_spill] sm:$0xff]  ;;  %v3763_v32 = vsel %vm2046_vm4, %v7553_v9, -inf  ;;  %v3588_v60 = vld [vmem:[%s8240_s9] sm:$0xff] }
 0x918   :  { %4150 = vst.msk [vmem:[%s8239_s10 + $0x30] sm:$0xff] %vm1300_vm7, %v3578_v0  ;;  %v3551_v10 = vsel %vm3537_vm9, %v2043_v50, %v7543_v48  ;;  %v2028_v51 = vsel %vm1372_vm3, %v1548_v18, %v8812_v13  ;;  %v3550_v62 = vsel %vm3537_vm9, %v2042_v2, %v7545_v29  ;;  %v2027_v3 = vsel %vm1372_vm3, %v1546_v4, %v8813_v39  ;;  %v3590_v47 = vld [vmem:[%s8240_s9 + $0x10] sm:$0xff] }
 0x919   :  { %v3508_v7 = vpop.permute.xlu1 %3507  ;;  %v3568_v48 = vsel %vm3554_vm10, %v3551_v10, %v7595_v41  ;;  %v3567_v0 = vsel %vm3554_vm10, %v3550_v62, %v7599_v45  ;;  %v2045_v12 = vsel %vm2029_vm8, %v2028_v51, %v8814_v20  ;;  %v2044_v44 = vsel %vm2029_vm8, %v2027_v3, %v8815_v46  ;;  %v3591_v10 = vld [vmem:[%s8240_s9 + $0x18] sm:$0xff] }
 0x91a   :  { %v3581_v42 = vsel %vm3571_vm11, %v3564_v37, %v3508_v7  ;;  %v3506_v40 = vpop.permute.xlu0 %3505  ;;  %v3553_v41 = vsel %vm3537_vm9, %v2045_v12, %v7555_v11  ;;  %v3552_v45 = vsel %vm3537_vm9, %v2044_v44, %v7560_v17  ;;  %v3760_v18 = vsel %vm2046_vm4, %v7541_v53, -inf }
 0x91b   :  { %4153 = vst.msk [vmem:[%s8239_s10 + $0x58] sm:$0xff] %vm1300_vm7, %v3581_v42  ;;  %v3580_v61 = vsel %vm3571_vm11, %v3563_v24, %v3506_v40  ;;  %v3570_v21 = vsel %vm3554_vm10, %v3553_v41, %v7610_v25  ;;  %v3569_v43 = vsel %vm3554_vm10, %v3552_v45, %v7614_v57  ;;  %v3769_v15 = vsel %vm2046_vm4, %v7558_v33, -inf }
 0x91c   :  { %4152 = vst.msk [vmem:[%s8239_s10 + $0x50] sm:$0xff] %vm1300_vm7, %v3580_v61  ;;  %v3868_v4 = vsel %vm2479_vm5, %v7541_v53, -inf  ;;  %v3985_v30 = vsel %vm2912_vm6, %v7558_v33, -inf  ;;  %v3874_v50 = vsel %vm2479_vm5, %v7550_v23, -inf  ;;  %v3677_v44 = vmul.f32 0.2, %v7553_v9 }
 0x91d   :  { %v3512_v36 = vpop.permute.xlu1 %3511 }
 0x91e   :  { %v3583_v8 = vsel %vm3571_vm11, %v3566_v52, %v3512_v36  ;;  %v3510_v26 = vpop.permute.xlu0 %3509  ;;  %v3871_v52 = vsel %vm2479_vm5, %v7553_v9, -inf  ;;  %v3877_v36 = vsel %vm2479_vm5, %v7558_v33, -inf }
 0x91f   :  { %4155 = vst.msk [vmem:[%s8239_s10 + $0x68] sm:$0xff] %vm1300_vm7, %v3583_v8  ;;  %v3582_v14 = vsel %vm3571_vm11, %v3565_v38, %v3510_v26  ;;  %v3976_v38 = vsel %vm2912_vm6, %v7541_v53, -inf  ;;  %v3979_v8 = vsel %vm2912_vm6, %v7553_v9, -inf  ;;  %v3982_v26 = vsel %vm2912_vm6, %v7550_v23, -inf }
 0x920   :  { %4154 = vst.msk [vmem:[%s8239_s10 + $0x60] sm:$0xff] %vm1300_vm7, %v3582_v14  ;;  %v3589_v14 = vld [vmem:[%s8240_s9 + $0x8] sm:$0xff] }
 0x921   :  { %v3516_v58 = vpop.permute.xlu1 %3515 }
 0x922   :  { %v3585_v49 = vsel %vm3571_vm11, %v3568_v48, %v3516_v58  ;;  %v3514_v22 = vpop.permute.xlu0 %3513 }
 0x923   :  { %4157 = vst.msk [vmem:[%s8239_s10 + $0x78] sm:$0xff] %vm1300_vm7, %v3585_v49  ;;  %v3584_v29 = vsel %vm3571_vm11, %v3567_v0, %v3514_v22 }
 0x924   :  { %4156 = vst.msk [vmem:[%s8239_s10 + $0x70] sm:$0xff] %vm1300_vm7, %v3584_v29  ;;  %v3676_v29 = vmul.f32 0.2, %v7541_v53 }
 0x925   :  { %v3520_v59 = vpop.permute.xlu1 %3519 }
 0x926   :  { %v3587_v11 = vsel %vm3571_vm11, %v3570_v21, %v3520_v59  ;;  %v3518_v34 = vpop.permute.xlu0 %3517  ;;  %v3680_v46 = vmul.f32 1.442695, %v3676_v29  ;;  %v3679_v59 = vmul.f32 0.2, %v7558_v33 }
 0x927   :  { %4159 = vst.msk [vmem:[%s8239_s10 + $0x88] sm:$0xff] %vm1300_vm7, %v3587_v11  ;;  %v3586_v56 = vsel %vm3571_vm11, %v3569_v43, %v3518_v34  ;;  %v3682_v43 = vmul.f32 1.442695, %v3677_v44  ;;  %v3678_v11 = vmul.f32 0.2, %v7550_v23 }
 0x928   :  { %4158 = vst.msk [vmem:[%s8239_s10 + $0x80] sm:$0xff] %vm1300_vm7, %v3586_v56 }
 0x960   :  { %v3594_v17 = vpop.xlane.xlu0 %3593 }
 0x961   :  { %v3604_v25 = vsub.f32 %v7541_v53, %v3594_v17  ;;  %v3686_v17 = vmul.f32 1.442695, %v3679_v59 }
 0x963   :  { %v3608_v31 = vmul.f32 1.442695, %v3604_v25  ;;  %v3684_v25 = vmul.f32 1.442695, %v3678_v11 }
 0x964   :  { %v3600_v57 = vpop.xlane.xlu0 %3599  ;;  %v3597_v27 = vpop.xlane.xlu1 %3596 }
 0x965   :  { %4540 = vpow2.f32 %v3608_v31  ;;  %v3606_v5 = vsub.f32 %v7550_v23, %v3600_v57  ;;  %v3605_v37 = vsub.f32 %v7553_v9, %v3597_v27 }
 0x967   :  { %v3612_v7 = vmul.f32 1.442695, %v3606_v5  ;;  %v3610_v24 = vmul.f32 1.442695, %v3605_v37 }
 0x968   :  { %v3603_v42 = vpop.xlane.xlu0 %3602 }
 0x969   :  { %4542 = vpow2.f32 %v3612_v7  ;;  %v3607_v40 = vsub.f32 %v7558_v33, %v3603_v42 }
 0x96a   :  { %4544 = vpow2.f32 %v3610_v24 }
 0x96b   :  { %v3614_v35 = vmul.f32 1.442695, %v3607_v40 }
 0x96d   :  { %4546 = vpow2.f32 %v3614_v35 }
 0x96e   :  { %4548 = vpow2.f32 %v3680_v46  ;;  %v3638_v46 = vmul.f32 0.1, %v7550_v23 }
 0x96f   :  { %v7838_v16 = vpop.eup %4540  ;;  %4550 = vpow2.f32 %v3682_v43 }
 0x970   :  { %v3616_v61 = vsel %vm1372_vm3, %v7838_v16, 0.0  ;;  %4552 = vpow2.f32 %v3686_v17 }
 0x971   :  { %3617 = vadd.xlane.f32.xlu0 %v3616_v61  ;;  %4554 = vpow2.f32 %v3684_v25 }
 0x973   :  { %v7842_v55 = vpop.eup %4542 }
 0x974   :  { %v7844_v28 = vpop.eup %4544  ;;  %v3622_v6 = vsel %vm1372_vm3, %v7842_v55, 0.0 }
 0x975   :  { %3623 = vadd.xlane.f32.xlu0 %v3622_v6  ;;  %v3619_v19 = vsel %vm1372_vm3, %v7844_v28, 0.0 }
 0x976   :  { %3620 = vadd.xlane.f32.xlu1 %v3619_v19 }
 0x977   :  { %v7850_v63 = vpop.eup %4546 }
 0x978   :  { %v3625_v54 = vsel %vm1372_vm3, %v7850_v63, 0.0  ;;  %v4549_v27 = vpop.eup %4548 }
 0x979   :  { %v4551_v24 = vpop.eup %4550 }
 0x97a   :  { %3626 = vadd.xlane.f32.xlu1 %v3625_v54  ;;  %v4553_v61 = vpop.eup %4552 }
 0x97b   :  { %v4555_v54 = vpop.eup %4554 }
 0x97e   :  { %3761 = vmax.xlane.f32.xlu1 %v3760_v18 }
 0x982   :  { %3764 = vmax.xlane.f32.xlu1 %v3763_v32 }
 0x986   :  { %3767 = vmax.xlane.f32.xlu1 %v3766_v1 }
 0x98a   :  { %3770 = vmax.xlane.f32.xlu1 %v3769_v15  ;;  %v3636_v15 = vmul.f32 0.1, %v7541_v53 }
 0x98b   :  { %3644 = vrot.lane.b32.xlu0 %v3588_v60, %s4617_s4 }
 0x98e   :  { %3869 = vmax.xlane.f32.xlu1 %v3868_v4 }
 0x992   :  { %3872 = vmax.xlane.f32.xlu1 %v3871_v52 }
 0x996   :  { %3878 = vmax.xlane.f32.xlu1 %v3877_v36 }
 0x99a   :  { %3977 = vmax.xlane.f32.xlu1 %v3976_v38  ;;  %v3637_v38 = vmul.f32 0.1, %v7553_v9 }
 0x99e   :  { %3980 = vmax.xlane.f32.xlu1 %v3979_v8 }
 0x9a2   :  { %3983 = vmax.xlane.f32.xlu1 %v3982_v26 }
 0x9a6   :  { %3986 = vmax.xlane.f32.xlu1 %v3985_v30 }
 0x9aa   :  { %3875 = vmax.xlane.f32.xlu0 %v3874_v50 }
 0x9b7   :  { %3646 = vrot.lane.b32.xlu1 %v3589_v14, %s4617_s4 }
 0x9bb   :  { %3650 = vrot.lane.b32.xlu1 %v3591_v10, %s4617_s4 }
 0x9bf   :  { %3660 = vrot.lane.b32.xlu1 %v3588_v60, %s4618_s11 }
 0x9c0   :  { %3648 = vrot.lane.b32.xlu0 %v3590_v47, %s4617_s4 }
 0x9c3   :  { %3662 = vrot.lane.b32.xlu1 %v3589_v14, %s4618_s11 }
 0x9c4   :  { %3666 = vrot.lane.b32.xlu0 %v3591_v10, %s4618_s11 }
 0x9c7   :  { %3664 = vrot.lane.b32.xlu1 %v3590_v47, %s4618_s11 }
 0x9fe   :  { %v7912_v49 = vpop.xlane.xlu0 %3617 }
 0xa02   :  { %v7918_v12 = vpop.xlane.xlu0 %3623 }
 0xa03   :  { %v7898_v2 = vpop.xlane.xlu1 %3620 }
 0xa06   :  { %v3645_v45 = vpop.permute.xlu0 %3644 }
 0xa07   :  { %v7900_v13 = vpop.xlane.xlu1 %3626  ;;  %v3656_v52 = vmul.f32 %v3645_v45, %v3636_v15 }
 0xa0b   :  { %v3762_v51 = vpop.xlane.xlu1 %3761 }
 0xa0c   :  { %v3772_v4 = vsub.f32 %v7541_v53, %v3762_v51  ;;  %v3639_v51 = vmul.f32 0.1, %v7558_v33 }
 0xa0e   :  { %v3776_v26 = vmul.f32 1.442695, %v3772_v4 }
 0xa0f   :  { %v3765_v62 = vpop.xlane.xlu1 %3764 }
 0xa10   :  { %v3773_v36 = vsub.f32 %v7553_v9, %v3765_v62  ;;  %4556 = vpow2.f32 %v3776_v26 }
 0xa12   :  { %v3778_v47 = vmul.f32 1.442695, %v3773_v36 }
 0xa13   :  { %v7902_v39 = vpop.xlane.xlu1 %3767 }
 0xa14   :  { %v3774_v30 = vsub.f32 %v7550_v23, %v7902_v39  ;;  %4558 = vpow2.f32 %v3778_v47 }
 0xa16   :  { %v3780_v44 = vmul.f32 1.442695, %v3774_v30 }
 0xa17   :  { %v7904_v3 = vpop.xlane.xlu1 %3770 }
 0xa18   :  { %v3775_v29 = vsub.f32 %v7558_v33, %v7904_v3  ;;  %4560 = vpow2.f32 %v3780_v44 }
 0xa1a   :  { %v3782_v11 = vmul.f32 1.442695, %v3775_v29 }
 0xa1b   :  { %v7906_v48 = vpop.xlane.xlu1 %3869 }
 0xa1c   :  { %v3880_v39 = vsub.f32 %v7541_v53, %v7906_v48  ;;  %4562 = vpow2.f32 %v3782_v11 }
 0xa1e   :  { %v3884_v48 = vmul.f32 1.442695, %v3880_v39 }
 0xa1f   :  { %v7908_v58 = vpop.xlane.xlu1 %3872 }
 0xa20   :  { %4564 = vpow2.f32 %v3884_v48 }
 0xa23   :  { %v7910_v0 = vpop.xlane.xlu1 %3878 }
 0xa27   :  { %v7914_v22 = vpop.xlane.xlu1 %3977 }
 0xa2b   :  { %v7916_v20 = vpop.xlane.xlu1 %3980 }
 0xa2f   :  { %v7921_v41 = vpop.xlane.xlu1 %3983 }
 0xa33   :  { %v7924_v21 = vpop.xlane.xlu1 %3986 }
 0xa37   :  { %v3647_v34 = vpop.permute.xlu1 %3646  ;;  %v7928_v56 = vpop.xlane.xlu0 %3875 }
 0xa38   :  { %v3657_v14 = vmul.f32 %v3647_v34, %v3637_v38  ;;  %v3881_v34 = vsub.f32 %v7553_v9, %v7908_v58  ;;  %v3883_v58 = vsub.f32 %v7558_v33, %v7910_v0  ;;  %v3989_v0 = vsub.f32 %v7553_v9, %v7916_v20 }
 0xa39   :  { %v3991_v20 = vsub.f32 %v7558_v33, %v7924_v21 }
 0xa3b   :  { %v3651_v31 = vpop.permute.xlu1 %3650  ;;  %v3649_v57 = vpop.permute.xlu0 %3648 }
 0xa3c   :  { %v3659_v59 = vmul.f32 %v3651_v31, %v3639_v51  ;;  %v3658_v43 = vmul.f32 %v3649_v57, %v3638_v46  ;;  %v3882_v31 = vsub.f32 %v7550_v23, %v7928_v56  ;;  %v3988_v56 = vsub.f32 %v7541_v53, %v7914_v22 }
 0xa3d   :  { %v3990_v53 = vsub.f32 %v7550_v23, %v7921_v41  ;;  %v3998_v23 = vmul.f32 1.442695, %v3991_v20 }
 0xa3f   :  { %v3661_v5 = vpop.permute.xlu1 %3660  ;;  %v3667_v42 = vpop.permute.xlu0 %3666  ;;  %v3996_v9 = vmul.f32 1.442695, %v3990_v53 }
 0xa40   :  { %v3688_v37 = vmul.f32 %v4549_v27, %v3661_v5  ;;  %v3691_v6 = vmul.f32 %v4553_v61, %v3667_v42  ;;  %v3672_v8 = vadd.f32 %v3661_v5, %v3656_v52  ;;  %v3675_v17 = vadd.f32 %v3667_v42, %v3659_v59 }
 0xa42   :  { %v3692_v7 = vmul.f32 0.5, %v3688_v37  ;;  %v3695_v1 = vmul.f32 0.5, %v3691_v6  ;;  %v3992_v6 = vmul.f32 1.442695, %v3988_v56 }
 0xa43   :  { %v3663_v40 = vpop.permute.xlu1 %3662 }
 0xa44   :  { %v3689_v35 = vmul.f32 %v4551_v24, %v3663_v40  ;;  %3700 = vrot.lane.b32.xlu1 %v3692_v7, %s4619_s5  ;;  %v7946_v62 = vadd.f32 %v3663_v40, %v3657_v14  ;;  %v3886_v7 = vmul.f32 1.442695, %v3881_v34  ;;  %v3888_v24 = vmul.f32 1.442695, %v3882_v31  ;;  %v7978_v40 = vpop.eup %4556 }
 0xa45   :  { %v7986_v61 = vpop.eup %4558 }
 0xa46   :  { %v3693_v19 = vmul.f32 0.5, %v3689_v35  ;;  %4566 = vpow2.f32 %v3886_v7  ;;  %v3890_v35 = vmul.f32 1.442695, %v3883_v58  ;;  %v7990_v22 = vpop.eup %4560 }
 0xa47   :  { %v3665_v18 = vpop.permute.xlu1 %3664  ;;  %4568 = vpow2.f32 %v3888_v24 }
 0xa48   :  { %v3690_v32 = vmul.f32 %v4555_v54, %v3665_v18  ;;  %3702 = vrot.lane.b32.xlu0 %v3693_v19, %s4619_s5  ;;  %v3674_v25 = vadd.f32 %v3665_v18, %v3658_v43  ;;  %4570 = vpow2.f32 %v3890_v35  ;;  %v3994_v19 = vmul.f32 1.442695, %v3989_v0  ;;  %v7998_v54 = vpop.eup %4562 }
 0xa49   :  { %4572 = vpow2.f32 %v3992_v6  ;;  %v8000_v18 = vpop.eup %4564 }
 0xa4a   :  { %v3694_v60 = vmul.f32 0.5, %v3690_v32  ;;  %4574 = vpow2.f32 %v3994_v19 }
 0xa4b   :  { %4576 = vpow2.f32 %v3996_v9 }
 0xa4c   :  { %3704 = vrot.lane.b32.xlu1 %v3694_v60, %s4619_s5  ;;  %3706 = vrot.lane.b32.xlu0 %v3695_v1, %s4619_s5  ;;  %4578 = vpow2.f32 %v3998_v23 }
 0xa4d   :  { %4580 = vrcp.f32 %v7912_v49 }
 0xa4e   :  { %4582 = vrcp.f32 %v7918_v12 }
 0xa4f   :  { %4584 = vrcp.f32 %v7898_v2 }
 0xa50   :  { %v8006_v41 = vpop.eup %4566 }
 0xa51   :  { %v8008_v32 = vpop.eup %4568 }
 0xa52   :  { %v8014_v33 = vpop.eup %4570 }
 0xa53   :  { %v8016_v21 = vpop.eup %4572 }
 0xa54   :  { %v8022_v1 = vpop.eup %4574 }
 0xa55   :  { %v8024_v60 = vpop.eup %4576 }
 0xa56   :  { %v8034_v4 = vpop.eup %4578 }
 0xa57   :  { %v4581_v38 = vpop.eup %4580 }
 0xab6   :  { %v3701_v50 = vpop.permute.xlu1 %3700 }
 0xab7   :  { %v7940_v10 = vsub.f32 %v3672_v8, %v3701_v50  ;;  %v7976_v42 = vadd.f32 %v3701_v50, %v3672_v8  ;;  %v3629_v8 = vmul.f32 %v4581_v38, %v7838_v16  ;;  %v4583_v50 = vpop.eup %4582 }
 0xab8   :  { %v3633_v47 = vmul.f32 %v4583_v50, %v7842_v55 }
 0xab9   :  { %3724 = vrot.lane.b32.xlu1 %v7940_v10, %s4620_s8 }
 0xaba   :  { %v7952_v45 = vpop.permute.xlu0 %3702 }
 0xabb   :  { %v7956_v3 = vsub.f32 %v7946_v62, %v7952_v45  ;;  %v8032_v15 = vadd.f32 %v7952_v45, %v7946_v62 }
 0xabd   :  { %3726 = vrot.lane.b32.xlu0 %v7956_v3, %s4620_s8 }
 0xabe   :  { %v3705_v57 = vpop.permute.xlu1 %3704  ;;  %v3707_v27 = vpop.permute.xlu0 %3706 }
 0xabf   :  { %v7964_v5 = vsub.f32 %v3674_v25, %v3705_v57  ;;  %v7966_v37 = vsub.f32 %v3675_v17, %v3707_v27  ;;  %v8040_v52 = vadd.f32 %v3705_v57, %v3674_v25  ;;  %v8042_v36 = vadd.f32 %v3707_v27, %v3675_v17  ;;  %v4585_v57 = vpop.eup %4584 }
 0xac0   :  { %v3631_v2 = vmul.f32 %v4585_v57, %v7844_v28 }
 0xac1   :  { %3728 = vrot.lane.b32.xlu1 %v7964_v5, %s4620_s8  ;;  %3730 = vrot.lane.b32.xlu0 %v7966_v37, %s4620_s8 }
 0xac5   :  { %3740 = vrot.lane.b32.xlu1 %v7976_v42, %s4621_s12  ;;  %3788 = vrot.lane.b32.xlu0 %v7978_v40, %s4624_s15 }
 0xac9   :  { %3790 = vrot.lane.b32.xlu1 %v7986_v61, %s4624_s15  ;;  %3792 = vrot.lane.b32.xlu0 %v7990_v22, %s4624_s15 }
 0xacd   :  { %3794 = vrot.lane.b32.xlu1 %v7998_v54, %s4624_s15  ;;  %3896 = vrot.lane.b32.xlu0 %v8000_v18, %s4625_s3 }
 0xad1   :  { %3898 = vrot.lane.b32.xlu1 %v8006_v41, %s4625_s3  ;;  %3900 = vrot.lane.b32.xlu0 %v8008_v32, %s4625_s3 }
 0xad5   :  { %3902 = vrot.lane.b32.xlu1 %v8014_v33, %s4625_s3  ;;  %4004 = vrot.lane.b32.xlu0 %v8016_v21, %s4620_s8 }
 0xad9   :  { %4006 = vrot.lane.b32.xlu1 %v8022_v1, %s4620_s8  ;;  %4008 = vrot.lane.b32.xlu0 %v8024_v60, %s4620_s8 }
 0xadd   :  { %4010 = vrot.lane.b32.xlu1 %v8034_v4, %s4620_s8  ;;  %3742 = vrot.lane.b32.xlu0 %v8032_v15, %s4621_s12 }
 0xae1   :  { %3744 = vrot.lane.b32.xlu1 %v8040_v52, %s4621_s12  ;;  %3746 = vrot.lane.b32.xlu0 %v8042_v36, %s4621_s12 }
 0xb2b   :  { %v3725_v26 = vpop.permute.xlu1 %3724 }
 0xb2c   :  { %v3752_v30 = vsel %vm1372_vm3, %v3629_v8, %v3725_v26 }
 0xb2f   :  { %v3727_v14 = vpop.permute.xlu0 %3726 }
 0xb30   :  { %v3753_v56 = vsel %vm1372_vm3, %v3631_v2, %v3727_v14 }
 0xb33   :  { %v3729_v29 = vpop.permute.xlu1 %3728  ;;  %v8053_v51 = vpop.permute.xlu0 %3730 }
 0xb34   :  { %v8056_v46 = vsel %vm1372_vm3, %v3633_v47, %v3729_v29 }
 0xb37   :  { %v3741_v62 = vpop.permute.xlu1 %3740  ;;  %v3789_v49 = vpop.permute.xlu0 %3788 }
 0xb38   :  { %v8059_v12 = vsel %vm2029_vm8, %v3752_v30, %v3741_v62  ;;  %v3800_v16 = vsel %vm1372_vm3, %v3789_v49, 0.0 }
 0xb39   :  { %3801 = vadd.xlane.f32.xlu1 %v3800_v16 }
 0xb3b   :  { %v3791_v44 = vpop.permute.xlu1 %3790  ;;  %v3793_v39 = vpop.permute.xlu0 %3792 }
 0xb3c   :  { %v3803_v45 = vsel %vm1372_vm3, %v3791_v44, 0.0  ;;  %v3806_v43 = vsel %vm1372_vm3, %v3793_v39, 0.0 }
 0xb3d   :  { %3804 = vadd.xlane.f32.xlu0 %v3803_v45 }
 0xb3f   :  { %v3795_v55 = vpop.permute.xlu1 %3794  ;;  %v3897_v59 = vpop.permute.xlu0 %3896 }
 0xb40   :  { %v3809_v11 = vsel %vm1372_vm3, %v3795_v55, 0.0  ;;  %v3908_v17 = vsel %vm1372_vm3, %v3897_v59, 0.0 }
 0xb41   :  { %3810 = vadd.xlane.f32.xlu1 %v3809_v11  ;;  %3807 = vadd.xlane.f32.xlu0 %v3806_v43 }
 0xb43   :  { %v3901_v34 = vpop.permute.xlu0 %3900  ;;  %v3899_v25 = vpop.permute.xlu1 %3898 }
 0xb44   :  { %v3911_v31 = vsel %vm1372_vm3, %v3899_v25, 0.0  ;;  %v3914_v7 = vsel %vm1372_vm3, %v3901_v34, 0.0 }
 0xb45   :  { %3909 = vadd.xlane.f32.xlu1 %v3908_v17 }
 0xb47   :  { %v4005_v48 = vpop.permute.xlu0 %4004  ;;  %v3903_v58 = vpop.permute.xlu1 %3902 }
 0xb48   :  { %v3917_v35 = vsel %vm1372_vm3, %v3903_v58, 0.0  ;;  %v4016_v53 = vsel %vm1372_vm3, %v4005_v48, 0.0 }
 0xb49   :  { %3912 = vadd.xlane.f32.xlu1 %v3911_v31 }
 0xb4b   :  { %v4009_v27 = vpop.permute.xlu0 %4008  ;;  %v4007_v6 = vpop.permute.xlu1 %4006 }
 0xb4c   :  { %v4022_v19 = vsel %vm1372_vm3, %v4009_v27, 0.0 }
 0xb4d   :  { %3915 = vadd.xlane.f32.xlu1 %v3914_v7 }
 0xb4f   :  { %v3743_v24 = vpop.permute.xlu0 %3742  ;;  %v4011_v9 = vpop.permute.xlu1 %4010 }
 0xb50   :  { %v8073_v0 = vsel %vm2029_vm8, %v3753_v56, %v3743_v24  ;;  %v4025_v28 = vsel %vm1372_vm3, %v4011_v9, 0.0 }
 0xb51   :  { %3918 = vadd.xlane.f32.xlu1 %v3917_v35 }
 0xb53   :  { %v8078_v20 = vpop.permute.xlu1 %3744  ;;  %v8080_v23 = vpop.permute.xlu0 %3746 }
 0xb55   :  { %4017 = vadd.xlane.f32.xlu1 %v4016_v53 }
 0xb59   :  { %4023 = vadd.xlane.f32.xlu1 %v4022_v19 }
 0xb5d   :  { %4026 = vadd.xlane.f32.xlu1 %v4025_v28 }
 0xbc6   :  { %v3802_v38 = vpop.xlane.xlu1 %3801 }
 0xbc7   :  { %4586 = vrcp.f32 %v3802_v38 }
 0xbca   :  { %v3805_v8 = vpop.xlane.xlu0 %3804 }
 0xbcb   :  { %4588 = vrcp.f32 %v3805_v8 }
 0xbce   :  { %v3808_v26 = vpop.xlane.xlu0 %3807  ;;  %v3811_v30 = vpop.xlane.xlu1 %3810 }
 0xbcf   :  { %4590 = vrcp.f32 %v3808_v26 }
 0xbd0   :  { %4592 = vrcp.f32 %v3811_v30 }
 0xbd1   :  { %v4587_v50 = vpop.eup %4586 }
 0xbd2   :  { %v3813_v14 = vmul.f32 %v4587_v50, %v7978_v40  ;;  %v3910_v44 = vpop.xlane.xlu1 %3909 }
 0xbd4   :  { %3824 = vrot.lane.b32.xlu0 %v3813_v14, %s4624_s15 }
 0xbd5   :  { %v4589_v47 = vpop.eup %4588 }
 0xbd6   :  { %v3815_v29 = vmul.f32 %v4589_v47, %v7986_v61  ;;  %v3913_v45 = vpop.xlane.xlu1 %3912 }
 0xbd7   :  { %4594 = vrcp.f32 %v3913_v45 }
 0xbd8   :  { %3826 = vrot.lane.b32.xlu1 %v3815_v29, %s4624_s15 }
 0xbd9   :  { %v4591_v62 = vpop.eup %4590 }
 0xbda   :  { %v3817_v49 = vmul.f32 %v4591_v62, %v7990_v22  ;;  %v4593_v16 = vpop.eup %4592  ;;  %v3916_v40 = vpop.xlane.xlu1 %3915  ;;  %v4019_v22 = vsel %vm1372_vm3, %v4007_v6, 0.0 }
 0xbdb   :  { %v3819_v39 = vmul.f32 %v4593_v16, %v7998_v54 }
 0xbdc   :  { %3828 = vrot.lane.b32.xlu1 %v3817_v49, %s4624_s15 }
 0xbde   :  { %v3919_v61 = vpop.xlane.xlu1 %3918 }
 0xbdf   :  { %4596 = vrcp.f32 %v3919_v61 }
 0xbe0   :  { %3830 = vrot.lane.b32.xlu1 %v3819_v39, %s4624_s15  ;;  %4598 = vrcp.f32 %v3910_v44 }
 0xbe1   :  { %v4595_v54 = vpop.eup %4594  ;;  %4600 = vrcp.f32 %v3916_v40 }
 0xbe2   :  { %v3923_v55 = vmul.f32 %v4595_v54, %v8006_v41  ;;  %v4018_v17 = vpop.xlane.xlu1 %4017 }
 0xbe3   :  { %4602 = vrcp.f32 %v4018_v17 }
 0xbe4   :  { %3838 = vrot.lane.b32.xlu1 %v7956_v3, %s4622_s13 }
 0xbe6   :  { %v4024_v25 = vpop.xlane.xlu1 %4023 }
 0xbe7   :  { %4604 = vrcp.f32 %v4024_v25 }
 0xbe8   :  { %3840 = vrot.lane.b32.xlu1 %v7964_v5, %s4622_s13 }
 0xbe9   :  { %v4597_v59 = vpop.eup %4596 }
 0xbea   :  { %v3927_v43 = vmul.f32 %v4597_v59, %v8014_v33  ;;  %v4599_v11 = vpop.eup %4598 }
 0xbeb   :  { %v3921_v41 = vmul.f32 %v4599_v11, %v8000_v18  ;;  %v4601_v33 = vpop.eup %4600 }
 0xbec   :  { %3842 = vrot.lane.b32.xlu1 %v7966_v37, %s4622_s13  ;;  %v3925_v34 = vmul.f32 %v4601_v33, %v8008_v32 }
 0xbed   :  { %v4603_v18 = vpop.eup %4602 }
 0xbee   :  { %v4029_v32 = vmul.f32 %v4603_v18, %v8016_v21  ;;  %v4027_v21 = vpop.xlane.xlu1 %4026 }
 0xbf0   :  { %3848 = vrot.lane.b32.xlu1 %v7976_v42, %s4623_s14 }
 0xbf1   :  { %v4605_v48 = vpop.eup %4604 }
 0xbf2   :  { %v4033_v31 = vmul.f32 %v4605_v48, %v8024_v60 }
 0xbf3   :  { %4020 = vadd.xlane.f32.xlu0 %v4019_v22 }
 0xbf4   :  { %3850 = vrot.lane.b32.xlu1 %v8032_v15, %s4623_s14 }
 0xbf8   :  { %3854 = vrot.lane.b32.xlu1 %v8042_v36, %s4623_s14 }
 0xbfc   :  { %3934 = vrot.lane.b32.xlu1 %v3923_v55, %s4625_s3 }
 0xc00   :  { %3938 = vrot.lane.b32.xlu1 %v3927_v43, %s4625_s3 }
 0xc04   :  { %3946 = vrot.lane.b32.xlu1 %v7956_v3, %s4626_s16 }
 0xc08   :  { %3950 = vrot.lane.b32.xlu1 %v7966_v37, %s4626_s16 }
 0xc09   :  { %3836 = vrot.lane.b32.xlu0 %v7940_v10, %s4622_s13 }
 0xc0c   :  { %3958 = vrot.lane.b32.xlu1 %v8032_v15, %s4627_s17 }
 0xc0d   :  { %3852 = vrot.lane.b32.xlu0 %v8040_v52, %s4623_s14 }
 0xc10   :  { %3962 = vrot.lane.b32.xlu1 %v8042_v36, %s4627_s17 }
 0xc11   :  { %3932 = vrot.lane.b32.xlu0 %v3921_v41, %s4625_s3 }
 0xc15   :  { %3936 = vrot.lane.b32.xlu0 %v3925_v34, %s4625_s3 }
 0xc19   :  { %3944 = vrot.lane.b32.xlu0 %v7940_v10, %s4626_s16 }
 0xc1d   :  { %3948 = vrot.lane.b32.xlu0 %v7964_v5, %s4626_s16 }
 0xc21   :  { %3956 = vrot.lane.b32.xlu0 %v7976_v42, %s4627_s17 }
 0xc25   :  { %3960 = vrot.lane.b32.xlu0 %v8040_v52, %s4627_s17 }
 0xc29   :  { %4040 = vrot.lane.b32.xlu0 %v4029_v32, %s4620_s8 }
 0xc2d   :  { %4044 = vrot.lane.b32.xlu0 %v4033_v31, %s4620_s8 }
 0xc31   :  { %4052 = vrot.lane.b32.xlu0 %v7940_v10, %s4628_s1 }
 0xc35   :  { %4056 = vrot.lane.b32.xlu0 %v7964_v5, %s4628_s1 }
 0xc39   :  { %4064 = vrot.lane.b32.xlu0 %v7976_v42, %s4629_s18 }
 0xc3d   :  { %4068 = vrot.lane.b32.xlu0 %v8040_v52, %s4629_s18 }
 0xc46   :  { %v3825_v56 = vpop.permute.xlu0 %3824 }
 0xc4a   :  { %v3827_v57 = vpop.permute.xlu1 %3826 }
 0xc4e   :  { %v3829_v27 = vpop.permute.xlu1 %3828 }
 0xc52   :  { %v3831_v7 = vpop.permute.xlu1 %3830 }
 0xc56   :  { %v3839_v2 = vpop.permute.xlu1 %3838 }
 0xc5a   :  { %v3841_v60 = vpop.permute.xlu1 %3840 }
 0xc5b   :  { %v3862_v52 = vsel %vm1372_vm3, %v3829_v27, %v3841_v60 }
 0xc5e   :  { %v3843_v58 = vpop.permute.xlu1 %3842 }
 0xc62   :  { %v3849_v24 = vpop.permute.xlu1 %3848 }
 0xc66   :  { %v3851_v10 = vpop.permute.xlu1 %3850 }
 0xc6a   :  { %v3855_v9 = vpop.permute.xlu1 %3854 }
 0xc6e   :  { %v3935_v30 = vpop.permute.xlu1 %3934 }
 0xc72   :  { %v3939_v29 = vpop.permute.xlu1 %3938 }
 0xc76   :  { %v3947_v49 = vpop.permute.xlu1 %3946 }
 0xc77   :  { %v3969_v59 = vsel %vm1372_vm3, %v3935_v30, %v3947_v49 }
 0xc7a   :  { %v3951_v45 = vpop.permute.xlu1 %3950 }
 0xc7b   :  { %v3971_v41 = vsel %vm1372_vm3, %v3939_v29, %v3951_v45 }
 0xc7e   :  { %v3959_v22 = vpop.permute.xlu1 %3958 }
 0xc7f   :  { %v3973_v43 = vsel %vm2029_vm8, %v3969_v59, %v3959_v22 }
 0xc80   :  { %v4021_v35 = vpop.xlane.xlu0 %4020 }
 0xc81   :  { %4606 = vrcp.f32 %v4021_v35 }
 0xc82   :  { %4608 = vrcp.f32 %v4027_v21  ;;  %v3963_v11 = vpop.permute.xlu1 %3962 }
 0xc83   :  { %v3975_v34 = vsel %vm2029_vm8, %v3971_v41, %v3963_v11  ;;  %4610 = vrcp.f32 %v7900_v13 }
 0xc84   :  { %v3837_v5 = vpop.permute.xlu0 %3836 }
 0xc85   :  { %v3860_v6 = vsel %vm1372_vm3, %v3825_v56, %v3837_v5 }
 0xc86   :  { %v3864_v42 = vsel %vm2029_vm8, %v3860_v6, %v3849_v24 }
 0xc87   :  { %4088 = vrot.lane.b32.xlu0 %v3864_v42, %s4630_s19 }
 0xc88   :  { %v3853_v53 = vpop.permute.xlu0 %3852 }
 0xc89   :  { %v3866_v19 = vsel %vm2029_vm8, %v3862_v52, %v3853_v53 }
 0xc8b   :  { %v4607_v28 = vpop.eup %4606  ;;  %4092 = vrot.lane.b32.xlu0 %v3866_v19, %s4630_s19 }
 0xc8c   :  { %v3933_v38 = vpop.permute.xlu0 %3932  ;;  %v4031_v8 = vmul.f32 %v4607_v28, %v8022_v1  ;;  %v4609_v26 = vpop.eup %4608  ;;  %v3758_v28 = vsel %vm2029_vm8, %v8056_v46, %v8078_v20 }
 0xc8d   :  { %v4035_v14 = vmul.f32 %v4609_v26, %v8034_v4  ;;  %v4611_v20 = vpop.eup %4610 }
 0xc8e   :  { %4042 = vrot.lane.b32.xlu1 %v4031_v8, %s4620_s8 }
 0xc90   :  { %v3937_v50 = vpop.permute.xlu0 %3936 }
 0xc92   :  { %4046 = vrot.lane.b32.xlu1 %v4035_v14, %s4620_s8 }
 0xc94   :  { %v3945_v47 = vpop.permute.xlu0 %3944 }
 0xc95   :  { %v3968_v1 = vsel %vm1372_vm3, %v3933_v38, %v3945_v47  ;;  %v3635_v47 = vmul.f32 %v4611_v20, %v7850_v63 }
 0xc96   :  { %4054 = vrot.lane.b32.xlu1 %v7956_v3, %s4628_s1 }
 0xc98   :  { %v3949_v62 = vpop.permute.xlu0 %3948 }
 0xc99   :  { %v3970_v4 = vsel %vm1372_vm3, %v3937_v50, %v3949_v62 }
 0xc9a   :  { %4058 = vrot.lane.b32.xlu1 %v7966_v37, %s4628_s1  ;;  %v3861_v37 = vsel %vm1372_vm3, %v3827_v57, %v3839_v2 }
 0xc9b   :  { %v3865_v61 = vsel %vm2029_vm8, %v3861_v37, %v3851_v10 }
 0xc9c   :  { %v3957_v16 = vpop.permute.xlu0 %3956 }
 0xc9d   :  { %v3972_v44 = vsel %vm2029_vm8, %v3968_v1, %v3957_v16  ;;  %v3755_v1 = vsel %vm1372_vm3, %v3635_v47, %v8053_v51 }
 0xc9e   :  { %4066 = vrot.lane.b32.xlu1 %v8032_v15, %s4629_s18  ;;  %4104 = vrot.lane.b32.xlu0 %v3972_v44, %s4618_s11  ;;  %v3863_v15 = vsel %vm1372_vm3, %v3831_v7, %v3843_v58  ;;  %v3759_v44 = vsel %vm2029_vm8, %v3755_v1, %v8080_v23 }
 0xc9f   :  { %v3867_v55 = vsel %vm2029_vm8, %v3863_v15, %v3855_v9 }
 0xca0   :  { %v3961_v39 = vpop.permute.xlu0 %3960 }
 0xca1   :  { %v3974_v3 = vsel %vm2029_vm8, %v3970_v4, %v3961_v39 }
 0xca2   :  { %4070 = vrot.lane.b32.xlu1 %v8042_v36, %s4629_s18  ;;  %4108 = vrot.lane.b32.xlu0 %v3974_v3, %s4618_s11 }
 0xca4   :  { %v4041_v40 = vpop.permute.xlu0 %4040 }
 0xca6   :  { %4090 = vrot.lane.b32.xlu1 %v3865_v61, %s4630_s19 }
 0xca8   :  { %v4045_v54 = vpop.permute.xlu0 %4044 }
 0xcaa   :  { %4094 = vrot.lane.b32.xlu1 %v3867_v55, %s4630_s19 }
 0xcac   :  { %v4053_v36 = vpop.permute.xlu0 %4052 }
 0xcad   :  { %v4076_v17 = vsel %vm1372_vm3, %v4041_v40, %v4053_v36 }
 0xcae   :  { %4106 = vrot.lane.b32.xlu1 %v3973_v43, %s4618_s11 }
 0xcb0   :  { %v4057_v33 = vpop.permute.xlu0 %4056 }
 0xcb1   :  { %v4078_v32 = vsel %vm1372_vm3, %v4045_v54, %v4057_v33 }
 0xcb2   :  { %4110 = vrot.lane.b32.xlu1 %v3975_v34, %s4618_s11 }
 0xcb4   :  { %v4065_v25 = vpop.permute.xlu0 %4064 }
 0xcb5   :  { %v4080_v18 = vsel %vm2029_vm8, %v4076_v17, %v4065_v25 }
 0xcb6   :  { %4120 = vrot.lane.b32.xlu0 %v4080_v18, %s4631_s20 }
 0xcb8   :  { %v4069_v48 = vpop.permute.xlu0 %4068 }
 0xcb9   :  { %v4082_v31 = vsel %vm2029_vm8, %v4078_v32, %v4069_v48 }
 0xcba   :  { %4124 = vrot.lane.b32.xlu0 %v4082_v31, %s4631_s20 }
 0xcf9   :  { %v4089_v56 = vpop.permute.xlu0 %4088 }
 0xcfa   :  { %v4132_v52 = vsel %vm3537_vm9, %v8059_v12, %v4089_v56 }
 0xcfd   :  { %v4093_v5 = vpop.permute.xlu0 %4092 }
 0xcfe   :  { %v4134_v38 = vsel %vm3537_vm9, %v3758_v28, %v4093_v5 }
 0xd00   :  { %v4043_v21 = vpop.permute.xlu1 %4042 }
 0xd04   :  { %v4047_v57 = vpop.permute.xlu1 %4046 }
 0xd08   :  { %v4055_v27 = vpop.permute.xlu1 %4054 }
 0xd09   :  { %v4077_v2 = vsel %vm1372_vm3, %v4043_v21, %v4055_v27 }
 0xd0c   :  { %v4059_v7 = vpop.permute.xlu1 %4058 }
 0xd0d   :  { %v4079_v24 = vsel %vm1372_vm3, %v4047_v57, %v4059_v7 }
 0xd10   :  { %v4067_v60 = vpop.permute.xlu1 %4066  ;;  %v4105_v6 = vpop.permute.xlu0 %4104 }
 0xd11   :  { %v4081_v58 = vsel %vm2029_vm8, %v4077_v2, %v4067_v60  ;;  %v4136_v53 = vsel %vm3554_vm10, %v4132_v52, %v4105_v6 }
 0xd12   :  { %4122 = vrot.lane.b32.xlu1 %v4081_v58, %s4631_s20 }
 0xd14   :  { %v4071_v35 = vpop.permute.xlu1 %4070  ;;  %v4109_v42 = vpop.permute.xlu0 %4108 }
 0xd15   :  { %v4083_v10 = vsel %vm2029_vm8, %v4079_v24, %v4071_v35  ;;  %v4138_v8 = vsel %vm3554_vm10, %v4134_v38, %v4109_v42 }
 0xd16   :  { %4126 = vrot.lane.b32.xlu1 %v4083_v10, %s4631_s20 }
 0xd18   :  { %v4091_v30 = vpop.permute.xlu1 %4090 }
 0xd19   :  { %v4133_v29 = vsel %vm3537_vm9, %v8073_v0, %v4091_v30 }
 0xd1c   :  { %v4095_v50 = vpop.permute.xlu1 %4094 }
 0xd1d   :  { %v4135_v63 = vsel %vm3537_vm9, %v3759_v44, %v4095_v50 }
 0xd20   :  { %v4107_v46 = vpop.permute.xlu1 %4106 }
 0xd21   :  { %v4137_v62 = vsel %vm3554_vm10, %v4133_v29, %v4107_v46 }
 0xd24   :  { %v4111_v14 = vpop.permute.xlu1 %4110 }
 0xd25   :  { %v4139_v13 = vsel %vm3554_vm10, %v4135_v63, %v4111_v14 }
 0xd28   :  { %v4121_v19 = vpop.permute.xlu0 %4120 }
 0xd29   :  { %v4140_v9 = vsel %vm3571_vm11, %v4136_v53, %v4121_v19 }
 0xd2a   :  { %4160 = vst.msk [vmem:[%s8239_s10 + $0x40] sm:$0xff] %vm1300_vm7, %v4140_v9 }
 0xd2c   :  { %v4125_v26 = vpop.permute.xlu0 %4124 }
 0xd2d   :  { %v4142_v12 = vsel %vm3571_vm11, %v4138_v8, %v4125_v26 }
 0xd2e   :  { %4162 = vst.msk [vmem:[%s8239_s10 + $0x90] sm:$0xff] %vm1300_vm7, %v4142_v12 }
 0xd84   :  { %v4123_v49 = vpop.permute.xlu1 %4122 }
 0xd85   :  { %v4141_v16 = vsel %vm3571_vm11, %v4137_v62, %v4123_v49 }
 0xd86   :  { %4161 = vst.msk [vmem:[%s8239_s10 + $0x48] sm:$0xff] %vm1300_vm7, %v4141_v16 }
 0xd88   :  { %v4127_v0 = vpop.permute.xlu1 %4126 }
 0xd89   :  { %v4143_v4 = vsel %vm3571_vm11, %v4139_v13, %v4127_v0 }
 0xd8a   :  { %4163 = vst.msk [vmem:[%s8239_s10 + $0x98] sm:$0xff] %vm1300_vm7, %v4143_v4 }

</bundles_post_ra>
